<compile_context>
chip_gen: v7x
topology: tpu7x:2x2x1
jax: 0.10.0
libtpu: 0.0.40
codegen_flags: <defaults>
</compile_context>

<pallas_src>
import functools
import math

import jax
import jax.numpy as jnp
from jax import lax
from jax.experimental import pallas as pl
from jax.experimental.pallas import tpu as pltpu


def _mha_kernel(x_ref, wq_ref, wkv_ref, wo_ref, bo_ref, o_ref, kv_ref,
                *, n_heads, dk, tq):
    # x_ref  : (1, L, C)  bf16, full sequence for one batch element
    # wq_ref : (C, C)     bf16, Wq.T with 1/sqrt(dk) pre-folded
    # wkv_ref: (C, 2C)    bf16, [Wk.T | Wv.T]
    # wo_ref : (C, C)     bf16, Wo.T
    # bo_ref : (1, C)     f32
    # o_ref  : (1, TQ, C) f32
    # kv_ref : (L, 2C)    bf16 VMEM scratch holding the K/V projections
    C = n_heads * dk
    x = x_ref[0]                                                   # [L, C] bf16

    # Fused K/V projection for the full sequence: one lane-dense matmul.
    kv = jnp.dot(x, wkv_ref[...], preferred_element_type=jnp.float32)
    kv_ref[...] = kv.astype(jnp.bfloat16)

    # Q projection only for this query tile (scale already folded into Wq).
    row0 = pl.multiple_of(pl.program_id(1) * tq, tq)
    xq = x_ref[0, pl.ds(row0, tq), :]                              # [TQ, C] bf16
    q = jnp.dot(xq, wq_ref[...],
                preferred_element_type=jnp.float32).astype(jnp.bfloat16)

    ctx_heads = []
    for h in range(n_heads):                                       # static unroll
        qh = q[:, h * dk:(h + 1) * dk]                             # [TQ, dk] bf16
        kh = kv_ref[:, h * dk:(h + 1) * dk]                        # [L, dk]  bf16
        vh = kv_ref[:, C + h * dk:C + (h + 1) * dk]                # [L, dk]  bf16

        # scores = (q*scale) @ k.T   (contract dk, no explicit transpose)
        s = lax.dot_general(qh, kh, (((1,), (1,)), ((), ())),
                            preferred_element_type=jnp.float32)    # [TQ, L] f32
        s = s - jnp.max(s, axis=-1, keepdims=True)
        p = jnp.exp(s)                                             # f32 softmax math
        denom = jnp.sum(p, axis=-1, keepdims=True)                 # [TQ, 1]

        # Deferred normalization: PV on un-normalized probs, rescale ctx.
        ctx = jnp.dot(p.astype(jnp.bfloat16), vh,
                      preferred_element_type=jnp.float32)          # [TQ, dk]
        ctx = ctx * pl.reciprocal(denom, approx=True)
        ctx_heads.append(ctx.astype(jnp.bfloat16))

    ctx_all = jnp.concatenate(ctx_heads, axis=-1)                  # [TQ, C] bf16
    out = jnp.dot(ctx_all, wo_ref[...],
                  preferred_element_type=jnp.float32)              # [TQ, C] f32
    o_ref[0] = (out + bo_ref[...]).astype(o_ref.dtype)


def prepare_mha_params(Wq, Wk, Wv, Wo, bo, *, n_heads):
    """One-time weight packing (call at model-init time, not per forward).

    PyTorch nn.Linear stores W as [out, in]; y = x @ W.T.
    """
    C = Wq.shape[0]
    dk = C // n_heads
    scale = dk ** (-0.5)
    wq = (Wq.T * scale).astype(jnp.bfloat16)                       # [C, C]
    wkv = jnp.concatenate([Wk.T, Wv.T], axis=1).astype(jnp.bfloat16)  # [C, 2C]
    wo = Wo.T.astype(jnp.bfloat16)                                 # [C, C]
    bo2d = bo.reshape(1, C).astype(jnp.float32)
    return wq, wkv, wo, bo2d


def mha_forward(x, wq, wkv, wo, bo2d, *, n_heads, tq=128):
    """x: [B, L, C] (any float dtype); packed params from prepare_mha_params."""
    B, L, C = x.shape
    dk = C // n_heads
    assert C % n_heads == 0 and C % 128 == 0 and L % 8 == 0
    tq = min(tq, L)
    assert L % tq == 0
    nq = L // tq

    x_bf = x.astype(jnp.bfloat16)
    kernel = functools.partial(_mha_kernel, n_heads=n_heads, dk=dk, tq=tq)

    flops = B * (2 * L * C * 3 * C          # qkv projections
                 + 4 * L * L * C            # scores + PV
                 + 2 * L * C * C)           # output projection
    cost = pl.CostEstimate(
        flops=flops,
        transcendentals=B * n_heads * L * L,
        bytes_accessed=(x_bf.size * 2
                        + (wq.size + wkv.size + wo.size) * 2
                        + bo2d.size * 4
                        + B * L * C * 4),
    )

    return pl.pallas_call(
        kernel,
        out_shape=jax.ShapeDtypeStruct((B, L, C), jnp.float32),
        grid_spec=pltpu.PrefetchScalarGridSpec(
            num_scalar_prefetch=0,
            grid=(B, nq),
            in_specs=[
                pl.BlockSpec((1, L, C), lambda b, qi: (b, 0, 0)),      # x (resident per batch)
                pl.BlockSpec((C, C), lambda b, qi: (0, 0)),            # Wq*scale (resident)
                pl.BlockSpec((C, 2 * C), lambda b, qi: (0, 0)),        # [Wk|Wv]  (resident)
                pl.BlockSpec((C, C), lambda b, qi: (0, 0)),            # Wo       (resident)
                pl.BlockSpec((1, C), lambda b, qi: (0, 0)),            # bias     (resident)
            ],
            out_specs=pl.BlockSpec((1, tq, C), lambda b, qi: (b, qi, 0)),
            scratch_shapes=[pltpu.VMEM((L, 2 * C), jnp.bfloat16)],     # K/V projections
        ),
        compiler_params=pltpu.CompilerParams(
            dimension_semantics=("parallel", "parallel"),
        ),
        cost_estimate=cost,
    )(x_bf, wq, wkv, wo, bo2d)


if __name__ == "__main__":
    d_model = 128     # lane-dense last dim (multiple of 128)
    n_heads = 4
    seq_len = 128
    batch = 2
    dk = d_model // n_heads

    key = jax.random.PRNGKey(0)
    kx, kq, kk, kv, ko, kb = jax.random.split(key, 6)
    x = jax.random.normal(kx, (batch, seq_len, d_model), dtype=jnp.float32)

    # PyTorch nn.Linear weight layout: [out_features, in_features]; y = x @ W.T
    Wq = jax.random.normal(kq, (d_model, d_model), jnp.float32) / math.sqrt(d_model)
    Wk = jax.random.normal(kk, (d_model, d_model), jnp.float32) / math.sqrt(d_model)
    Wv = jax.random.normal(kv, (d_model, d_model), jnp.float32) / math.sqrt(d_model)
    Wo = jax.random.normal(ko, (d_model, d_model), jnp.float32) / math.sqrt(d_model)
    bo = jax.random.normal(kb, (d_model,), jnp.float32) * 0.1

    # One-time weight packing (hoisted out of the forward path).
    wq_p, wkv_p, wo_p, bo_p = prepare_mha_params(Wq, Wk, Wv, Wo, bo, n_heads=n_heads)

    out = mha_forward(x, wq_p, wkv_p, wo_p, bo_p, n_heads=n_heads)
    out = jax.block_until_ready(out)

    # Pure-JAX f32 reference mirroring the PyTorch forward exactly.
    def reference(x):
        B, L, C = x.shape
        scale = dk ** (-0.5)

        def proj(W):
            return (x @ W.T).reshape(B, L, n_heads, dk).transpose(0, 2, 1, 3)

        q, k, v = proj(Wq), proj(Wk), proj(Wv)
        att = jnp.einsum("bhld,bhmd->bhlm", q, k) * scale
        att = jax.nn.softmax(att, axis=-1)
        o = jnp.einsum("bhlm,bhmd->bhld", att, v)
        o = o.transpose(0, 2, 1, 3).reshape(B, L, C)
        return o @ Wo.T + bo

    ref = reference(x)
    assert out.shape == ref.shape
    max_diff = float(jnp.max(jnp.abs(out - ref)))
    # bf16 matmul operands with f32 accumulation vs. an all-f32 reference.
    assert jnp.allclose(out, ref, atol=4e-2, rtol=4e-2), (
        f"mismatch vs reference, max|diff|={max_diff}"
    )

    print("KERNEL_OK")
</pallas_src>

<mosaic_0001>
module attributes {stable_mosaic.version = 11 : i64} {
  func.func @_mha_kernel(%arg0: i32, %arg1: i32, %arg2: memref<1x128x128xbf16, #tpu.memory_space<vmem>>, %arg3: memref<128x128xbf16, #tpu.memory_space<vmem>>, %arg4: memref<128x256xbf16, #tpu.memory_space<vmem>>, %arg5: memref<128x128xbf16, #tpu.memory_space<vmem>>, %arg6: memref<1x128xf32, #tpu.memory_space<vmem>>, %arg7: memref<1x128x128xf32, #tpu.memory_space<vmem>>, %arg8: memref<128x256xbf16, #tpu.memory_space<vmem>>) attributes {dimension_semantics = [#tpu.dimension_semantics<parallel>, #tpu.dimension_semantics<parallel>], iteration_bounds = array<i64: 2, 1>, scalar_prefetch = 0 : i64, scratch_operands = 1 : i64, tpu.core_type = #tpu.core_type<tc>, window_params = [{transform_indices = @transform_0, window_bounds = array<i64: 1, 128, 128>}, {pipeline_mode = #tpu.pipeline_mode<synchronous>, transform_indices = @transform_1, window_bounds = array<i64: 128, 128>}, {pipeline_mode = #tpu.pipeline_mode<synchronous>, transform_indices = @transform_2, window_bounds = array<i64: 128, 256>}, {pipeline_mode = #tpu.pipeline_mode<synchronous>, transform_indices = @transform_3, window_bounds = array<i64: 128, 128>}, {pipeline_mode = #tpu.pipeline_mode<synchronous>, transform_indices = @transform_4, window_bounds = array<i64: 1, 128>}, {transform_indices = @transform_5, window_bounds = array<i64: 1, 128, 128>}]} {
    %c0 = arith.constant 0 : index
    %c0_0 = arith.constant 0 : index
    %c0_1 = arith.constant 0 : index
    %0 = vector.load %arg2[%c0, %c0_0, %c0_1] : memref<1x128x128xbf16, #tpu.memory_space<vmem>>, vector<1x128x128xbf16>
    %1 = vector.shape_cast %0 : vector<1x128x128xbf16> to vector<128x128xbf16>
    %c0_2 = arith.constant 0 : index
    %c0_3 = arith.constant 0 : index
    %2 = vector.load %arg4[%c0_2, %c0_3] : memref<128x256xbf16, #tpu.memory_space<vmem>>, vector<128x256xbf16>
    %cst = arith.constant dense<0.000000e+00> : vector<128x256xf32>
    %3 = tpu.matmul %1, %2, %cst {dimension_numbers = #tpu.dot_dimension_numbers<[1], [0], [0], [1], [0, 0, 1, 1], [], []>} : vector<128x128xbf16>, vector<128x256xbf16>, vector<128x256xf32> -> vector<128x256xf32>
    %4 = arith.truncf %3 : vector<128x256xf32> to vector<128x256xbf16>
    %c0_4 = arith.constant 0 : index
    %c0_5 = arith.constant 0 : index
    %5 = vector.load %arg8[%c0_4, %c0_5] : memref<128x256xbf16, #tpu.memory_space<vmem>>, vector<128x256xbf16>
    tpu.vector_store %arg8[%c0_4, %c0_5], %4 {strides = array<i32>} : memref<128x256xbf16, #tpu.memory_space<vmem>>, vector<128x256xbf16>,
    %c128_i32 = arith.constant 128 : i32
    %6 = arith.muli %arg1, %c128_i32 : i32
    %7 = tpu.assume_multiple %6, 128 : i32
    %c0_6 = arith.constant 0 : index
    %8 = arith.index_cast %7 : i32 to index
    %c0_7 = arith.constant 0 : index
    %9 = vector.load %arg2[%c0_6, %8, %c0_7] : memref<1x128x128xbf16, #tpu.memory_space<vmem>>, vector<1x128x128xbf16>
    %10 = vector.shape_cast %9 : vector<1x128x128xbf16> to vector<128x128xbf16>
    %c0_8 = arith.constant 0 : index
    %c0_9 = arith.constant 0 : index
    %11 = vector.load %arg3[%c0_8, %c0_9] : memref<128x128xbf16, #tpu.memory_space<vmem>>, vector<128x128xbf16>
    %cst_10 = arith.constant dense<0.000000e+00> : vector<128x128xf32>
    %12 = tpu.matmul %10, %11, %cst_10 {dimension_numbers = #tpu.dot_dimension_numbers<[1], [0], [0], [1], [0, 0, 1, 1], [], []>} : vector<128x128xbf16>, vector<128x128xbf16>, vector<128x128xf32> -> vector<128x128xf32>
    %13 = arith.truncf %12 : vector<128x128xf32> to vector<128x128xbf16>
    %14 = vector.extract_strided_slice %13 {offsets = [0, 0], sizes = [128, 32], strides = [1, 1]} : vector<128x128xbf16> to vector<128x32xbf16>
    %c0_11 = arith.constant 0 : index
    %c0_12 = arith.constant 0 : index
    %15 = vector.load %arg8[%c0_11, %c0_12] : memref<128x256xbf16, #tpu.memory_space<vmem>>, vector<128x32xbf16>
    %c0_13 = arith.constant 0 : index
    %c128 = arith.constant 128 : index
    %16 = vector.load %arg8[%c0_13, %c128] : memref<128x256xbf16, #tpu.memory_space<vmem>>, vector<128x32xbf16>
    %cst_14 = arith.constant dense<0.000000e+00> : vector<128x128xf32>
    %17 = tpu.matmul %14, %15, %cst_14 {dimension_numbers = #tpu.dot_dimension_numbers<[1], [1], [0], [0], [0, 0, 1, 0], [], []>} : vector<128x32xbf16>, vector<128x32xbf16>, vector<128x128xf32> -> vector<128x128xf32>
    %cst_15 = arith.constant dense<0xFF800000> : vector<128xf32>
    %18 = vector.multi_reduction <maximumf>, %17, %cst_15 [1] : vector<128x128xf32> to vector<128xf32>
    %19 = vector.shape_cast %18 : vector<128xf32> to vector<128x1xf32>
    %20 = vector.broadcast %19 : vector<128x1xf32> to vector<128x128xf32>
    %21 = arith.subf %17, %20 : vector<128x128xf32>
    %22 = math.exp %21 : vector<128x128xf32>
    %cst_16 = arith.constant dense<0.000000e+00> : vector<128xf32>
    %23 = vector.multi_reduction <add>, %22, %cst_16 [1] : vector<128x128xf32> to vector<128xf32>
    %24 = vector.shape_cast %23 : vector<128xf32> to vector<128x1xf32>
    %25 = arith.truncf %22 : vector<128x128xf32> to vector<128x128xbf16>
    %cst_17 = arith.constant dense<0.000000e+00> : vector<128x32xf32>
    %26 = tpu.matmul %25, %16, %cst_17 {dimension_numbers = #tpu.dot_dimension_numbers<[1], [0], [0], [1], [0, 0, 1, 1], [], []>} : vector<128x128xbf16>, vector<128x32xbf16>, vector<128x32xf32> -> vector<128x32xf32>
    %27 = tpu.reciprocal %24 {approx = true} : vector<128x1xf32> -> vector<128x1xf32>
    %28 = vector.broadcast %27 : vector<128x1xf32> to vector<128x32xf32>
    %29 = arith.mulf %26, %28 : vector<128x32xf32>
    %30 = arith.truncf %29 : vector<128x32xf32> to vector<128x32xbf16>
    %31 = vector.extract_strided_slice %13 {offsets = [0, 32], sizes = [128, 32], strides = [1, 1]} : vector<128x128xbf16> to vector<128x32xbf16>
    %c0_18 = arith.constant 0 : index
    %c32 = arith.constant 32 : index
    %32 = vector.load %arg8[%c0_18, %c32] : memref<128x256xbf16, #tpu.memory_space<vmem>>, vector<128x32xbf16>
    %c0_19 = arith.constant 0 : index
    %c160 = arith.constant 160 : index
    %33 = vector.load %arg8[%c0_19, %c160] : memref<128x256xbf16, #tpu.memory_space<vmem>>, vector<128x32xbf16>
    %cst_20 = arith.constant dense<0.000000e+00> : vector<128x128xf32>
    %34 = tpu.matmul %31, %32, %cst_20 {dimension_numbers = #tpu.dot_dimension_numbers<[1], [1], [0], [0], [0, 0, 1, 0], [], []>} : vector<128x32xbf16>, vector<128x32xbf16>, vector<128x128xf32> -> vector<128x128xf32>
    %cst_21 = arith.constant dense<0xFF800000> : vector<128xf32>
    %35 = vector.multi_reduction <maximumf>, %34, %cst_21 [1] : vector<128x128xf32> to vector<128xf32>
    %36 = vector.shape_cast %35 : vector<128xf32> to vector<128x1xf32>
    %37 = vector.broadcast %36 : vector<128x1xf32> to vector<128x128xf32>
    %38 = arith.subf %34, %37 : vector<128x128xf32>
    %39 = math.exp %38 : vector<128x128xf32>
    %cst_22 = arith.constant dense<0.000000e+00> : vector<128xf32>
    %40 = vector.multi_reduction <add>, %39, %cst_22 [1] : vector<128x128xf32> to vector<128xf32>
    %41 = vector.shape_cast %40 : vector<128xf32> to vector<128x1xf32>
    %42 = arith.truncf %39 : vector<128x128xf32> to vector<128x128xbf16>
    %cst_23 = arith.constant dense<0.000000e+00> : vector<128x32xf32>
    %43 = tpu.matmul %42, %33, %cst_23 {dimension_numbers = #tpu.dot_dimension_numbers<[1], [0], [0], [1], [0, 0, 1, 1], [], []>} : vector<128x128xbf16>, vector<128x32xbf16>, vector<128x32xf32> -> vector<128x32xf32>
    %44 = tpu.reciprocal %41 {approx = true} : vector<128x1xf32> -> vector<128x1xf32>
    %45 = vector.broadcast %44 : vector<128x1xf32> to vector<128x32xf32>
    %46 = arith.mulf %43, %45 : vector<128x32xf32>
    %47 = arith.truncf %46 : vector<128x32xf32> to vector<128x32xbf16>
    %48 = vector.extract_strided_slice %13 {offsets = [0, 64], sizes = [128, 32], strides = [1, 1]} : vector<128x128xbf16> to vector<128x32xbf16>
    %c0_24 = arith.constant 0 : index
    %c64 = arith.constant 64 : index
    %49 = vector.load %arg8[%c0_24, %c64] : memref<128x256xbf16, #tpu.memory_space<vmem>>, vector<128x32xbf16>
    %c0_25 = arith.constant 0 : index
    %c192 = arith.constant 192 : index
    %50 = vector.load %arg8[%c0_25, %c192] : memref<128x256xbf16, #tpu.memory_space<vmem>>, vector<128x32xbf16>
    %cst_26 = arith.constant dense<0.000000e+00> : vector<128x128xf32>
    %51 = tpu.matmul %48, %49, %cst_26 {dimension_numbers = #tpu.dot_dimension_numbers<[1], [1], [0], [0], [0, 0, 1, 0], [], []>} : vector<128x32xbf16>, vector<128x32xbf16>, vector<128x128xf32> -> vector<128x128xf32>
    %cst_27 = arith.constant dense<0xFF800000> : vector<128xf32>
    %52 = vector.multi_reduction <maximumf>, %51, %cst_27 [1] : vector<128x128xf32> to vector<128xf32>
    %53 = vector.shape_cast %52 : vector<128xf32> to vector<128x1xf32>
    %54 = vector.broadcast %53 : vector<128x1xf32> to vector<128x128xf32>
    %55 = arith.subf %51, %54 : vector<128x128xf32>
    %56 = math.exp %55 : vector<128x128xf32>
    %cst_28 = arith.constant dense<0.000000e+00> : vector<128xf32>
    %57 = vector.multi_reduction <add>, %56, %cst_28 [1] : vector<128x128xf32> to vector<128xf32>
    %58 = vector.shape_cast %57 : vector<128xf32> to vector<128x1xf32>
    %59 = arith.truncf %56 : vector<128x128xf32> to vector<128x128xbf16>
    %cst_29 = arith.constant dense<0.000000e+00> : vector<128x32xf32>
    %60 = tpu.matmul %59, %50, %cst_29 {dimension_numbers = #tpu.dot_dimension_numbers<[1], [0], [0], [1], [0, 0, 1, 1], [], []>} : vector<128x128xbf16>, vector<128x32xbf16>, vector<128x32xf32> -> vector<128x32xf32>
    %61 = tpu.reciprocal %58 {approx = true} : vector<128x1xf32> -> vector<128x1xf32>
    %62 = vector.broadcast %61 : vector<128x1xf32> to vector<128x32xf32>
    %63 = arith.mulf %60, %62 : vector<128x32xf32>
    %64 = arith.truncf %63 : vector<128x32xf32> to vector<128x32xbf16>
    %65 = vector.extract_strided_slice %13 {offsets = [0, 96], sizes = [128, 32], strides = [1, 1]} : vector<128x128xbf16> to vector<128x32xbf16>
    %c0_30 = arith.constant 0 : index
    %c96 = arith.constant 96 : index
    %66 = vector.load %arg8[%c0_30, %c96] : memref<128x256xbf16, #tpu.memory_space<vmem>>, vector<128x32xbf16>
    %c0_31 = arith.constant 0 : index
    %c224 = arith.constant 224 : index
    %67 = vector.load %arg8[%c0_31, %c224] : memref<128x256xbf16, #tpu.memory_space<vmem>>, vector<128x32xbf16>
    %cst_32 = arith.constant dense<0.000000e+00> : vector<128x128xf32>
    %68 = tpu.matmul %65, %66, %cst_32 {dimension_numbers = #tpu.dot_dimension_numbers<[1], [1], [0], [0], [0, 0, 1, 0], [], []>} : vector<128x32xbf16>, vector<128x32xbf16>, vector<128x128xf32> -> vector<128x128xf32>
    %cst_33 = arith.constant dense<0xFF800000> : vector<128xf32>
    %69 = vector.multi_reduction <maximumf>, %68, %cst_33 [1] : vector<128x128xf32> to vector<128xf32>
    %70 = vector.shape_cast %69 : vector<128xf32> to vector<128x1xf32>
    %71 = vector.broadcast %70 : vector<128x1xf32> to vector<128x128xf32>
    %72 = arith.subf %68, %71 : vector<128x128xf32>
    %73 = math.exp %72 : vector<128x128xf32>
    %cst_34 = arith.constant dense<0.000000e+00> : vector<128xf32>
    %74 = vector.multi_reduction <add>, %73, %cst_34 [1] : vector<128x128xf32> to vector<128xf32>
    %75 = vector.shape_cast %74 : vector<128xf32> to vector<128x1xf32>
    %76 = arith.truncf %73 : vector<128x128xf32> to vector<128x128xbf16>
    %cst_35 = arith.constant dense<0.000000e+00> : vector<128x32xf32>
    %77 = tpu.matmul %76, %67, %cst_35 {dimension_numbers = #tpu.dot_dimension_numbers<[1], [0], [0], [1], [0, 0, 1, 1], [], []>} : vector<128x128xbf16>, vector<128x32xbf16>, vector<128x32xf32> -> vector<128x32xf32>
    %78 = tpu.reciprocal %75 {approx = true} : vector<128x1xf32> -> vector<128x1xf32>
    %79 = vector.broadcast %78 : vector<128x1xf32> to vector<128x32xf32>
    %80 = arith.mulf %77, %79 : vector<128x32xf32>
    %81 = arith.truncf %80 : vector<128x32xf32> to vector<128x32xbf16>
    %82 = tpu.concatenate %30, %47, %64, %81 in 1 : vector<128x32xbf16>, vector<128x32xbf16>, vector<128x32xbf16>, vector<128x32xbf16> -> vector<128x128xbf16>
    %c0_36 = arith.constant 0 : index
    %c0_37 = arith.constant 0 : index
    %83 = vector.load %arg5[%c0_36, %c0_37] : memref<128x128xbf16, #tpu.memory_space<vmem>>, vector<128x128xbf16>
    %cst_38 = arith.constant dense<0.000000e+00> : vector<128x128xf32>
    %84 = tpu.matmul %82, %83, %cst_38 {dimension_numbers = #tpu.dot_dimension_numbers<[1], [0], [0], [1], [0, 0, 1, 1], [], []>} : vector<128x128xbf16>, vector<128x128xbf16>, vector<128x128xf32> -> vector<128x128xf32>
    %c0_39 = arith.constant 0 : index
    %c0_40 = arith.constant 0 : index
    %85 = vector.load %arg6[%c0_39, %c0_40] : memref<1x128xf32, #tpu.memory_space<vmem>>, vector<1x128xf32>
    %86 = vector.broadcast %85 : vector<1x128xf32> to vector<128x128xf32>
    %87 = arith.addf %84, %86 : vector<128x128xf32>
    %c0_41 = arith.constant 0 : index
    %c0_42 = arith.constant 0 : index
    %c0_43 = arith.constant 0 : index
    %88 = vector.load %arg7[%c0_41, %c0_42, %c0_43] : memref<1x128x128xf32, #tpu.memory_space<vmem>>, vector<1x128x128xf32>
    %89 = vector.shape_cast %88 : vector<1x128x128xf32> to vector<128x128xf32>
    %90 = vector.shape_cast %87 : vector<128x128xf32> to vector<1x128x128xf32>
    tpu.vector_store %arg7[%c0_41, %c0_42, %c0_43], %90 {strides = array<i32>} : memref<1x128x128xf32, #tpu.memory_space<vmem>>, vector<1x128x128xf32>,
    return
  }
  func.func @transform_0(%arg0: i32, %arg1: i32) -> (i32, i32, i32) {
    %c0_i32 = arith.constant 0 : i32
    %c0_i32_0 = arith.constant 0 : i32
    %c0_i32_1 = arith.constant 0 : i32
    return %arg0, %c0_i32, %c0_i32_0 : i32, i32, i32
  }
  func.func @transform_1(%arg0: i32, %arg1: i32) -> (i32, i32) {
    %c0_i32 = arith.constant 0 : i32
    %c0_i32_0 = arith.constant 0 : i32
    %c0_i32_1 = arith.constant 0 : i32
    return %c0_i32, %c0_i32_0 : i32, i32
  }
  func.func @transform_2(%arg0: i32, %arg1: i32) -> (i32, i32) {
    %c0_i32 = arith.constant 0 : i32
    %c0_i32_0 = arith.constant 0 : i32
    %c0_i32_1 = arith.constant 0 : i32
    return %c0_i32, %c0_i32_0 : i32, i32
  }
  func.func @transform_3(%arg0: i32, %arg1: i32) -> (i32, i32) {
    %c0_i32 = arith.constant 0 : i32
    %c0_i32_0 = arith.constant 0 : i32
    %c0_i32_1 = arith.constant 0 : i32
    return %c0_i32, %c0_i32_0 : i32, i32
  }
  func.func @transform_4(%arg0: i32, %arg1: i32) -> (i32, i32) {
    %c0_i32 = arith.constant 0 : i32
    %c0_i32_0 = arith.constant 0 : i32
    %c0_i32_1 = arith.constant 0 : i32
    return %c0_i32, %c0_i32_0 : i32, i32
  }
  func.func @transform_5(%arg0: i32, %arg1: i32) -> (i32, i32, i32) {
    %c0_i32 = arith.constant 0 : i32
    %c0_i32_0 = arith.constant 0 : i32
    return %arg0, %arg1, %c0_i32 : i32, i32, i32
  }
}

</mosaic_0001>

<bundles_post_ra>
// kernel: tpu_custom_call.1
= control target key start
LH: loop header
LB: loop body
LE: loop exit
PB: predicated region body
PF: predicated region fallthrough
CT: control target
= control target key end

     0   :  { %s5904_s0 = inlined_call_operand.hbm [shape: bf16[2,128,128], index: 0, kind: input, shape index: {}]   ;;  %s5905_s1 = inlined_call_operand.hbm [shape: bf16[128,128], index: 1, kind: input, shape index: {}]   ;;  %s5906_s2 = inlined_call_operand.hbm [shape: bf16[128,256], index: 2, kind: input, shape index: {}]   ;;  %s5907_s3 = inlined_call_operand.hbm [shape: bf16[128,128], index: 3, kind: input, shape index: {}]   ;;  %s5908_s4 = inlined_call_operand.vmem [shape: f32[1,128], index: 4, kind: input, shape index: {}]   ;;  %s5909_s5 = inlined_call_operand.hbm [shape: f32[2,128,128], index: 5, kind: output, shape index: {}]  }
   0x1   :  { %5927 = sst [smem:[#allocation67_spill]] %s5905_s1 }
   0x2   :  { %10 = vsyncpa [#allocation4], 0 }
   0x3   :  { %12 = vsyncpa [#allocation4 + $0x1], 0 }
   0x4   :  { %13 = vsyncpa [#allocation7], 0 }
   0x5   :  { %14 = vsyncpa [#allocation10], 0 }
   0x6   :  { %15 = vsyncpa [#allocation5], 0 }
   0x7   :  { %17 = vsyncpa [#allocation5 + $0x1], 0  ;;  %s4414_s18 = smov 0   ;;  %s4416_s19 = smov 0  }
   0x8   :  { %s4418_s20 = smov 0   ;;  %s4420_s21 = smov 0  }
   0x9   :  { %s4422_s22 = smov 0   ;;  %s4424_s23 = smov 0  }
   0xa LB: > { %s3116_s24 = sadd.s32 4294967295, %s4367_s23   ;;  %s3117_s25 = sadd.s32 4294967294, %s4367_s23   ;;  %s4367_s23 = sphi %s4424_s23, %s23_s23   ;;  %s4363_s22 = sphi %s4422_s22, %s6053_s22   ;;  %s4359_s21 = sphi %s4420_s21, %s6052_s21   ;;  %s4355_s20 = sphi %s4418_s20, %s6051_s20   ;;  %s4351_s19 = sphi %s4416_s19, %s6050_s19   ;;  %s4347_s18 = sphi %s4414_s18, %s6049_s18  }
   0xb   : > { %p55_p0 = scmp.ne.s32.totalorder %s4351_s19, %s4347_s18  ;;  %p4448_p1 = scmp.eq.s32.totalorder %s3116_s24, 0 }
   0xc   : > { %p4452_p2 = scmp.eq.s32.totalorder %s3116_s24, 1  ;;  %p171_p3 = scmp.eq.s32.totalorder %s3117_s25, 1 }
   0xd   : > { %s5928_s26 = scalar_select %p4448_p1, 1, 0 }
   0xe   : > { %s5929_s27 = scalar_select %p4452_p2, 1, 0 }
   0xf   : > { %p4458_p4 = por %p4448_p1, %p55_p0  ;;  %p3118_p5 = scmp.ge.s32.totalorder %s4367_s23, 1 }
  0x10   : > { %p4463_p6 = por %p171_p3, %p55_p0  ;;  %p178_p7 = scmp.lt.s32.totalorder %s4367_s23, 3 }
  0x11   : > { %s5930_s28 = scalar_select %p4458_p4, 1, 0 }
  0x12   : > { %s5931_s29 = scalar_select %p4463_p6, 1, 0 }
  0x13   : > { %p4468_p8 = pnand %p3118_p5, %p178_p7  ;;  %s4369_s6 = smov [#allocation6]  }
  0x14   : > { %5932 = sst [smem:[#allocation16_spill]] %s5931_s29  ;;  %s190_s7 = sshll.u32 %s4369_s6, 4  ;;  %s4472_s7 = int_to_ptr.vmem [resolvable:$true] %s190_s7 }
  0x15   : > { %s5933_s30 = scalar_select %p4468_p8, 1, 0 }
  0x16   : > { %p3764_p9 = pneg %p4468_p8  ;;  %s4370_s9 = smov [#allocation8]  }
  0x17   : > { %s203_s10 = sshll.u32 %s4370_s9, 4  ;;  %s5935_s1 = sld [smem:[#allocation67_spill]]  ;;  %s4483_s10 = int_to_ptr.vmem [resolvable:$true] %s203_s10 }
  0x18   : > { %p4479_p11 = pnand %p3764_p9, %p4448_p1 }
  0x1a   : > { %p4493_p13 = pneg %p4479_p11 }
  0x1d   : > { %s4163_s13 = scalar_lea.hbm %s5935_s1, 1024 }
  0x1e   : > { %p4164_p12 = scmp.ne.s32.totalorder %s5935_s1, %s4163_s13  ;;  %p4170_p5 = scmp.lt.u32.totalorder %s4163_s13, %s5935_s1 }
  0x20   : > { %p4166_p0 = pnand %p4493_p13, %p4164_p12 }
  0x22   : > { %p4167_p3 = pneg %p4166_p0 }
  0x24   : > { %p4172_p7 = pnand %p4170_p5, %p4167_p3 }
  0x26   : > { %4175 = shalt.err (!%p4172_p7)
}
  0x27   : > { %s4176_s25 = scalar_lea.vmem %s4472_s7, 1024  ;;  %p4184_p1 = scmp.lt.s32.totalorder %s4472_s7, %s4472_s7 }
  0x28   : > { %p4177_p9 = scmp.ne.s32.totalorder %s4472_s7, %s4176_s25  ;;  %p4185_p4 = scmp.lt.s32.totalorder %s4176_s25, %s4176_s25 }
  0x2a   : > { %p4179_p10 = pnand %p4177_p9, %p4493_p13  ;;  %p4186_p12 = por %p4185_p4, %p4184_p1 }
  0x2c   : > { %p4180_p6 = pneg %p4179_p10 }
  0x2e   : > { %p4187_p0 = pnand %p4186_p12, %p4180_p6 }
  0x30   : > { %4190 = shalt.err (!%p4187_p0)
}
  0x31   : > { %s5914_s6 = smov 64   ;;  %s5916_s9 = smov 4  }
  0x32   : > { %3767 = dma.hbm_to_vmem [thread:$0]  (!%p4479_p11), %s5935_s1, 1024, %s4472_s7, [#allocation7], %s5914_s6, %s5914_s6, %s5916_s9  }
  0x33   : > { %s4191_s15 = scalar_lea.hbm %s5906_s2, 2048 }
  0x34   : > { %p4192_p1 = scmp.ne.s32.totalorder %s5906_s2, %s4191_s15  ;;  %p4198_p10 = scmp.lt.u32.totalorder %s4191_s15, %s5906_s2 }
  0x36   : > { %p4194_p4 = pnand %p4192_p1, %p4493_p13 }
  0x38   : > { %p4195_p6 = pneg %p4194_p4 }
  0x3a   : > { %p4200_p3 = pnand %p4198_p10, %p4195_p6 }
  0x3c   : > { %4203 = shalt.err (!%p4200_p3)
}
  0x3d   : > { %s4204_s7 = scalar_lea.vmem %s4483_s10, 2048  ;;  %p4212_p12 = scmp.lt.s32.totalorder %s4483_s10, %s4483_s10 }
  0x3e   : > { %p4205_p5 = scmp.ne.s32.totalorder %s4483_s10, %s4204_s7  ;;  %p4213_p0 = scmp.lt.s32.totalorder %s4204_s7, %s4204_s7 }
  0x40   : > { %p4207_p7 = pnand %p4205_p5, %p4493_p13  ;;  %p4214_p1 = por %p4213_p0, %p4212_p12 }
  0x42   : > { %p4208_p9 = pneg %p4207_p7 }
  0x44   : > { %p4215_p4 = pnand %p4214_p1, %p4208_p9 }
  0x46   : > { %4218 = shalt.err (!%p4215_p4)
}
  0x47   : > { %s4373_s11 = smov 128   ;;  %s4374_s29 = smov 8  }
  0x48   : > { %3770 = dma.hbm_to_vmem [thread:$0]  (!%p4479_p11), %s5906_s2, 2048, %s4483_s10, [#allocation7], %s4373_s11, %s4373_s11, %s4374_s29  }
  0x49   : > { %s4375_s14 = smov [#allocation9]   ;;  %s4219_s25 = scalar_lea.hbm %s5907_s3, 1024 }
  0x4a   : > { %s216_s15 = sshll.u32 %s4375_s14, 4  ;;  %p4220_p6 = scmp.ne.s32.totalorder %s5907_s3, %s4219_s25  ;;  %s217_s15 = int_to_ptr.vmem [resolvable:$true] %s216_s15 }
  0x4b   : > { %p4226_p5 = scmp.lt.u32.totalorder %s4219_s25, %s5907_s3 }
  0x4c   : > { %p4222_p10 = pnand %p4220_p6, %p4493_p13 }
  0x4e   : > { %p4223_p3 = pneg %p4222_p10 }
  0x50   : > { %p4228_p7 = pnand %p4226_p5, %p4223_p3 }
  0x52   : > { %4231 = shalt.err (!%p4228_p7)
}
  0x53   : > { %s4232_s10 = scalar_lea.vmem %s217_s15, 1024  ;;  %p4240_p1 = scmp.lt.s32.totalorder %s217_s15, %s217_s15 }
  0x54   : > { %p4233_p9 = scmp.ne.s32.totalorder %s217_s15, %s4232_s10  ;;  %p4241_p4 = scmp.lt.s32.totalorder %s4232_s10, %s4232_s10 }
  0x56   : > { %p4235_p12 = pnand %p4233_p9, %p4493_p13  ;;  %p4242_p8 = por %p4241_p4, %p4240_p1 }
  0x58   : > { %p4236_p0 = pneg %p4235_p12 }
  0x5a   : > { %p4243_p2 = pnand %p4242_p8, %p4236_p0 }
  0x5c   : > { %4246 = shalt.err (!%p4243_p2)
}
  0x5d   : > { %s5937_s6 = smov 4   ;;  %s5938_s11 = smov 64  }
  0x5e   : > { %3773 = dma.hbm_to_vmem [thread:$0]  (!%p4479_p11), %s5907_s3, 1024, %s217_s15, [#allocation10], %s5938_s11, %s5938_s11, %s5937_s6  }
  0x5f   : > { %s35_s16 = sadd.s32 1, %s4363_s22  ;;  %s42_s8 = sadd.s32 1, %s4355_s20 }
  0x60   : > { %p37_p2 = scmp.ge.s32.totalorder %s35_s16, 2  ;;  %p49_p8 = scmp.ne.s32.totalorder %s4355_s20, %s4351_s19 }
  0x61   : > { %p50_p13 = scmp.eq.s32.totalorder %s4367_s23, 0  ;;  %p5940_p10 = scmp.ne.s32.totalorder %s5929_s27, 0 }
  0x62   : > { %s6055_s16 = smov (%p37_p2, %s35_s16), 0  ;;  %p3785_p11 = scmp.lt.s32.totalorder %s4367_s23, 2 }
  0x63   : > { %p4568_p6 = por %p50_p13, %p49_p8  ;;  %p4574_p3 = por %p5940_p10, %p49_p8 }
  0x64   : > { %s39_s13 = ssub.s32 %s4363_s22, %s6055_s16  ;;  %s233_s14 = sand.u32 1, %s4355_s20  }
  0x65   : > { %p40_p5 = scmp.eq.s32.totalorder %s39_s13, 0  ;;  %s3123_s15 = sshll.u32 %s233_s14, 6 }
  0x66   : > { %s3218_s24 = sshll.u32 %s4363_s22, 10  ;;  %s237_s27 = scalar_lea.vmem [#allocation3], %s3123_s15 }
  0x67   : > { %s4583_s17 = scalar_select %p40_p5, %s4355_s20, %s42_s8  }
  0x68   : > { %s4589_s10 = scalar_lea.hbm %s5904_s0, %s3218_s24  ;;  %s244_s1 = sshll.u32 %s237_s27, 4  ;;  %s4591_s1 = int_to_ptr.vmem [resolvable:$true] %s244_s1 }
  0x69   : > { %p4595_p7 = pnand %p3785_p11, %p4568_p6  ;;  %s4599_s8 = scalar_lea.sflag [#allocation4], %s233_s14 }
  0x6a   : > { %s4247_s13 = scalar_lea.hbm %s4589_s10, 1024  ;;  %s4252_s29 = scalar_lea.hbm %s5904_s0, 2048 }
  0x6b   : > { %p4248_p9 = scmp.ne.s32.totalorder %s4589_s10, %s4247_s13  ;;  %p4249_p12 = pneg %p4595_p7 }
  0x6c   : > { %p4253_p4 = scmp.lt.u32.totalorder %s4589_s10, %s5904_s0  ;;  %p4254_p2 = scmp.lt.u32.totalorder %s4252_s29, %s4247_s13 }
  0x6d   : > { %p4250_p0 = pnand %p4249_p12, %p4248_p9  ;;  %p4256_p13 = scmp.lt.u32.totalorder %s4247_s13, %s4589_s10 }
  0x6e   : > { %p4255_p8 = por %p4254_p2, %p4253_p4 }
  0x6f   : > { %p4251_p1 = pneg %p4250_p0 }
  0x70   : > { %p4257_p6 = por %p4256_p13, %p4255_p8 }
  0x72   : > { %p4258_p10 = pnand %p4257_p6, %p4251_p1 }
  0x74   : > { %4261 = shalt.err (!%p4258_p10)
}
  0x75   : > { %s4262_s14 = scalar_lea.vmem %s4591_s1, 1024  ;;  %s4376_s27 = smov [#allocation3]  }
  0x76   : > { %p4263_p11 = scmp.ne.s32.totalorder %s4591_s1, %s4262_s14  ;;  %s4267_s15 = sshll.u32 %s4376_s27, 4  ;;  %s4268_s15 = int_to_ptr.vmem [resolvable:$false] %s4267_s15 }
  0x77   : > { %s4269_s24 = scalar_lea.vmem %s4268_s15, 2048  ;;  %p4270_p0 = scmp.lt.s32.totalorder %s4591_s1, %s4268_s15 }
  0x78   : > { %p4265_p5 = pnand %p4263_p11, %p4249_p12  ;;  %p4271_p4 = scmp.lt.s32.totalorder %s4269_s24, %s4262_s14 }
  0x7a   : > { %p4266_p9 = pneg %p4265_p5  ;;  %p4272_p2 = por %p4271_p4, %p4270_p0 }
  0x7c   : > { %p4273_p8 = pnand %p4272_p2, %p4266_p9 }
  0x7e   : > { %4276 = shalt.err (!%p4273_p8)
}
  0x7f   : > { %3777 = dma.hbm_to_vmem [thread:$0]  (!%p4595_p7), %s4589_s10, 1024, %s4591_s1, %s4599_s8, %s5938_s11, %s5938_s11, %s5937_s6  }
  0x80   : > { %p5943_p12 = scmp.ne.s32.totalorder %s5933_s30, 0 }
  0x82   : > { %256 = sbr.rel (%p5943_p12) target bundleno = 2869 (0xb35), region = 40 }
  0x89   : > { %s4633_s13 = sand.u32 1, %s4351_s19   ;;  %p5944_p1 = scmp.ne.s32.totalorder %s5930_s28, 0 }
  0x8a   : > { %s3127_s29 = sshll.u32 %s4633_s13, 6  ;;  %s259_s25 = scalar_lea.sflag [#allocation4], %s4633_s13 }
  0x8b   : > { %s4637_s7 = scalar_lea.vmem [#allocation3], %s3127_s29 }
  0x8c   : > { %4330 = dma.done.wait (%p5944_p1), %s259_s25, 1024  }
  0x8d   : > { %4332 = vsyncadd (%p5944_p1), %s259_s25, 4294966272  ;;  %p5945_p7 = scmp.ne.s32.totalorder %s5928_s26, 0 }
  0x8f   : > { %4334 = dma.done.wait (%p5945_p7), [#allocation7], 3072  }
  0x90   : > { %4336 = vsyncadd (%p5945_p7), [#allocation7], 4294964224 }
  0x91   : > { %4338 = dma.done.wait (%p5945_p7), [#allocation10], 1024  }
  0x92   : > { %4340 = vsyncadd (%p5945_p7), [#allocation10], 4294966272  ;;  %v4377_v0 = vmov 0   ;;  %v3851_v1 = vld [vmem:[#allocation8 + $0x4] ss:$8 sps:$4 sm:$0xff]   ;;  %v3882_v15 = vld [vmem:[#allocation6 + $0x10] sm:$0xff]  }
  0x93   : > { %495 = vmatprep.mubr.bf16.mxu0 %v4377_v0  ;;  %v3853_v2 = vld [vmem:[#allocation8] ss:$8 sps:$4 sm:$0xff]   ;;  %463 = vmatprep.subr.bf16.mxu0 %v3851_v1  ;;  %v3854_v3 = vld [vmem:[#allocation8 + $0x14] ss:$8 sps:$4 sm:$0xff]   ;;  %v3856_v4 = vld [vmem:[#allocation8 + $0x10] ss:$8 sps:$4 sm:$0xff]  }
  0x94   : > { %464 = vmatpush1.bf16.msra.mxu0 %v3853_v2  ;;  %v3857_v5 = vld [vmem:[#allocation8 + $0x24] ss:$8 sps:$4 sm:$0xff]   ;;  %v3859_v6 = vld [vmem:[#allocation8 + $0x20] ss:$8 sps:$4 sm:$0xff]   ;;  %v3860_v7 = vld [vmem:[#allocation8 + $0x34] ss:$8 sps:$4 sm:$0xff]  }
  0x95   : > { %465 = vmatprep.subr.bf16.mxu0 %v3854_v3  ;;  %v3862_v8 = vld [vmem:[#allocation8 + $0x30] ss:$8 sps:$4 sm:$0xff]   ;;  %v3863_v9 = vld [vmem:[#allocation8 + $0x44] ss:$8 sps:$4 sm:$0xff]   ;;  %v3865_v10 = vld [vmem:[#allocation8 + $0x40] ss:$8 sps:$4 sm:$0xff]  }
  0x96   : > { %v3879_v11 = vld [vmem:[#allocation6] sm:$0xff]   ;;  %v3866_v12 = vld [vmem:[#allocation8 + $0x54] ss:$8 sps:$4 sm:$0xff]   ;;  %v3881_v13 = vld [vmem:[#allocation6 + $0x8] sm:$0xff]   ;;  %vm862_vm0 = vcmask 261120   ;;  %s4378_s26 = smov 96  }
  0x97   : > { %3380 = vmatprep.subr.bf16.mxu1 %v3879_v11  ;;  %v3868_v14 = vld [vmem:[#allocation8 + $0x50] ss:$8 sps:$4 sm:$0xff]   ;;  %v3869_v16 = vld [vmem:[#allocation8 + $0x64] ss:$8 sps:$4 sm:$0xff]   ;;  %v3871_v17 = vld [vmem:[#allocation8 + $0x60] ss:$8 sps:$4 sm:$0xff]  }
  0x98   : > { %466 = vmatpush1.bf16.msra.mxu0 %v3856_v4  ;;  %3381 = vmatpush3.bf16.msra.mxu1 %v3879_v11  ;;  %v3884_v18 = vld [vmem:[#allocation6 + $0x18] sm:$0xff]   ;;  %v3885_v21 = vld [vmem:[#allocation6 + $0x20] sm:$0xff]   ;;  %v3887_v24 = vld [vmem:[#allocation6 + $0x28] sm:$0xff]   ;;  %s4379_s28 = smov 64   ;;  %s4380_s30 = smov 32   ;;  %vm2759_vm1 = vcmask 523264  }
  0x99   : > { %467 = vmatprep.subr.bf16.mxu0 %v3857_v5  ;;  %3382 = vmatprep.subr.bf16.mxu1 %v3881_v13  ;;  %v3872_v19 = vld [vmem:[#allocation8 + $0x74] ss:$8 sps:$4 sm:$0xff]   ;;  %v3874_v20 = vld [vmem:[#allocation8 + $0x70] ss:$8 sps:$4 sm:$0xff]   ;;  %v3891_v22 = vld [vmem:[%s4637_s7] sm:$0xff]   ;;  %vm2776_vm2 = vcmask 785408  }
  0x9a   : > { %3396 = vmatprep.mubr.bf16.mxu1 %v3891_v22  ;;  %v3875_v23 = vld [vmem:[%s4637_s7] sm:$0xff]   ;;  %v3888_v25 = vld [vmem:[#allocation6 + $0x30] sm:$0xff]   ;;  %v3876_v26 = vld [vmem:[%s4637_s7 + $0x8] sm:$0xff]   ;;  %s3131_s6 = sshll.u32 %s4633_s13, 7  ;;  %s3219_s9 = sshll.u32 %s4359_s21, 11 }
  0x9b   : > { %v3890_v27 = vld [vmem:[#allocation6 + $0x38] sm:$0xff]   ;;  %v3892_v28 = vld [vmem:[%s4637_s7 + $0x8] sm:$0xff]   ;;  %v3877_v29 = vld [vmem:[%s4637_s7 + $0x10] sm:$0xff]   ;;  %s5830_s1 = scalar_lea.vmem [#allocation11], %s3131_s6  ;;  %s5850_s15 = scalar_lea.hbm %s5909_s5, %s3219_s9 }
  0x9c   : > { %468 = vmatpush1.bf16.msra.mxu0 %v3859_v6  ;;  %3383 = vmatpush3.bf16.msra.mxu1 %v3881_v13  ;;  %v3893_v30 = vld [vmem:[%s4637_s7 + $0x10] sm:$0xff]   ;;  %v3894_v31 = vld [vmem:[%s4637_s7 + $0x18] sm:$0xff]   ;;  %v3895_v33 = vld [vmem:[%s4637_s7 + $0x20] sm:$0xff]   ;;  %s3001_s8 = sshll.u32 %s5830_s1, 4  ;;  %s2986_s21 = scalar_lea.sflag [#allocation5], %s4633_s13  ;;  %s5852_s8 = int_to_ptr.vmem [resolvable:$true] %s3001_s8 }
  0x9d   : > { %469 = vmatprep.subr.bf16.mxu0 %v3860_v7  ;;  %3384 = vmatprep.subr.bf16.mxu1 %v3882_v15  ;;  %v3878_v32 = vld [vmem:[%s4637_s7 + $0x18] sm:$0xff]   ;;  %v3896_v34 = vld [vmem:[%s4637_s7 + $0x28] sm:$0xff]   ;;  %v3880_v35 = vld [vmem:[%s4637_s7 + $0x20] sm:$0xff]   ;;  %s4277_s24 = scalar_lea.vmem %s5852_s8, 2048  ;;  %s4381_s29 = smov [#allocation11]  }
  0x9e   : > { %v3897_v36 = vld [vmem:[%s4637_s7 + $0x30] sm:$0xff]   ;;  %v3898_v37 = vld [vmem:[%s4637_s7 + $0x38] sm:$0xff]   ;;  %v3883_v38 = vld [vmem:[%s4637_s7 + $0x28] sm:$0xff]   ;;  %p4278_p13 = scmp.ne.s32.totalorder %s5852_s8, %s4277_s24  ;;  %s4281_s25 = sshll.u32 %s4381_s29, 4  ;;  %s4282_s25 = int_to_ptr.vmem [resolvable:$false] %s4281_s25 }
  0x9f   : > { %v3886_v39 = vld [vmem:[%s4637_s7 + $0x30] sm:$0xff]   ;;  %v3889_v40 = vld [vmem:[%s4637_s7 + $0x38] sm:$0xff]   ;;  %s4283_s7 = scalar_lea.vmem %s4282_s25, 4096  ;;  %p4284_p11 = scmp.lt.s32.totalorder %s5852_s8, %s4282_s25 }
  0xa0   : > { %470 = vmatpush1.bf16.msra.mxu0 %v3862_v8  ;;  %3385 = vmatpush3.bf16.msra.mxu1 %v3882_v15  ;;  %p4279_p6 = pnand %p4278_p13, %p4574_p3  ;;  %p4285_p5 = scmp.lt.s32.totalorder %s4283_s7, %s4277_s24 }
  0xa1   : > { %471 = vmatprep.subr.bf16.mxu0 %v3863_v9  ;;  %3386 = vmatprep.subr.bf16.mxu1 %v3884_v18 }
  0xa2   : > { %p4280_p10 = pneg %p4279_p6  ;;  %p4286_p9 = por %p4285_p5, %p4284_p11 }
  0xa4   : > { %472 = vmatpush1.bf16.msra.mxu0 %v3865_v10  ;;  %3387 = vmatpush3.bf16.msra.mxu1 %v3884_v18  ;;  %p4287_p0 = pnand %p4286_p9, %p4280_p10 }
  0xa5   : > { %473 = vmatprep.subr.bf16.mxu0 %v3866_v12  ;;  %3388 = vmatprep.subr.bf16.mxu1 %v3885_v21 }
  0xa8   : > { %474 = vmatpush1.bf16.msra.mxu0 %v3868_v14  ;;  %3389 = vmatpush3.bf16.msra.mxu1 %v3885_v21 }
  0xa9   : > { %475 = vmatprep.subr.bf16.mxu0 %v3869_v16  ;;  %3390 = vmatprep.subr.bf16.mxu1 %v3887_v24 }
  0xac   : > { %476 = vmatpush1.bf16.msra.mxu0 %v3871_v17  ;;  %3391 = vmatpush3.bf16.msra.mxu1 %v3887_v24 }
  0xad   : > { %477 = vmatprep.subr.bf16.mxu0 %v3872_v19  ;;  %3392 = vmatprep.subr.bf16.mxu1 %v3888_v25 }
  0xb0   : > { %478 = vmatpush1.bf16.msra.mxu0 %v3874_v20  ;;  %3393 = vmatpush3.bf16.msra.mxu1 %v3888_v25 }
  0xb1   : > { %3394 = vmatprep.subr.bf16.mxu1 %v3890_v27 }
  0xb3   : > { %496 = vmatmul.mubr.bf16.vlgmr.msra.gmra.mrb[0].mxu0 %v3875_v23 }
  0xb4   : > { %505 = vmatprep.mubr.bf16.mxu0 %v4377_v0  ;;  %3395 = vmatpush3.bf16.msra.mxu1 %v3890_v27 }
  0xb7   : > { %3397 = vmatmul.mubr.bf16.vlgmr.msra.gmra.mrb[0].mxu1 %v3892_v28 }
  0xb8   : > { %3400 = vmatprep.mubr.bf16.mxu1 %v3893_v30 }
  0xbb   : > { %506 = vmatmul.mubr.bf16.gmra.mrb[4].mxu0 %v3876_v26 }
  0xbc   : > { %515 = vmatprep.mubr.bf16.mxu0 %v4377_v0 }
  0xbf   : > { %3401 = vmatmul.mubr.bf16.gmra.mrb[4].mxu1 %v3894_v31 }
  0xc0   : > { %3404 = vmatprep.mubr.bf16.mxu1 %v3895_v33 }
  0xc3   : > { %516 = vmatmul.mubr.bf16.gmra.mrb[8].mxu0 %v3877_v29 }
  0xc4   : > { %525 = vmatprep.mubr.bf16.mxu0 %v4377_v0 }
  0xc7   : > { %3405 = vmatmul.mubr.bf16.gmra.mrb[8].mxu1 %v3896_v34 }
  0xc8   : > { %3408 = vmatprep.mubr.bf16.mxu1 %v3897_v36 }
  0xcb   : > { %526 = vmatmul.mubr.bf16.gmra.mrb[12].mxu0 %v3878_v32 }
  0xcc   : > { %535 = vmatprep.mubr.bf16.mxu0 %v4377_v0 }
  0xcf   : > { %3409 = vmatmul.mubr.bf16.gmra.mrb[12].mxu1 %v3898_v37 }
  0xd3   : > { %536 = vmatmul.mubr.bf16.gmra.mrb[16].mxu0 %v3880_v35 }
  0xd4   : > { %545 = vmatprep.mubr.bf16.mxu0 %v4377_v0 }
  0xdb   : > { %546 = vmatmul.mubr.bf16.gmra.mrb[20].mxu0 %v3883_v38 }
  0xdc   : > { %555 = vmatprep.mubr.bf16.mxu0 %v4377_v0 }
  0xe3   : > { %556 = vmatmul.mubr.bf16.gmra.mrb[24].mxu0 %v3886_v39 }
  0xe4   : > { %565 = vmatprep.mubr.bf16.mxu0 %v4377_v0 }
  0xeb   : > { %566 = vmatmul.mubr.bf16.gmra.mrb[28].mxu0 %v3889_v40 }
 0x186   : > { %v497_v41 = vpop.f32.mrb[0].mxu0 }
 0x187   : > { %v499_v42 = vpop.f32.mrb[1].mxu0 }
 0x188   : > { %v501_v43 = vpop.f32.mrb[2].mxu0 }
 0x189   : > { %v4675_v44 = vpack.c.bf16 %v501_v43, %v497_v41  ;;  %v503_v45 = vpop.f32.mrb[3].mxu0 }
 0x18a   : > { %v4677_v46 = vpack.c.bf16 %v503_v45, %v499_v42  ;;  %v3398_v55 = vpop.f32.mrb[0].mxu1 }
 0x18b   : > { %1297 = vrot.lane.b32.xlu0 %v4675_v44, %s4378_s26  ;;  %3716 = vmatprep.subr.msk.bf16.mxu0 %vm862_vm0, %v4675_v44  ;;  %v888_v47 = vsel %vm862_vm0, %v4675_v44, 0  ;;  %v775_v57 = vpop.f32.mrb[1].mxu1 }
 0x18c   : > { %3413 = vmatpush3.bf16.xpose.msra.mxu0 %v888_v47  ;;  %3444 = vmatprep.subr.bf16.mxu1 %v4677_v46  ;;  %v3399_v59 = vpop.f32.mrb[2].mxu1 }
 0x18d   : > { %3445 = vmatpush3.bf16.msra.mxu1 %v4677_v46  ;;  %v4699_v61 = vpack.c.bf16 %v3399_v59, %v3398_v55  ;;  %v778_v62 = vpop.f32.mrb[3].mxu1 }
 0x18e   : > { %v507_v48 = vpop.f32.mrb[4].mxu0  ;;  %v4703_v1 = vpack.c.bf16 %v778_v62, %v775_v57 }
 0x18f   : > { %v509_v49 = vpop.f32.mrb[5].mxu0 }
 0x190   : > { %v511_v50 = vpop.f32.mrb[6].mxu0  ;;  %3428 = vmatprep.mubr.msk.bf16.mxu0 %vm862_vm0, %v4703_v1 }
 0x191   : > { %v4687_v51 = vpack.c.bf16 %v511_v50, %v507_v48  ;;  %v513_v52 = vpop.f32.mrb[7].mxu0 }
 0x192   : > { %v4689_v53 = vpack.c.bf16 %v513_v52, %v509_v49  ;;  %v3402_v4 = vpop.f32.mrb[4].mxu1 }
 0x193   : > { %1299 = vrot.lane.b32.xlu1 %v4687_v51, %s4378_s26  ;;  %3717 = vmatprep.subr.msk.bf16.mxu0 %vm862_vm0, %v4687_v51  ;;  %v891_v54 = vsel %vm862_vm0, %v4687_v51, 0  ;;  %v791_v6 = vpop.f32.mrb[5].mxu1 }
 0x194   : > { %3415 = vmatpush3.bf16.xpose.msra.mxu0 %v891_v54  ;;  %3446 = vmatprep.subr.bf16.mxu1 %v4689_v53  ;;  %v3403_v8 = vpop.f32.mrb[6].mxu1 }
 0x195   : > { %3447 = vmatpush3.bf16.msra.mxu1 %v4689_v53  ;;  %v4717_v10 = vpack.c.bf16 %v3403_v8, %v3402_v4  ;;  %v794_v11 = vpop.f32.mrb[7].mxu1 }
 0x196   : > { %v517_v56 = vpop.f32.mrb[8].mxu0  ;;  %v4721_v14 = vpack.c.bf16 %v794_v11, %v791_v6 }
 0x197   : > { %v519_v58 = vpop.f32.mrb[9].mxu0 }
 0x198   : > { %v521_v60 = vpop.f32.mrb[10].mxu0 }
 0x199   : > { %v4701_v63 = vpack.c.bf16 %v521_v60, %v517_v56  ;;  %v523_v0 = vpop.f32.mrb[11].mxu0 }
 0x19a   : > { %v4705_v2 = vpack.c.bf16 %v523_v0, %v519_v58  ;;  %v3406_v17 = vpop.f32.mrb[8].mxu1 }
 0x19b   : > { %1301 = vrot.lane.b32.xlu0 %v4701_v63, %s4378_s26  ;;  %3718 = vmatprep.subr.msk.bf16.mxu0 %vm862_vm0, %v4701_v63  ;;  %v894_v3 = vsel %vm862_vm0, %v4701_v63, 0  ;;  %v807_v19 = vpop.f32.mrb[9].mxu1 }
 0x19c   : > { %3417 = vmatpush3.bf16.xpose.msra.mxu0 %v894_v3  ;;  %3448 = vmatprep.subr.bf16.mxu1 %v4705_v2  ;;  %v3407_v21 = vpop.f32.mrb[10].mxu1 }
 0x19d   : > { %3449 = vmatpush3.bf16.msra.mxu1 %v4705_v2  ;;  %v4731_v23 = vpack.c.bf16 %v3407_v21, %v3406_v17  ;;  %v810_v24 = vpop.f32.mrb[11].mxu1 }
 0x19e   : > { %v527_v5 = vpop.f32.mrb[12].mxu0  ;;  %v4735_v27 = vpack.c.bf16 %v810_v24, %v807_v19 }
 0x19f   : > { %v529_v7 = vpop.f32.mrb[13].mxu0 }
 0x1a0   : > { %v531_v9 = vpop.f32.mrb[14].mxu0 }
 0x1a1   : > { %v4719_v12 = vpack.c.bf16 %v531_v9, %v527_v5  ;;  %v533_v13 = vpop.f32.mrb[15].mxu0 }
 0x1a2   : > { %v4723_v15 = vpack.c.bf16 %v533_v13, %v529_v7  ;;  %v3410_v30 = vpop.f32.mrb[12].mxu1 }
 0x1a3   : > { %3719 = vmatprep.subr.msk.bf16.mxu0 %vm862_vm0, %v4719_v12  ;;  %v897_v16 = vsel %vm862_vm0, %v4719_v12, 0  ;;  %v823_v32 = vpop.f32.mrb[13].mxu1 }
 0x1a4   : > { %3419 = vmatpush3.bf16.xpose.msra.mxu0 %v897_v16  ;;  %3450 = vmatprep.subr.bf16.mxu1 %v4723_v15  ;;  %v3411_v34 = vpop.f32.mrb[14].mxu1 }
 0x1a5   : > { %3451 = vmatpush3.bf16.msra.mxu1 %v4723_v15  ;;  %v4745_v36 = vpack.c.bf16 %v3411_v34, %v3410_v30  ;;  %v826_v37 = vpop.f32.mrb[15].mxu1 }
 0x1a6   : > { %v537_v18 = vpop.f32.mrb[16].mxu0  ;;  %v4749_v40 = vpack.c.bf16 %v826_v37, %v823_v32 }
 0x1a7   : > { %v539_v20 = vpop.f32.mrb[17].mxu0 }
 0x1a8   : > { %v541_v22 = vpop.f32.mrb[18].mxu0 }
 0x1a9   : > { %v4733_v25 = vpack.c.bf16 %v541_v22, %v537_v18  ;;  %v543_v26 = vpop.f32.mrb[19].mxu0 }
 0x1aa   : > { %v4737_v28 = vpack.c.bf16 %v543_v26, %v539_v20 }
 0x1ab   : > { %3720 = vmatprep.subr.msk.bf16.mxu0 %vm862_vm0, %v4733_v25  ;;  %v900_v29 = vsel %vm862_vm0, %v4733_v25, 0 }
 0x1ac   : > { %3421 = vmatpush3.bf16.xpose.msra.mxu0 %v900_v29  ;;  %3452 = vmatprep.subr.bf16.mxu1 %v4737_v28 }
 0x1ad   : > { %3453 = vmatpush3.bf16.msra.mxu1 %v4737_v28 }
 0x1ae   : > { %v547_v31 = vpop.f32.mrb[20].mxu0 }
 0x1af   : > { %v549_v33 = vpop.f32.mrb[21].mxu0 }
 0x1b0   : > { %v551_v35 = vpop.f32.mrb[22].mxu0 }
 0x1b1   : > { %v4747_v38 = vpack.c.bf16 %v551_v35, %v547_v31  ;;  %v553_v39 = vpop.f32.mrb[23].mxu0 }
 0x1b2   : > { %v4751_v41 = vpack.c.bf16 %v553_v39, %v549_v33 }
 0x1b3   : > { %3721 = vmatprep.subr.msk.bf16.mxu0 %vm862_vm0, %v4747_v38  ;;  %v903_v42 = vsel %vm862_vm0, %v4747_v38, 0 }
 0x1b4   : > { %3423 = vmatpush3.bf16.xpose.msra.mxu0 %v903_v42  ;;  %3454 = vmatprep.subr.bf16.mxu1 %v4751_v41 }
 0x1b5   : > { %3455 = vmatpush3.bf16.msra.mxu1 %v4751_v41 }
 0x1b6   : > { %v557_v43 = vpop.f32.mrb[24].mxu0 }
 0x1b7   : > { %v559_v45 = vpop.f32.mrb[25].mxu0 }
 0x1b8   : > { %v561_v47 = vpop.f32.mrb[26].mxu0 }
 0x1b9   : > { %v4759_v48 = vpack.c.bf16 %v561_v47, %v557_v43  ;;  %v563_v49 = vpop.f32.mrb[27].mxu0 }
 0x1ba   : > { %v4761_v50 = vpack.c.bf16 %v563_v49, %v559_v45 }
 0x1bb   : > { %3722 = vmatprep.subr.msk.bf16.mxu0 %vm862_vm0, %v4759_v48  ;;  %v906_v52 = vsel %vm862_vm0, %v4759_v48, 0 }
 0x1bc   : > { %3425 = vmatpush3.bf16.xpose.msra.mxu0 %v906_v52  ;;  %3456 = vmatprep.subr.bf16.mxu1 %v4761_v50 }
 0x1bd   : > { %3457 = vmatpush3.bf16.msra.mxu1 %v4761_v50 }
 0x1be   : > { %v567_v54 = vpop.f32.mrb[28].mxu0 }
 0x1bf   : > { %v569_v55 = vpop.f32.mrb[29].mxu0 }
 0x1c0   : > { %v571_v56 = vpop.f32.mrb[30].mxu0 }
 0x1c1   : > { %v4769_v57 = vpack.c.bf16 %v571_v56, %v567_v54  ;;  %v573_v58 = vpop.f32.mrb[31].mxu0 }
 0x1c2   : > { %v4771_v59 = vpack.c.bf16 %v573_v58, %v569_v55 }
 0x1c3   : > { %3723 = vmatprep.subr.msk.bf16.mxu0 %vm862_vm0, %v4769_v57  ;;  %v909_v60 = vsel %vm862_vm0, %v4769_v57, 0 }
 0x1c4   : > { %3427 = vmatpush3.bf16.xpose.msra.mxu0 %v909_v60  ;;  %3458 = vmatprep.subr.bf16.mxu1 %v4771_v59 }
 0x1c5   : > { %3459 = vmatpush3.bf16.msra.mxu1 %v4771_v59 }
 0x1cb   : > { %3429 = vmatmul.mubr.msk.bf16.vlgmr.msra.gmra.mrb[32].mxu0 %vm862_vm0, %v4699_v61 }
 0x1cc   : > { %3432 = vmatprep.mubr.msk.bf16.mxu0 %vm862_vm0, %v4721_v14 }
 0x1d3   : > { %3433 = vmatmul.mubr.msk.bf16.gmra.mrb[36].mxu0 %vm862_vm0, %v4717_v10 }
 0x1d4   : > { %3436 = vmatprep.mubr.msk.bf16.mxu0 %vm862_vm0, %v4735_v27 }
 0x1db   : > { %3437 = vmatmul.mubr.msk.bf16.gmra.mrb[40].mxu0 %vm862_vm0, %v4731_v23 }
 0x1dc   : > { %3440 = vmatprep.mubr.msk.bf16.mxu0 %vm862_vm0, %v4749_v40 }
 0x1e3   : > { %3441 = vmatmul.mubr.msk.bf16.gmra.mrb[44].mxu0 %vm862_vm0, %v4745_v36 }
 0x1fd   : > { %v4793_v62 = vpop.permute.xlu0 %1297 }
 0x1fe   : > { %3724 = vmatprep.subr.msk.bf16.mxu1 %vm862_vm0, %v4793_v62  ;;  %v1338_v56 = vsel %vm862_vm0, %v4793_v62, 0 }
 0x205   : > { %v1300_v22 = vpop.permute.xlu1 %1299 }
 0x206   : > { %v1341_v58 = vsel %vm862_vm0, %v1300_v22, 0 }
 0x20d   : > { %v1302_v24 = vpop.permute.xlu0 %1301 }
 0x20e   : > { %v1344_v60 = vsel %vm862_vm0, %v1302_v24, 0 }
 0x29e   : > { %v4797_v0 = vpop.f32.mrb[32].mxu0 }
 0x29f   : > { %1012 = vmax.xlane.f32.xlu1 %v4797_v0  ;;  %v945_v3 = vpop.f32.mrb[33].mxu0 }
 0x2a0   : > { %1008 = vmax.xlane.f32.xlu0 %v945_v3  ;;  %v4800_v4 = vpop.f32.mrb[34].mxu0 }
 0x2a1   : > { %v4802_v5 = vpop.f32.mrb[35].mxu0 }
 0x2a3   : > { %1014 = vmax.xlane.f32.xlu1 %v4800_v4 }
 0x2a4   : > { %1010 = vmax.xlane.f32.xlu0 %v4802_v5 }
 0x2a6   : > { %v4806_v6 = vpop.f32.mrb[36].mxu0 }
 0x2a7   : > { %v4808_v7 = vpop.f32.mrb[37].mxu0 }
 0x2a8   : > { %v4810_v8 = vpop.f32.mrb[38].mxu0 }
 0x2a9   : > { %v4812_v9 = vpop.f32.mrb[39].mxu0 }
 0x2ae   : > { %v4814_v11 = vpop.f32.mrb[40].mxu0 }
 0x2af   : > { %v4816_v13 = vpop.f32.mrb[41].mxu0 }
 0x2b0   : > { %v4818_v16 = vpop.f32.mrb[42].mxu0 }
 0x2b1   : > { %v4820_v17 = vpop.f32.mrb[43].mxu0 }
 0x2b4   : > { %1303 = vrot.lane.b32.xlu1 %v4719_v12, %s4378_s26 }
 0x2b6   : > { %v4824_v18 = vpop.f32.mrb[44].mxu0 }
 0x2b7   : > { %v4826_v19 = vpop.f32.mrb[45].mxu0 }
 0x2b8   : > { %v4828_v20 = vpop.f32.mrb[46].mxu0 }
 0x2b9   : > { %v4830_v21 = vpop.f32.mrb[47].mxu0 }
 0x2ba   : > { %1305 = vrot.lane.b32.xlu0 %v4733_v25, %s4378_s26 }
 0x2d8   : > { %1016 = vmax.xlane.f32.xlu1 %v4808_v7 }
 0x2d9   : > { %1020 = vmax.xlane.f32.xlu0 %v4806_v6 }
 0x2dc   : > { %1022 = vmax.xlane.f32.xlu1 %v4810_v8 }
 0x2dd   : > { %1024 = vmax.xlane.f32.xlu0 %v4816_v13 }
 0x2e0   : > { %1018 = vmax.xlane.f32.xlu1 %v4812_v9 }
 0x2e1   : > { %1026 = vmax.xlane.f32.xlu0 %v4820_v17 }
 0x2e4   : > { %1028 = vmax.xlane.f32.xlu1 %v4814_v11 }
 0x2e5   : > { %1036 = vmax.xlane.f32.xlu0 %v4824_v18 }
 0x2e8   : > { %1030 = vmax.xlane.f32.xlu1 %v4818_v16 }
 0x2ec   : > { %1032 = vmax.xlane.f32.xlu1 %v4826_v19 }
 0x2f0   : > { %1038 = vmax.xlane.f32.xlu1 %v4828_v20 }
 0x2f4   : > { %1034 = vmax.xlane.f32.xlu1 %v4830_v21 }
 0x2fb   : > { %1309 = vrot.lane.b32.xlu0 %v4759_v48, %s4378_s26 }
 0x2ff   : > { %1311 = vrot.lane.b32.xlu0 %v4769_v57, %s4378_s26 }
 0x303   : > { %1273 = vrot.lane.b32.xlu0 %v4703_v1, %s4378_s26 }
 0x305   : > { %1307 = vrot.lane.b32.xlu1 %v4747_v38, %s4378_s26 }
 0x307   : > { %1277 = vrot.lane.b32.xlu0 %v4721_v14, %s4378_s26 }
 0x309   : > { %1275 = vrot.lane.b32.xlu1 %v4699_v61, %s4378_s26 }
 0x30b   : > { %1281 = vrot.lane.b32.xlu0 %v4735_v27, %s4378_s26 }
 0x30d   : > { %1279 = vrot.lane.b32.xlu1 %v4717_v10, %s4378_s26 }
 0x30f   : > { %1285 = vrot.lane.b32.xlu0 %v4749_v40, %s4378_s26 }
 0x311   : > { %1283 = vrot.lane.b32.xlu1 %v4731_v23, %s4378_s26 }
 0x313   : > { %1586 = vrot.lane.b32.xlu0 %v4677_v46, %s4378_s26 }
 0x315   : > { %1287 = vrot.lane.b32.xlu1 %v4745_v36, %s4378_s26 }
 0x317   : > { %1590 = vrot.lane.b32.xlu0 %v4705_v2, %s4378_s26 }
 0x319   : > { %1588 = vrot.lane.b32.xlu1 %v4689_v53, %s4378_s26 }
 0x31b   : > { %1598 = vrot.lane.b32.xlu0 %v4761_v50, %s4378_s26 }
 0x31d   : > { %1592 = vrot.lane.b32.xlu1 %v4723_v15, %s4378_s26 }
 0x31f   : > { %1763 = vrot.lane.b32.xlu0 %v4675_v44, %s4379_s28 }
 0x321   : > { %1594 = vrot.lane.b32.xlu1 %v4737_v28, %s4378_s26 }
 0x323   : > { %1765 = vrot.lane.b32.xlu0 %v4687_v51, %s4379_s28 }
 0x325   : > { %1596 = vrot.lane.b32.xlu1 %v4751_v41, %s4378_s26 }
 0x327   : > { %1769 = vrot.lane.b32.xlu0 %v4719_v12, %s4379_s28 }
 0x329   : > { %1600 = vrot.lane.b32.xlu1 %v4771_v59, %s4378_s26 }
 0x32c   : > { %v1013_v26 = vpop.xlane.xlu1 %1012 }
 0x32d   : > { %v1009_v29 = vpop.xlane.xlu0 %1008  ;;  %1767 = vrot.lane.b32.xlu1 %v4701_v63, %s4379_s28  ;;  %v1042_v31 = vsub.f32 %v4797_v0, %v1013_v26 }
 0x32e   : > { %v1040_v30 = vsub.f32 %v945_v3, %v1009_v29 }
 0x32f   : > { %v1060_v39 = vmul.f32 1.442695, %v1042_v31 }
 0x330   : > { %v1056_v32 = vmul.f32 1.442695, %v1040_v30  ;;  %v1015_v33 = vpop.xlane.xlu1 %1014 }
 0x331   : > { %v1043_v34 = vsub.f32 %v4800_v4, %v1015_v33  ;;  %v1011_v35 = vpop.xlane.xlu0 %1010 }
 0x332   : > { %v1041_v37 = vsub.f32 %v4802_v5, %v1011_v35  ;;  %3907 = vpow2.f32 %v1056_v32 }
 0x333   : > { %v1062_v42 = vmul.f32 1.442695, %v1043_v34 }
 0x334   : > { %v1058_v43 = vmul.f32 1.442695, %v1041_v37  ;;  %v1304_v0 = vpop.permute.xlu1 %1303 }
 0x335   : > { %3909 = vpow2.f32 %v1062_v42  ;;  %v1347_v3 = vsel %vm862_vm0, %v1304_v0, 0  ;;  %v1306_v4 = vpop.permute.xlu0 %1305 }
 0x336   : > { %3911 = vpow2.f32 %v1058_v43  ;;  %v1350_v62 = vsel %vm862_vm0, %v1306_v4, 0 }
 0x337   : > { %3913 = vpow2.f32 %v1060_v39 }
 0x33c   : > { %v4895_v45 = vpop.eup %3907 }
 0x33f   : > { %v4897_v47 = vpop.eup %3909 }
 0x340   : > { %v4899_v49 = vpop.eup %3911 }
 0x341   : > { %v4901_v52 = vpop.eup %3913  ;;  %v1120_v54 = vpack.c.bf16 %v4899_v49, %v4895_v45 }
 0x342   : > { %v1121_v55 = vpack.c.bf16 %v4897_v47, %v4901_v52 }
 0x343   : > { %3460 = vmatprep.mubr.bf16.mxu1 %v1120_v54 }
 0x344   : > { %3461 = vmatmul.mubr.bf16.vlgmr.msra.gmra.mrb[16].mxu1 %v1121_v55 }
 0x345   : > { %3477 = vmatpush3.bf16.xpose.msra.mxu1 %v1338_v56 }
 0x346   : > { %3725 = vmatprep.subr.msk.bf16.mxu1 %vm862_vm0, %v1300_v22 }
 0x34d   : > { %3479 = vmatpush3.bf16.xpose.msra.mxu1 %v1341_v58 }
 0x34e   : > { %3726 = vmatprep.subr.msk.bf16.mxu1 %vm862_vm0, %v1302_v24 }
 0x355   : > { %3481 = vmatpush3.bf16.xpose.msra.mxu1 %v1344_v60 }
 0x356   : > { %3727 = vmatprep.subr.msk.bf16.mxu1 %vm862_vm0, %v1304_v0 }
 0x35d   : > { %3483 = vmatpush3.bf16.xpose.msra.mxu1 %v1347_v3 }
 0x35e   : > { %3728 = vmatprep.subr.msk.bf16.mxu1 %vm862_vm0, %v1306_v4 }
 0x365   : > { %3485 = vmatpush3.bf16.xpose.msra.mxu1 %v1350_v62  ;;  %v1017_v5 = vpop.xlane.xlu1 %1016 }
 0x366   : > { %v1044_v22 = vsub.f32 %v4808_v7, %v1017_v5  ;;  %v1021_v26 = vpop.xlane.xlu0 %1020 }
 0x367   : > { %v1046_v29 = vsub.f32 %v4806_v6, %v1021_v26 }
 0x368   : > { %v1064_v30 = vmul.f32 1.442695, %v1044_v22 }
 0x369   : > { %v1023_v24 = vpop.xlane.xlu1 %1022  ;;  %v1068_v33 = vmul.f32 1.442695, %v1046_v29 }
 0x36a   : > { %v1047_v31 = vsub.f32 %v4810_v8, %v1023_v24  ;;  %v1025_v32 = vpop.xlane.xlu0 %1024  ;;  %3915 = vpow2.f32 %v1064_v30 }
 0x36b   : > { %v1048_v34 = vsub.f32 %v4816_v13, %v1025_v32  ;;  %3917 = vpow2.f32 %v1068_v33 }
 0x36c   : > { %v1070_v35 = vmul.f32 1.442695, %v1047_v31 }
 0x36d   : > { %v1072_v37 = vmul.f32 1.442695, %v1048_v34  ;;  %v1019_v39 = vpop.xlane.xlu1 %1018 }
 0x36e   : > { %v1045_v42 = vsub.f32 %v4812_v9, %v1019_v39  ;;  %v1027_v43 = vpop.xlane.xlu0 %1026  ;;  %3919 = vpow2.f32 %v1070_v35 }
 0x36f   : > { %v1049_v7 = vsub.f32 %v4820_v17, %v1027_v43  ;;  %3921 = vpow2.f32 %v1072_v37 }
 0x370   : > { %v1066_v6 = vmul.f32 1.442695, %v1045_v42 }
 0x371   : > { %v1074_v54 = vmul.f32 1.442695, %v1049_v7  ;;  %v1029_v55 = vpop.xlane.xlu1 %1028 }
 0x372   : > { %3923 = vpow2.f32 %v1066_v6  ;;  %v1050_v8 = vsub.f32 %v4814_v11, %v1029_v55  ;;  %v1037_v56 = vpop.xlane.xlu0 %1036 }
 0x373   : > { %3925 = vpow2.f32 %v1074_v54  ;;  %v1054_v34 = vsub.f32 %v4824_v18, %v1037_v56 }
 0x374   : > { %v1076_v13 = vmul.f32 1.442695, %v1050_v8  ;;  %v4925_v9 = vpop.eup %3915 }
 0x375   : > { %v1031_v58 = vpop.xlane.xlu1 %1030  ;;  %5946 = vst [vmem:[#allocation17_spill] sm:$0xff] %v4925_v9  ;;  %v4927_v4 = vpop.eup %3917 }
 0x376   : > { %v1051_v60 = vsub.f32 %v4818_v16, %v1031_v58  ;;  %v1310_v0 = vpop.permute.xlu0 %1309  ;;  %5947 = vst [vmem:[#allocation18_spill] sm:$0xff] %v4927_v4  ;;  %3927 = vpow2.f32 %v1076_v13 }
 0x378   : > { %v1078_v3 = vmul.f32 1.442695, %v1051_v60  ;;  %v4929_v62 = vpop.eup %3919 }
 0x379   : > { %v1033_v17 = vpop.xlane.xlu1 %1032  ;;  %5948 = vst [vmem:[#allocation19_spill] sm:$0xff] %v4929_v62  ;;  %v4931_v22 = vpop.eup %3921  ;;  %v1123_v32 = vpack.c.bf16 %v4929_v62, %v4927_v4 }
 0x37a   : > { %3929 = vpow2.f32 %v1078_v3  ;;  %v1312_v5 = vpop.permute.xlu0 %1311  ;;  %v1052_v26 = vsub.f32 %v4826_v19, %v1033_v17  ;;  %v1356_v3 = vsel %vm862_vm0, %v1310_v0, 0 }
 0x37c   : > { %v4933_v11 = vpop.eup %3923  ;;  %v1080_v35 = vmul.f32 1.442695, %v1052_v26 }
 0x37d   : > { %5949 = vst [vmem:[#allocation20_spill] sm:$0xff] %v4933_v11  ;;  %v4936_v29 = vpop.eup %3925  ;;  %v1039_v16 = vpop.xlane.xlu1 %1038  ;;  %v1122_v24 = vpack.c.bf16 %v4933_v11, %v4925_v9 }
 0x37e   : > { %v1055_v30 = vsub.f32 %v4828_v20, %v1039_v16  ;;  %v1274_v31 = vpop.permute.xlu0 %1273  ;;  %v1124_v33 = vpack.c.bf16 %v4936_v29, %v4931_v22  ;;  %v1084_v20 = vmul.f32 1.442695, %v1054_v34  ;;  %3931 = vpow2.f32 %v1080_v35 }
 0x37f   : > { %3464 = vmatprep.mubr.bf16.mxu1 %v1122_v24 }
 0x380   : > { %3465 = vmatmul.mubr.bf16.gmra.mrb[20].mxu1 %v1123_v32  ;;  %v1086_v19 = vmul.f32 1.442695, %v1055_v30  ;;  %v4947_v43 = vpop.eup %3927 }
 0x381   : > { %v1035_v37 = vpop.xlane.xlu1 %1034  ;;  %3468 = vmatprep.mubr.bf16.mxu1 %v1124_v33  ;;  %v1359_v33 = vsel %vm862_vm0, %v1312_v5, 0 }
 0x382   : > { %v1053_v39 = vsub.f32 %v4830_v21, %v1035_v37  ;;  %v1278_v42 = vpop.permute.xlu0 %1277  ;;  %3933 = vpow2.f32 %v1086_v19 }
 0x384   : > { %v4949_v7 = vpop.eup %3929  ;;  %v1082_v6 = vmul.f32 1.442695, %v1053_v39 }
 0x385   : > { %v1308_v54 = vpop.permute.xlu1 %1307  ;;  %v1125_v18 = vpack.c.bf16 %v4949_v7, %v4947_v43 }
 0x386   : > { %3935 = vpow2.f32 %v1082_v6  ;;  %v1282_v55 = vpop.permute.xlu0 %1281  ;;  %3729 = vmatprep.subr.msk.bf16.mxu1 %vm862_vm0, %v1308_v54  ;;  %v1353_v8 = vsel %vm862_vm0, %v1308_v54, 0 }
 0x387   : > { %3937 = vpow2.f32 %v1084_v20  ;;  %3487 = vmatpush3.bf16.xpose.msra.mxu1 %v1353_v8 }
 0x388   : > { %3469 = vmatmul.mubr.bf16.gmra.mrb[24].mxu1 %v1125_v18  ;;  %3730 = vmatprep.subr.msk.bf16.mxu1 %vm862_vm0, %v1310_v0  ;;  %v4956_v58 = vpop.eup %3931 }
 0x389   : > { %v1276_v21 = vpop.permute.xlu1 %1275  ;;  %5950 = vst [vmem:[#allocation21_spill] sm:$0xff] %v4956_v58 }
 0x38a   : > { %v1286_v56 = vpop.permute.xlu0 %1285 }
 0x38c   : > { %v4959_v17 = vpop.eup %3933 }
 0x38d   : > { %v1280_v13 = vpop.permute.xlu1 %1279  ;;  %5951 = vst [vmem:[#allocation22_spill] sm:$0xff] %v4959_v17 }
 0x38e   : > { %v1587_v60 = vpop.permute.xlu0 %1586 }
 0x38f   : > { %3489 = vmatpush3.bf16.xpose.msra.mxu1 %v1356_v3  ;;  %3508 = vmatprep.subr.bf16.mxu0 %v1587_v60 }
 0x390   : > { %v4961_v26 = vpop.eup %3935  ;;  %3731 = vmatprep.subr.msk.bf16.mxu1 %vm862_vm0, %v1312_v5  ;;  %3509 = vmatpush3.bf16.msra.mxu0 %v1587_v60 }
 0x391   : > { %5952 = vst [vmem:[#allocation23_spill] sm:$0xff] %v4961_v26  ;;  %v4964_v16 = vpop.eup %3937  ;;  %v1284_v24 = vpop.permute.xlu1 %1283  ;;  %v1126_v30 = vpack.c.bf16 %v4961_v26, %v4956_v58 }
 0x392   : > { %5953 = vst [vmem:[#allocation24_spill] sm:$0xff] %v4964_v16  ;;  %v1127_v32 = vpack.c.bf16 %v4959_v17, %v4964_v16  ;;  %v1591_v35 = vpop.permute.xlu0 %1590 }
 0x393   : > { %3472 = vmatprep.mubr.bf16.mxu1 %v1126_v30 }
 0x394   : > { %3473 = vmatmul.mubr.bf16.gmra.mrb[28].mxu1 %v1127_v32 }
 0x395   : > { %v1288_v0 = vpop.permute.xlu1 %1287  ;;  %3492 = vmatprep.mubr.msk.bf16.mxu1 %vm862_vm0, %v1274_v31 }
 0x396   : > { %v1599_v5 = vpop.permute.xlu0 %1598 }
 0x397   : > { %3491 = vmatpush3.bf16.xpose.msra.mxu1 %v1359_v33 }
 0x399   : > { %v1589_v34 = vpop.permute.xlu1 %1588 }
 0x39a   : > { %3510 = vmatprep.subr.bf16.mxu0 %v1589_v34 }
 0x39b   : > { %3511 = vmatpush3.bf16.msra.mxu0 %v1589_v34 }
 0x39c   : > { %3512 = vmatprep.subr.bf16.mxu0 %v1591_v35 }
 0x39d   : > { %v1593_v19 = vpop.permute.xlu1 %1592 }
 0x39e   : > { %3493 = vmatmul.mubr.msk.bf16.vlgmr.msra.gmra.mrb[32].mxu1 %vm862_vm0, %v1276_v21 }
 0x39f   : > { %3496 = vmatprep.mubr.msk.bf16.mxu1 %vm862_vm0, %v1278_v42  ;;  %3513 = vmatpush3.bf16.msra.mxu0 %v1591_v35  ;;  %v4978_v42 = vpop.permute.xlu0 %1763 }
 0x3a0   : > { %3514 = vmatprep.subr.bf16.mxu0 %v1593_v19 }
 0x3a1   : > { %v1595_v37 = vpop.permute.xlu1 %1594 }
 0x3a3   : > { %3515 = vmatpush3.bf16.msra.mxu0 %v1593_v19 }
 0x3a4   : > { %3516 = vmatprep.subr.bf16.mxu0 %v1595_v37 }
 0x3a5   : > { %v1597_v31 = vpop.permute.xlu1 %1596 }
 0x3a6   : > { %3497 = vmatmul.mubr.msk.bf16.gmra.mrb[36].mxu1 %vm862_vm0, %v1280_v13 }
 0x3a7   : > { %3500 = vmatprep.mubr.msk.bf16.mxu1 %vm862_vm0, %v1282_v55  ;;  %3517 = vmatpush3.bf16.msra.mxu0 %v1595_v37 }
 0x3a8   : > { %3518 = vmatprep.subr.bf16.mxu0 %v1597_v31 }
 0x3a9   : > { %v1601_v39 = vpop.permute.xlu1 %1600 }
 0x3ab   : > { %3519 = vmatpush3.bf16.msra.mxu0 %v1597_v31 }
 0x3ac   : > { %3520 = vmatprep.subr.bf16.mxu0 %v1599_v5 }
 0x3ae   : > { %3501 = vmatmul.mubr.msk.bf16.gmra.mrb[40].mxu1 %vm862_vm0, %v1284_v24 }
 0x3af   : > { %3504 = vmatprep.mubr.msk.bf16.mxu1 %vm862_vm0, %v1286_v56  ;;  %3521 = vmatpush3.bf16.msra.mxu0 %v1599_v5 }
 0x3b0   : > { %3522 = vmatprep.subr.bf16.mxu0 %v1601_v39 }
 0x3b3   : > { %3523 = vmatpush3.bf16.msra.mxu0 %v1601_v39 }
 0x3b4   : > { %3732 = vmatprep.subr.msk.bf16.mxu0 %vm862_vm0, %v4978_v42 }
 0x3b6   : > { %3505 = vmatmul.mubr.msk.bf16.gmra.mrb[44].mxu1 %vm862_vm0, %v1288_v0 }
 0x417   : > { %v4983_v20 = vpop.f32.mrb[16].mxu1 }
 0x418   : > { %5954 = vst [vmem:[#allocation25_spill] sm:$0xff] %v4983_v20  ;;  %v4985_v6 = vpop.f32.mrb[17].mxu1 }
 0x419   : > { %5955 = vst [vmem:[#allocation26_spill] sm:$0xff] %v4985_v6  ;;  %v4987_v54 = vpop.f32.mrb[18].mxu1 }
 0x41a   : > { %5956 = vst [vmem:[#allocation27_spill] sm:$0xff] %v4987_v54  ;;  %v4989_v18 = vpop.f32.mrb[19].mxu1 }
 0x41b   : > { %5957 = vst [vmem:[#allocation28_spill] sm:$0xff] %v4989_v18 }
 0x453   : > { %v4991_v55 = vpop.f32.mrb[20].mxu1 }
 0x454   : > { %5958 = vst [vmem:[#allocation29_spill] sm:$0xff] %v4991_v55  ;;  %v4993_v8 = vpop.f32.mrb[21].mxu1 }
 0x455   : > { %5959 = vst [vmem:[#allocation30_spill] sm:$0xff] %v4993_v8  ;;  %v4995_v21 = vpop.f32.mrb[22].mxu1 }
 0x456   : > { %5960 = vst [vmem:[#allocation31_spill] sm:$0xff] %v4995_v21  ;;  %v4997_v56 = vpop.f32.mrb[23].mxu1 }
 0x457   : > { %5961 = vst [vmem:[#allocation32_spill] sm:$0xff] %v4997_v56 }
 0x45b   : > { %v4999_v13 = vpop.f32.mrb[24].mxu1 }
 0x45c   : > { %5962 = vst [vmem:[#allocation33_spill] sm:$0xff] %v4999_v13  ;;  %v5001_v60 = vpop.f32.mrb[25].mxu1 }
 0x45d   : > { %5963 = vst [vmem:[#allocation34_spill] sm:$0xff] %v5001_v60  ;;  %v5003_v3 = vpop.f32.mrb[26].mxu1 }
 0x45e   : > { %5964 = vst [vmem:[#allocation35_spill] sm:$0xff] %v5003_v3  ;;  %v5005_v24 = vpop.f32.mrb[27].mxu1 }
 0x45f   : > { %5965 = vst [vmem:[#allocation36_spill] sm:$0xff] %v5005_v24  ;;  %v5108_v24 = vpop.permute.xlu1 %1767 }
 0x467   : > { %v5007_v30 = vpop.f32.mrb[28].mxu1 }
 0x468   : > { %5966 = vst [vmem:[#allocation37_spill] sm:$0xff] %v5007_v30  ;;  %v5009_v32 = vpop.f32.mrb[29].mxu1 }
 0x469   : > { %5967 = vst [vmem:[#allocation38_spill] sm:$0xff] %v5009_v32  ;;  %v5011_v0 = vpop.f32.mrb[30].mxu1 }
 0x46a   : > { %5968 = vst [vmem:[#allocation39_spill] sm:$0xff] %v5011_v0  ;;  %v5013_v33 = vpop.f32.mrb[31].mxu1 }
 0x46b   : > { %5969 = vst [vmem:[#allocation40_spill] sm:$0xff] %v5013_v33 }
 0x471   : > { %v5015_v34 = vpop.f32.mrb[32].mxu1 }
 0x472   : > { %1462 = vmax.xlane.f32.xlu0 %v5015_v34  ;;  %v5018_v35 = vpop.f32.mrb[33].mxu1 }
 0x473   : > { %v5020_v19 = vpop.f32.mrb[34].mxu1 }
 0x474   : > { %v1398_v37 = vpop.f32.mrb[35].mxu1 }
 0x475   : > { %1460 = vmax.xlane.f32.xlu1 %v1398_v37 }
 0x476   : > { %1458 = vmax.xlane.f32.xlu0 %v5018_v35 }
 0x479   : > { %v5023_v31 = vpop.f32.mrb[36].mxu1 }
 0x47a   : > { %1464 = vmax.xlane.f32.xlu0 %v5020_v19  ;;  %1470 = vmax.xlane.f32.xlu1 %v5023_v31  ;;  %v5027_v5 = vpop.f32.mrb[37].mxu1 }
 0x47b   : > { %v5029_v39 = vpop.f32.mrb[38].mxu1 }
 0x47c   : > { %v5031_v30 = vpop.f32.mrb[39].mxu1 }
 0x47e   : > { %1466 = vmax.xlane.f32.xlu1 %v5027_v5  ;;  %1468 = vmax.xlane.f32.xlu0 %v5031_v30 }
 0x481   : > { %v5035_v55 = vpop.f32.mrb[40].mxu1 }
 0x482   : > { %1472 = vmax.xlane.f32.xlu1 %v5029_v39  ;;  %1478 = vmax.xlane.f32.xlu0 %v5035_v55  ;;  %v5039_v21 = vpop.f32.mrb[41].mxu1 }
 0x483   : > { %v5041_v32 = vpop.f32.mrb[42].mxu1 }
 0x484   : > { %v5043_v8 = vpop.f32.mrb[43].mxu1 }
 0x486   : > { %1474 = vmax.xlane.f32.xlu1 %v5039_v21 }
 0x489   : > { %v5046_v0 = vpop.f32.mrb[44].mxu1 }
 0x48a   : > { %1480 = vmax.xlane.f32.xlu1 %v5041_v32  ;;  %v5049_v33 = vpop.f32.mrb[45].mxu1 }
 0x48b   : > { %1482 = vmax.xlane.f32.xlu0 %v5049_v33  ;;  %v5052_v56 = vpop.f32.mrb[46].mxu1 }
 0x48c   : > { %v5054_v3 = vpop.f32.mrb[47].mxu1 }
 0x48e   : > { %1476 = vmax.xlane.f32.xlu1 %v5043_v8 }
 0x492   : > { %1486 = vmax.xlane.f32.xlu1 %v5046_v0 }
 0x496   : > { %1488 = vmax.xlane.f32.xlu1 %v5052_v56 }
 0x4a1   : > { %1773 = vrot.lane.b32.xlu0 %v4747_v38, %s4379_s28 }
 0x4a7   : > { %1771 = vrot.lane.b32.xlu1 %v4733_v25, %s4379_s28 }
 0x4ab   : > { %1749 = vrot.lane.b32.xlu1 %v4699_v61, %s4379_s28 }
 0x4af   : > { %1753 = vrot.lane.b32.xlu1 %v4717_v10, %s4379_s28 }
 0x4b3   : > { %1757 = vrot.lane.b32.xlu1 %v4731_v23, %s4379_s28 }
 0x4b7   : > { %1761 = vrot.lane.b32.xlu1 %v4745_v36, %s4379_s28 }
 0x4bb   : > { %2046 = vrot.lane.b32.xlu1 %v4689_v53, %s4379_s28 }
 0x4bf   : > { %2050 = vrot.lane.b32.xlu1 %v4723_v15, %s4379_s28 }
 0x4c0   : > { %1484 = vmax.xlane.f32.xlu0 %v5054_v3 }
 0x4c3   : > { %2052 = vrot.lane.b32.xlu1 %v4737_v28, %s4379_s28 }
 0x4c7   : > { %2054 = vrot.lane.b32.xlu1 %v4751_v41, %s4379_s28 }
 0x4cb   : > { %2058 = vrot.lane.b32.xlu1 %v4771_v59, %s4379_s28 }
 0x4cf   : > { %2225 = vrot.lane.b32.xlu1 %v4701_v63, %s4380_s30  ;;  %v5100_v63 = vpop.permute.xlu0 %1765 }
 0x4d3   : > { %v5106_v54 = vpop.permute.xlu0 %1769 }
 0x4d6   : > { %1775 = vrot.lane.b32.xlu0 %v4759_v48, %s4379_s28 }
 0x4da   : > { %1777 = vrot.lane.b32.xlu0 %v4769_v57, %s4379_s28 }
 0x4de   : > { %1747 = vrot.lane.b32.xlu0 %v4703_v1, %s4379_s28 }
 0x4e2   : > { %1751 = vrot.lane.b32.xlu0 %v4721_v14, %s4379_s28 }
 0x4e6   : > { %1755 = vrot.lane.b32.xlu0 %v4735_v27, %s4379_s28 }
 0x4ea   : > { %1759 = vrot.lane.b32.xlu0 %v4749_v40, %s4379_s28 }
 0x4ee   : > { %2044 = vrot.lane.b32.xlu0 %v4677_v46, %s4379_s28 }
 0x4f2   : > { %2048 = vrot.lane.b32.xlu0 %v4705_v2, %s4379_s28 }
 0x4f6   : > { %2056 = vrot.lane.b32.xlu0 %v4761_v50, %s4379_s28 }
 0x4fa   : > { %2221 = vrot.lane.b32.xlu0 %v4675_v44, %s4380_s30 }
 0x4fe   : > { %2223 = vrot.lane.b32.xlu0 %v4687_v51, %s4380_s30 }
 0x4ff   : > { %v1463_v18 = vpop.xlane.xlu0 %1462 }
 0x500   : > { %v1492_v20 = vsub.f32 %v5015_v34, %v1463_v18 }
 0x502   : > { %v1461_v13 = vpop.xlane.xlu1 %1460  ;;  %2227 = vrot.lane.b32.xlu0 %v4719_v12, %s4380_s30  ;;  %v1510_v58 = vmul.f32 1.442695, %v1492_v20 }
 0x503   : > { %v1491_v60 = vsub.f32 %v1398_v37, %v1461_v13  ;;  %v1459_v6 = vpop.xlane.xlu0 %1458 }
 0x504   : > { %v1490_v16 = vsub.f32 %v5018_v35, %v1459_v6 }
 0x505   : > { %v1508_v4 = vmul.f32 1.442695, %v1491_v60 }
 0x506   : > { %v1506_v44 = vmul.f32 1.442695, %v1490_v16 }
 0x507   : > { %3939 = vpow2.f32 %v1508_v4  ;;  %v1465_v9 = vpop.xlane.xlu0 %1464  ;;  %v1471_v17 = vpop.xlane.xlu1 %1470 }
 0x508   : > { %3941 = vpow2.f32 %v1506_v44  ;;  %v1493_v51 = vsub.f32 %v5020_v19, %v1465_v9  ;;  %v1496_v26 = vsub.f32 %v5023_v31, %v1471_v17 }
 0x509   : > { %3943 = vpow2.f32 %v1510_v58 }
 0x50a   : > { %v1512_v62 = vmul.f32 1.442695, %v1493_v51  ;;  %v1518_v20 = vmul.f32 1.442695, %v1496_v26 }
 0x50b   : > { %v1467_v12 = vpop.xlane.xlu1 %1466  ;;  %v1469_v11 = vpop.xlane.xlu0 %1468 }
 0x50c   : > { %3945 = vpow2.f32 %v1512_v62  ;;  %v1494_v18 = vsub.f32 %v5027_v5, %v1467_v12  ;;  %v1495_v6 = vsub.f32 %v5031_v30, %v1469_v11 }
 0x50e   : > { %v1514_v13 = vmul.f32 1.442695, %v1494_v18  ;;  %v1516_v16 = vmul.f32 1.442695, %v1495_v6 }
 0x50f   : > { %v1473_v4 = vpop.xlane.xlu1 %1472  ;;  %v1479_v30 = vpop.xlane.xlu0 %1478 }
 0x510   : > { %3947 = vpow2.f32 %v1514_v13  ;;  %v1497_v60 = vsub.f32 %v5029_v39, %v1473_v4  ;;  %v1500_v5 = vsub.f32 %v5035_v55, %v1479_v30  ;;  %v1804_v39 = vsel %vm862_vm0, %v4978_v42, 0 }
 0x511   : > { %v5121_v34 = vpop.eup %3939  ;;  %3949 = vpow2.f32 %v1516_v16 }
 0x512   : > { %v5123_v9 = vpop.eup %3941  ;;  %v1520_v58 = vmul.f32 1.442695, %v1497_v60  ;;  %3951 = vpow2.f32 %v1518_v20  ;;  %v1526_v13 = vmul.f32 1.442695, %v1500_v5 }
 0x513   : > { %v1475_v17 = vpop.xlane.xlu1 %1474  ;;  %v1570_v62 = vpack.c.bf16 %v5121_v34, %v5123_v9  ;;  %v5127_v11 = vpop.eup %3943 }
 0x514   : > { %3953 = vpow2.f32 %v1520_v58  ;;  %v1498_v35 = vsub.f32 %v5039_v21, %v1475_v17  ;;  %v1810_v17 = vsel %vm862_vm0, %v5108_v24, 0 }
 0x515   : > { %3524 = vmatprep.mubr.bf16.mxu0 %v1570_v62 }
 0x516   : > { %v5129_v26 = vpop.eup %3945  ;;  %v1522_v51 = vmul.f32 1.442695, %v1498_v35 }
 0x517   : > { %v1481_v19 = vpop.xlane.xlu1 %1480  ;;  %v1571_v37 = vpack.c.bf16 %v5129_v26, %v5127_v11 }
 0x518   : > { %v1501_v31 = vsub.f32 %v5041_v32, %v1481_v19  ;;  %3955 = vpow2.f32 %v1522_v51 }
 0x519   : > { %3525 = vmatmul.mubr.bf16.vlgmr.msra.gmra.mrb[48].mxu0 %v1571_v37 }
 0x51a   : > { %v5138_v44 = vpop.eup %3947  ;;  %3541 = vmatpush3.bf16.xpose.msra.mxu0 %v1804_v39  ;;  %v1528_v18 = vmul.f32 1.442695, %v1501_v31  ;;  %v1483_v31 = vpop.xlane.xlu0 %1482 }
 0x51b   : > { %v5140_v12 = vpop.eup %3949  ;;  %3733 = vmatprep.subr.msk.bf16.mxu0 %vm862_vm0, %v5100_v63  ;;  %v1477_v21 = vpop.xlane.xlu1 %1476 }
 0x51c   : > { %v1499_v6 = vsub.f32 %v5043_v8, %v1477_v21  ;;  %v1572_v55 = vpack.c.bf16 %v5140_v12, %v5138_v44  ;;  %v5147_v32 = vpop.eup %3951  ;;  %3957 = vpow2.f32 %v1528_v18  ;;  %v1807_v8 = vsel %vm862_vm0, %v5100_v63, 0 }
 0x51d   : > { %v1502_v18 = vsub.f32 %v5049_v33, %v1483_v31 }
 0x51e   : > { %v5149_v42 = vpop.eup %3953  ;;  %v1524_v16 = vmul.f32 1.442695, %v1499_v6  ;;  %3528 = vmatprep.mubr.bf16.mxu0 %v1572_v55  ;;  %v1774_v39 = vpop.permute.xlu0 %1773 }
 0x51f   : > { %v1573_v20 = vpack.c.bf16 %v5149_v42, %v5147_v32  ;;  %v1487_v4 = vpop.xlane.xlu1 %1486  ;;  %v1819_v51 = vsel %vm862_vm0, %v1774_v39, 0  ;;  %v1530_v6 = vmul.f32 1.442695, %v1502_v18 }
 0x520   : > { %3959 = vpow2.f32 %v1524_v16 }
 0x521   : > { %3961 = vpow2.f32 %v1526_v13  ;;  %3529 = vmatmul.mubr.bf16.gmra.mrb[52].mxu0 %v1573_v20 }
 0x522   : > { %3543 = vmatpush3.bf16.xpose.msra.mxu0 %v1807_v8  ;;  %v5157_v60 = vpop.eup %3955  ;;  %3963 = vpow2.f32 %v1530_v6 }
 0x523   : > { %3734 = vmatprep.subr.msk.bf16.mxu0 %vm862_vm0, %v5108_v24  ;;  %v1489_v35 = vpop.xlane.xlu1 %1488  ;;  %v1813_v24 = vsel %vm862_vm0, %v5106_v54, 0 }
 0x524   : > { %v1505_v21 = vsub.f32 %v5052_v56, %v1489_v35 }
 0x526   : > { %v5159_v58 = vpop.eup %3957  ;;  %v1536_v55 = vmul.f32 1.442695, %v1505_v21 }
 0x527   : > { %v1772_v37 = vpop.permute.xlu1 %1771 }
 0x528   : > { %v1816_v5 = vsel %vm862_vm0, %v1772_v37, 0  ;;  %3965 = vpow2.f32 %v1536_v55 }
 0x52a   : > { %v5163_v62 = vpop.eup %3959  ;;  %3545 = vmatpush3.bf16.xpose.msra.mxu0 %v1810_v17 }
 0x52b   : > { %v5165_v30 = vpop.eup %3961  ;;  %3735 = vmatprep.subr.msk.bf16.mxu0 %vm862_vm0, %v5106_v54  ;;  %v1574_v63 = vpack.c.bf16 %v5163_v62, %v5157_v60  ;;  %v1504_v54 = vsub.f32 %v5046_v0, %v1487_v4  ;;  %v1750_v17 = vpop.permute.xlu1 %1749 }
 0x52c   : > { %v1575_v19 = vpack.c.bf16 %v5159_v58, %v5165_v30  ;;  %v5186_v35 = vpop.eup %3963 }
 0x52d   : > { %3532 = vmatprep.mubr.bf16.mxu0 %v1574_v63  ;;  %v1534_v20 = vmul.f32 1.442695, %v1504_v54 }
 0x52e   : > { %3533 = vmatmul.mubr.bf16.gmra.mrb[56].mxu0 %v1575_v19 }
 0x52f   : > { %v1754_v0 = vpop.permute.xlu1 %1753 }
 0x532   : > { %3547 = vmatpush3.bf16.xpose.msra.mxu0 %v1813_v24  ;;  %v5189_v19 = vpop.eup %3965 }
 0x533   : > { %3736 = vmatprep.subr.msk.bf16.mxu0 %vm862_vm0, %v1772_v37  ;;  %v1758_v31 = vpop.permute.xlu1 %1757 }
 0x537   : > { %v1762_v21 = vpop.permute.xlu1 %1761 }
 0x53a   : > { %3549 = vmatpush3.bf16.xpose.msra.mxu0 %v1816_v5 }
 0x53b   : > { %3737 = vmatprep.subr.msk.bf16.mxu0 %vm862_vm0, %v1774_v39  ;;  %v2047_v6 = vpop.permute.xlu1 %2046 }
 0x542   : > { %3551 = vmatpush3.bf16.xpose.msra.mxu0 %v1819_v51 }
 0x54d   : > { %v1485_v13 = vpop.xlane.xlu0 %1484 }
 0x54e   : > { %v1503_v16 = vsub.f32 %v5054_v3, %v1485_v13  ;;  %v2051_v13 = vpop.permute.xlu1 %2050 }
 0x550   : > { %v1532_v8 = vmul.f32 1.442695, %v1503_v16 }
 0x551   : > { %v1776_v63 = vpop.permute.xlu0 %1775 }
 0x552   : > { %3967 = vpow2.f32 %v1532_v8  ;;  %3738 = vmatprep.subr.msk.bf16.mxu0 %vm862_vm0, %v1776_v63  ;;  %v1822_v33 = vsel %vm862_vm0, %v1776_v63, 0 }
 0x553   : > { %3969 = vpow2.f32 %v1534_v20  ;;  %3553 = vmatpush3.bf16.xpose.msra.mxu0 %v1822_v33  ;;  %v2053_v20 = vpop.permute.xlu1 %2052 }
 0x555   : > { %v1778_v56 = vpop.permute.xlu0 %1777 }
 0x556   : > { %3739 = vmatprep.subr.msk.bf16.mxu0 %vm862_vm0, %v1778_v56  ;;  %v1825_v3 = vsel %vm862_vm0, %v1778_v56, 0 }
 0x557   : > { %v2055_v8 = vpop.permute.xlu1 %2054 }
 0x559   : > { %v1748_v4 = vpop.permute.xlu0 %1747 }
 0x55b   : > { %3555 = vmatpush3.bf16.xpose.msra.mxu0 %v1825_v3  ;;  %v2059_v63 = vpop.permute.xlu1 %2058 }
 0x55c   : > { %v5191_v24 = vpop.eup %3967 }
 0x55d   : > { %v5193_v37 = vpop.eup %3969  ;;  %v1752_v5 = vpop.permute.xlu0 %1751  ;;  %v1576_v39 = vpack.c.bf16 %v5191_v24, %v5186_v35 }
 0x55e   : > { %v1577_v51 = vpack.c.bf16 %v5189_v19, %v5193_v37 }
 0x55f   : > { %3536 = vmatprep.mubr.bf16.mxu0 %v1576_v39 }
 0x560   : > { %3537 = vmatmul.mubr.bf16.gmra.mrb[60].mxu0 %v1577_v51 }
 0x561   : > { %3556 = vmatprep.mubr.msk.bf16.mxu0 %vm862_vm0, %v1748_v4  ;;  %v1756_v18 = vpop.permute.xlu0 %1755 }
 0x565   : > { %v1760_v54 = vpop.permute.xlu0 %1759 }
 0x568   : > { %3557 = vmatmul.mubr.msk.bf16.vlgmr.msra.gmra.mrb[64].mxu0 %vm862_vm0, %v1750_v17 }
 0x569   : > { %3560 = vmatprep.mubr.msk.bf16.mxu0 %vm862_vm0, %v1752_v5  ;;  %v2045_v55 = vpop.permute.xlu0 %2044 }
 0x56a   : > { %3572 = vmatprep.subr.bf16.mxu1 %v2045_v55 }
 0x56b   : > { %3573 = vmatpush3.bf16.msra.mxu1 %v2045_v55 }
 0x56c   : > { %3574 = vmatprep.subr.bf16.mxu1 %v2047_v6 }
 0x56d   : > { %v2049_v16 = vpop.permute.xlu0 %2048 }
 0x56f   : > { %3575 = vmatpush3.bf16.msra.mxu1 %v2047_v6 }
 0x570   : > { %3561 = vmatmul.mubr.msk.bf16.gmra.mrb[68].mxu0 %vm862_vm0, %v1754_v0  ;;  %3576 = vmatprep.subr.bf16.mxu1 %v2049_v16 }
 0x571   : > { %3564 = vmatprep.mubr.msk.bf16.mxu0 %vm862_vm0, %v1756_v18  ;;  %v2057_v17 = vpop.permute.xlu0 %2056 }
 0x573   : > { %3577 = vmatpush3.bf16.msra.mxu1 %v2049_v16 }
 0x574   : > { %3578 = vmatprep.subr.bf16.mxu1 %v2051_v13 }
 0x575   : > { %v5207_v33 = vpop.permute.xlu0 %2221 }
 0x577   : > { %3579 = vmatpush3.bf16.msra.mxu1 %v2051_v13 }
 0x578   : > { %3565 = vmatmul.mubr.msk.bf16.gmra.mrb[72].mxu0 %vm862_vm0, %v1758_v31  ;;  %3580 = vmatprep.subr.bf16.mxu1 %v2053_v20 }
 0x579   : > { %3568 = vmatprep.mubr.msk.bf16.mxu0 %vm862_vm0, %v1760_v54 }
 0x57b   : > { %3581 = vmatpush3.bf16.msra.mxu1 %v2053_v20 }
 0x57c   : > { %3582 = vmatprep.subr.bf16.mxu1 %v2055_v8 }
 0x57f   : > { %3583 = vmatpush3.bf16.msra.mxu1 %v2055_v8 }
 0x580   : > { %3569 = vmatmul.mubr.msk.bf16.gmra.mrb[76].mxu0 %vm862_vm0, %v1762_v21  ;;  %3584 = vmatprep.subr.bf16.mxu1 %v2057_v17 }
 0x583   : > { %3585 = vmatpush3.bf16.msra.mxu1 %v2057_v17 }
 0x584   : > { %3586 = vmatprep.subr.bf16.mxu1 %v2059_v63 }
 0x587   : > { %3587 = vmatpush3.bf16.msra.mxu1 %v2059_v63 }
 0x588   : > { %3740 = vmatprep.subr.msk.bf16.mxu1 %vm862_vm0, %v5207_v33 }
 0x5ec   : > { %v5211_v56 = vpop.f32.mrb[48].mxu0 }
 0x5ed   : > { %5970 = vst [vmem:[#allocation41_spill] sm:$0xff] %v5211_v56  ;;  %v5213_v0 = vpop.f32.mrb[49].mxu0 }
 0x5ee   : > { %v5215_v4 = vpop.f32.mrb[50].mxu0 }
 0x5ef   : > { %5971 = vst [vmem:[#allocation42_spill] sm:$0xff] %v5215_v4  ;;  %v5217_v3 = vpop.f32.mrb[51].mxu0 }
 0x5f4   : > { %v5219_v31 = vpop.f32.mrb[52].mxu0 }
 0x5f5   : > { %5972 = vst [vmem:[#allocation43_spill] sm:$0xff] %v5219_v31  ;;  %v5221_v5 = vpop.f32.mrb[53].mxu0 }
 0x5f6   : > { %5973 = vst [vmem:[#allocation44_spill] sm:$0xff] %v5221_v5  ;;  %v5223_v39 = vpop.f32.mrb[54].mxu0 }
 0x5f7   : > { %5974 = vst [vmem:[#allocation45_spill] sm:$0xff] %v5223_v39  ;;  %v5225_v51 = vpop.f32.mrb[55].mxu0 }
 0x5f8   : > { %5975 = vst [vmem:[#allocation46_spill] sm:$0xff] %v5225_v51 }
 0x601   : > { %v5227_v18 = vpop.f32.mrb[56].mxu0 }
 0x602   : > { %5976 = vst [vmem:[#allocation47_spill] sm:$0xff] %v5227_v18  ;;  %v5229_v21 = vpop.f32.mrb[57].mxu0 }
 0x603   : > { %5977 = vst [vmem:[#allocation48_spill] sm:$0xff] %v5229_v21  ;;  %v5231_v54 = vpop.f32.mrb[58].mxu0 }
 0x604   : > { %5978 = vst [vmem:[#allocation49_spill] sm:$0xff] %v5231_v54  ;;  %v5233_v6 = vpop.f32.mrb[59].mxu0 }
 0x605   : > { %5979 = vst [vmem:[#allocation50_spill] sm:$0xff] %v5233_v6 }
 0x633   : > { %v5235_v55 = vpop.f32.mrb[60].mxu0 }
 0x634   : > { %5980 = vst [vmem:[#allocation51_spill] sm:$0xff] %v5235_v55  ;;  %v5237_v13 = vpop.f32.mrb[61].mxu0 }
 0x635   : > { %5981 = vst [vmem:[#allocation52_spill] sm:$0xff] %v5237_v13  ;;  %v5239_v16 = vpop.f32.mrb[62].mxu0 }
 0x636   : > { %5982 = vst [vmem:[#allocation53_spill] sm:$0xff] %v5239_v16  ;;  %v5241_v20 = vpop.f32.mrb[63].mxu0 }
 0x637   : > { %5983 = vst [vmem:[#allocation54_spill] sm:$0xff] %v5241_v20 }
 0x63b   : > { %v5243_v8 = vpop.f32.mrb[64].mxu0 }
 0x63c   : > { %1928 = vmax.xlane.f32.xlu0 %v5243_v8  ;;  %v1861_v17 = vpop.f32.mrb[65].mxu0 }
 0x63d   : > { %v5246_v63 = vpop.f32.mrb[66].mxu0 }
 0x63e   : > { %v1864_v39 = vpop.f32.mrb[67].mxu0 }
 0x63f   : > { %1926 = vmax.xlane.f32.xlu1 %v1864_v39 }
 0x640   : > { %1924 = vmax.xlane.f32.xlu0 %v1861_v17 }
 0x643   : > { %v5248_v31 = vpop.f32.mrb[68].mxu0 }
 0x644   : > { %1930 = vmax.xlane.f32.xlu0 %v5246_v63  ;;  %1936 = vmax.xlane.f32.xlu1 %v5248_v31  ;;  %v5252_v55 = vpop.f32.mrb[69].mxu0 }
 0x645   : > { %v5254_v16 = vpop.f32.mrb[70].mxu0 }
 0x646   : > { %v5256_v20 = vpop.f32.mrb[71].mxu0 }
 0x648   : > { %1932 = vmax.xlane.f32.xlu1 %v5252_v55  ;;  %1934 = vmax.xlane.f32.xlu0 %v5256_v20 }
 0x64b   : > { %v5260_v13 = vpop.f32.mrb[72].mxu0 }
 0x64c   : > { %1938 = vmax.xlane.f32.xlu1 %v5254_v16  ;;  %1944 = vmax.xlane.f32.xlu0 %v5260_v13  ;;  %v5264_v51 = vpop.f32.mrb[73].mxu0 }
 0x64d   : > { %v5266_v5 = vpop.f32.mrb[74].mxu0 }
 0x64e   : > { %v5268_v54 = vpop.f32.mrb[75].mxu0 }
 0x650   : > { %1940 = vmax.xlane.f32.xlu1 %v5264_v51 }
 0x653   : > { %v5271_v18 = vpop.f32.mrb[76].mxu0 }
 0x654   : > { %1946 = vmax.xlane.f32.xlu1 %v5266_v5  ;;  %v5274_v4 = vpop.f32.mrb[77].mxu0 }
 0x655   : > { %1948 = vmax.xlane.f32.xlu0 %v5274_v4  ;;  %v5277_v56 = vpop.f32.mrb[78].mxu0 }
 0x656   : > { %v5279_v6 = vpop.f32.mrb[79].mxu0 }
 0x658   : > { %1942 = vmax.xlane.f32.xlu1 %v5268_v54 }
 0x65c   : > { %1952 = vmax.xlane.f32.xlu1 %v5271_v18 }
 0x660   : > { %1954 = vmax.xlane.f32.xlu1 %v5277_v56 }
 0x66b   : > { %2231 = vrot.lane.b32.xlu0 %v4747_v38, %s4380_s30 }
 0x671   : > { %2229 = vrot.lane.b32.xlu1 %v4733_v25, %s4380_s30 }
 0x675   : > { %2207 = vrot.lane.b32.xlu1 %v4699_v61, %s4380_s30 }
 0x679   : > { %2211 = vrot.lane.b32.xlu1 %v4717_v10, %s4380_s30 }
 0x67d   : > { %2215 = vrot.lane.b32.xlu1 %v4731_v23, %s4380_s30 }
 0x681   : > { %2219 = vrot.lane.b32.xlu1 %v4745_v36, %s4380_s30 }
 0x685   : > { %2504 = vrot.lane.b32.xlu1 %v4689_v53, %s4380_s30  ;;  %v5317_v53 = vpop.permute.xlu0 %2223 }
 0x689   : > { %2510 = vrot.lane.b32.xlu1 %v4737_v28, %s4380_s30  ;;  %v5323_v61 = vpop.permute.xlu0 %2227 }
 0x68a   : > { %1950 = vmax.xlane.f32.xlu0 %v5279_v6 }
 0x6a0   : > { %2233 = vrot.lane.b32.xlu0 %v4759_v48, %s4380_s30 }
 0x6a4   : > { %2235 = vrot.lane.b32.xlu0 %v4769_v57, %s4380_s30 }
 0x6a8   : > { %2205 = vrot.lane.b32.xlu0 %v4703_v1, %s4380_s30  ;;  %v5325_v1 = vpop.permute.xlu1 %2225 }
 0x6ac   : > { %2209 = vrot.lane.b32.xlu0 %v4721_v14, %s4380_s30 }
 0x6b0   : > { %2213 = vrot.lane.b32.xlu0 %v4735_v27, %s4380_s30 }
 0x6b4   : > { %2217 = vrot.lane.b32.xlu0 %v4749_v40, %s4380_s30 }
 0x6b8   : > { %2502 = vrot.lane.b32.xlu0 %v4677_v46, %s4380_s30 }
 0x6bc   : > { %2506 = vrot.lane.b32.xlu0 %v4705_v2, %s4380_s30 }
 0x6c0   : > { %2508 = vrot.lane.b32.xlu0 %v4723_v15, %s4380_s30 }
 0x6c4   : > { %2512 = vrot.lane.b32.xlu0 %v4751_v41, %s4380_s30 }
 0x6c9   : > { %v1929_v10 = vpop.xlane.xlu0 %1928 }
 0x6ca   : > { %v1958_v46 = vsub.f32 %v5243_v8, %v1929_v10 }
 0x6cc   : > { %v1927_v14 = vpop.xlane.xlu1 %1926  ;;  %v1976_v15 = vmul.f32 1.442695, %v1958_v46 }
 0x6cd   : > { %v1957_v23 = vsub.f32 %v1864_v39, %v1927_v14  ;;  %v1925_v25 = vpop.xlane.xlu0 %1924 }
 0x6ce   : > { %v1956_v27 = vsub.f32 %v1861_v17, %v1925_v25 }
 0x6cf   : > { %v1974_v2 = vmul.f32 1.442695, %v1957_v23 }
 0x6d0   : > { %v1972_v28 = vmul.f32 1.442695, %v1956_v27 }
 0x6d1   : > { %3971 = vpow2.f32 %v1974_v2  ;;  %v1937_v36 = vpop.xlane.xlu1 %1936  ;;  %v1931_v38 = vpop.xlane.xlu0 %1930 }
 0x6d2   : > { %3973 = vpow2.f32 %v1972_v28  ;;  %v1959_v40 = vsub.f32 %v5246_v63, %v1931_v38  ;;  %v1962_v48 = vsub.f32 %v5248_v31, %v1937_v36 }
 0x6d3   : > { %3975 = vpow2.f32 %v1976_v15 }
 0x6d4   : > { %v1978_v41 = vmul.f32 1.442695, %v1959_v40  ;;  %v1984_v14 = vmul.f32 1.442695, %v1962_v48  ;;  %v2262_v48 = vsel %vm862_vm0, %v5207_v33, 0 }
 0x6d5   : > { %v1933_v57 = vpop.xlane.xlu1 %1932  ;;  %v1935_v21 = vpop.xlane.xlu0 %1934 }
 0x6d6   : > { %v1960_v39 = vsub.f32 %v5252_v55, %v1933_v57  ;;  %v1961_v8 = vsub.f32 %v5256_v20, %v1935_v21  ;;  %3977 = vpow2.f32 %v1978_v41 }
 0x6d8   : > { %v1980_v17 = vmul.f32 1.442695, %v1960_v39  ;;  %v1982_v10 = vmul.f32 1.442695, %v1961_v8 }
 0x6d9   : > { %v1939_v23 = vpop.xlane.xlu1 %1938  ;;  %v1945_v20 = vpop.xlane.xlu0 %1944 }
 0x6da   : > { %3979 = vpow2.f32 %v1980_v17  ;;  %v1963_v25 = vsub.f32 %v5254_v16, %v1939_v23  ;;  %v1966_v15 = vsub.f32 %v5260_v13, %v1945_v20 }
 0x6db   : > { %v5333_v46 = vpop.eup %3971  ;;  %3981 = vpow2.f32 %v1982_v10 }
 0x6dc   : > { %v5335_v63 = vpop.eup %3973  ;;  %v1986_v31 = vmul.f32 1.442695, %v1963_v25  ;;  %3983 = vpow2.f32 %v1984_v14  ;;  %v1992_v17 = vmul.f32 1.442695, %v1966_v15 }
 0x6dd   : > { %v1941_v27 = vpop.xlane.xlu1 %1940  ;;  %v2036_v55 = vpack.c.bf16 %v5333_v46, %v5335_v63  ;;  %v5339_v21 = vpop.eup %3975 }
 0x6de   : > { %3985 = vpow2.f32 %v1986_v31  ;;  %v1964_v2 = vsub.f32 %v5264_v51, %v1941_v27 }
 0x6df   : > { %3588 = vmatprep.mubr.bf16.mxu1 %v2036_v55  ;;  %v2268_v55 = vsel %vm862_vm0, %v5325_v1, 0 }
 0x6e0   : > { %v5342_v28 = vpop.eup %3977  ;;  %v1988_v41 = vmul.f32 1.442695, %v1964_v2 }
 0x6e1   : > { %v1947_v16 = vpop.xlane.xlu1 %1946  ;;  %v2037_v38 = vpack.c.bf16 %v5342_v28, %v5339_v21 }
 0x6e2   : > { %v1967_v36 = vsub.f32 %v5266_v5, %v1947_v16  ;;  %3987 = vpow2.f32 %v1988_v41 }
 0x6e3   : > { %3589 = vmatmul.mubr.bf16.vlgmr.msra.gmra.mrb[48].mxu1 %v2037_v38 }
 0x6e4   : > { %v5348_v40 = vpop.eup %3979  ;;  %v1994_v51 = vmul.f32 1.442695, %v1967_v36  ;;  %3605 = vmatpush3.bf16.xpose.msra.mxu1 %v2262_v48  ;;  %v2271_v36 = vsel %vm862_vm0, %v5323_v61, 0 }
 0x6e5   : > { %v5352_v57 = vpop.eup %3981  ;;  %v1943_v39 = vpop.xlane.xlu1 %1942  ;;  %3741 = vmatprep.subr.msk.bf16.mxu1 %vm862_vm0, %v5317_v53 }
 0x6e6   : > { %v1965_v5 = vsub.f32 %v5268_v54, %v1943_v39  ;;  %v2038_v13 = vpack.c.bf16 %v5352_v57, %v5348_v40  ;;  %v5359_v8 = vpop.eup %3983  ;;  %3989 = vpow2.f32 %v1994_v51  ;;  %v2265_v54 = vsel %vm862_vm0, %v5317_v53, 0 }
 0x6e8   : > { %v5361_v10 = vpop.eup %3985  ;;  %v1990_v33 = vmul.f32 1.442695, %v1965_v5  ;;  %3592 = vmatprep.mubr.bf16.mxu1 %v2038_v13 }
 0x6e9   : > { %v2039_v14 = vpack.c.bf16 %v5361_v10, %v5359_v8  ;;  %v1953_v23 = vpop.xlane.xlu1 %1952 }
 0x6ea   : > { %3991 = vpow2.f32 %v1990_v33 }
 0x6eb   : > { %3993 = vpow2.f32 %v1992_v17  ;;  %3593 = vmatmul.mubr.bf16.gmra.mrb[52].mxu1 %v2039_v14 }
 0x6ec   : > { %3607 = vmatpush3.bf16.xpose.msra.mxu1 %v2265_v54  ;;  %v5369_v25 = vpop.eup %3987 }
 0x6ed   : > { %3742 = vmatprep.subr.msk.bf16.mxu1 %vm862_vm0, %v5325_v1  ;;  %v1955_v16 = vpop.xlane.xlu1 %1954  ;;  %v1949_v1 = vpop.xlane.xlu0 %1948 }
 0x6ee   : > { %v1968_v51 = vsub.f32 %v5274_v4, %v1949_v1  ;;  %v1971_v39 = vsub.f32 %v5277_v56, %v1955_v16 }
 0x6f0   : > { %v5371_v31 = vpop.eup %3989  ;;  %v1996_v5 = vmul.f32 1.442695, %v1968_v51  ;;  %v2002_v13 = vmul.f32 1.442695, %v1971_v39 }
 0x6f1   : > { %v2230_v38 = vpop.permute.xlu1 %2229  ;;  %v2232_v41 = vpop.permute.xlu0 %2231 }
 0x6f2   : > { %v2274_v15 = vsel %vm862_vm0, %v2230_v38, 0  ;;  %v2277_v48 = vsel %vm862_vm0, %v2232_v41, 0  ;;  %3995 = vpow2.f32 %v1996_v5 }
 0x6f3   : > { %3997 = vpow2.f32 %v2002_v13 }
 0x6f4   : > { %v5373_v27 = vpop.eup %3991  ;;  %3609 = vmatpush3.bf16.xpose.msra.mxu1 %v2268_v55 }
 0x6f5   : > { %v5377_v20 = vpop.eup %3993  ;;  %v2040_v53 = vpack.c.bf16 %v5373_v27, %v5369_v25  ;;  %3743 = vmatprep.subr.msk.bf16.mxu1 %vm862_vm0, %v5323_v61  ;;  %v1970_v61 = vsub.f32 %v5271_v18, %v1953_v23  ;;  %v2208_v4 = vpop.permute.xlu1 %2207 }
 0x6f6   : > { %v2041_v2 = vpack.c.bf16 %v5371_v31, %v5377_v20 }
 0x6f7   : > { %3596 = vmatprep.mubr.bf16.mxu1 %v2040_v53  ;;  %v2000_v14 = vmul.f32 1.442695, %v1970_v61 }
 0x6f8   : > { %3597 = vmatmul.mubr.bf16.gmra.mrb[56].mxu1 %v2041_v2 }
 0x6f9   : > { %v2212_v18 = vpop.permute.xlu1 %2211 }
 0x6fc   : > { %3611 = vmatpush3.bf16.xpose.msra.mxu1 %v2271_v36  ;;  %v5398_v2 = vpop.eup %3995 }
 0x6fd   : > { %3744 = vmatprep.subr.msk.bf16.mxu1 %vm862_vm0, %v2230_v38  ;;  %v5401_v16 = vpop.eup %3997 }
 0x704   : > { %3613 = vmatpush3.bf16.xpose.msra.mxu1 %v2274_v15 }
 0x705   : > { %3745 = vmatprep.subr.msk.bf16.mxu1 %vm862_vm0, %v2232_v41 }
 0x70c   : > { %3615 = vmatpush3.bf16.xpose.msra.mxu1 %v2277_v48  ;;  %v2216_v48 = vpop.permute.xlu1 %2215 }
 0x710   : > { %v2220_v39 = vpop.permute.xlu1 %2219 }
 0x714   : > { %v2505_v13 = vpop.permute.xlu1 %2504 }
 0x717   : > { %v1951_v17 = vpop.xlane.xlu0 %1950 }
 0x718   : > { %v1969_v33 = vsub.f32 %v5279_v6, %v1951_v17 }
 0x71a   : > { %v1998_v54 = vmul.f32 1.442695, %v1969_v33 }
 0x71b   : > { %v2234_v55 = vpop.permute.xlu0 %2233 }
 0x71c   : > { %3999 = vpow2.f32 %v1998_v54  ;;  %3746 = vmatprep.subr.msk.bf16.mxu1 %vm862_vm0, %v2234_v55  ;;  %v2280_v53 = vsel %vm862_vm0, %v2234_v55, 0 }
 0x71d   : > { %4001 = vpow2.f32 %v2000_v14  ;;  %3617 = vmatpush3.bf16.xpose.msra.mxu1 %v2280_v53  ;;  %v2511_v14 = vpop.permute.xlu1 %2510 }
 0x71f   : > { %v2236_v56 = vpop.permute.xlu0 %2235 }
 0x720   : > { %3747 = vmatprep.subr.msk.bf16.mxu1 %vm862_vm0, %v2236_v56  ;;  %v2283_v6 = vsel %vm862_vm0, %v2236_v56, 0 }
 0x723   : > { %v2206_v23 = vpop.permute.xlu0 %2205 }
 0x725   : > { %3619 = vmatpush3.bf16.xpose.msra.mxu1 %v2283_v6 }
 0x726   : > { %v5403_v36 = vpop.eup %3999 }
 0x727   : > { %v5405_v38 = vpop.eup %4001  ;;  %v2210_v1 = vpop.permute.xlu0 %2209  ;;  %v2042_v15 = vpack.c.bf16 %v5403_v36, %v5398_v2 }
 0x728   : > { %v2043_v41 = vpack.c.bf16 %v5401_v16, %v5405_v38 }
 0x729   : > { %3600 = vmatprep.mubr.bf16.mxu1 %v2042_v15 }
 0x72a   : > { %3601 = vmatmul.mubr.bf16.gmra.mrb[60].mxu1 %v2043_v41 }
 0x72b   : > { %3620 = vmatprep.mubr.msk.bf16.mxu1 %vm862_vm0, %v2206_v23  ;;  %v2214_v51 = vpop.permute.xlu0 %2213 }
 0x72f   : > { %v2218_v61 = vpop.permute.xlu0 %2217 }
 0x732   : > { %3621 = vmatmul.mubr.msk.bf16.vlgmr.msra.gmra.mrb[64].mxu1 %vm862_vm0, %v2208_v4 }
 0x733   : > { %3624 = vmatprep.mubr.msk.bf16.mxu1 %vm862_vm0, %v2210_v1  ;;  %v2503_v5 = vpop.permute.xlu0 %2502 }
 0x734   : > { %3636 = vmatprep.subr.bf16.mxu0 %v2503_v5 }
 0x735   : > { %3637 = vmatpush3.bf16.msra.mxu0 %v2503_v5 }
 0x736   : > { %3638 = vmatprep.subr.bf16.mxu0 %v2505_v13 }
 0x737   : > { %v2507_v17 = vpop.permute.xlu0 %2506 }
 0x739   : > { %3639 = vmatpush3.bf16.msra.mxu0 %v2505_v13 }
 0x73a   : > { %3625 = vmatmul.mubr.msk.bf16.gmra.mrb[68].mxu1 %vm862_vm0, %v2212_v18  ;;  %3640 = vmatprep.subr.bf16.mxu0 %v2507_v17 }
 0x73b   : > { %3628 = vmatprep.mubr.msk.bf16.mxu1 %vm862_vm0, %v2214_v51  ;;  %v2509_v33 = vpop.permute.xlu0 %2508 }
 0x73d   : > { %3641 = vmatpush3.bf16.msra.mxu0 %v2507_v17 }
 0x73e   : > { %3642 = vmatprep.subr.bf16.mxu0 %v2509_v33 }
 0x73f   : > { %v2513_v54 = vpop.permute.xlu0 %2512 }
 0x741   : > { %3643 = vmatpush3.bf16.msra.mxu0 %v2509_v33 }
 0x742   : > { %3629 = vmatmul.mubr.msk.bf16.gmra.mrb[72].mxu1 %vm862_vm0, %v2216_v48  ;;  %3644 = vmatprep.subr.bf16.mxu0 %v2511_v14 }
 0x743   : > { %3632 = vmatprep.mubr.msk.bf16.mxu1 %vm862_vm0, %v2218_v61 }
 0x745   : > { %3645 = vmatpush3.bf16.msra.mxu0 %v2511_v14 }
 0x746   : > { %3646 = vmatprep.subr.bf16.mxu0 %v2513_v54 }
 0x749   : > { %3647 = vmatpush3.bf16.msra.mxu0 %v2513_v54 }
 0x74a   : > { %3633 = vmatmul.mubr.msk.bf16.gmra.mrb[76].mxu1 %vm862_vm0, %v2220_v39 }
 0x7b6   : > { %v5419_v55 = vpop.f32.mrb[48].mxu1 }
 0x7b7   : > { %5984 = vst [vmem:[#allocation55_spill] sm:$0xff] %v5419_v55  ;;  %v5421_v53 = vpop.f32.mrb[49].mxu1 }
 0x7b8   : > { %v5423_v4 = vpop.f32.mrb[50].mxu1 }
 0x7b9   : > { %5985 = vst [vmem:[#allocation56_spill] sm:$0xff] %v5423_v4  ;;  %v5425_v56 = vpop.f32.mrb[51].mxu1 }
 0x7be   : > { %v5427_v18 = vpop.f32.mrb[52].mxu1 }
 0x7bf   : > { %5986 = vst [vmem:[#allocation57_spill] sm:$0xff] %v5427_v18  ;;  %v5429_v23 = vpop.f32.mrb[53].mxu1 }
 0x7c0   : > { %5987 = vst [vmem:[#allocation58_spill] sm:$0xff] %v5429_v23  ;;  %v5431_v6 = vpop.f32.mrb[54].mxu1 }
 0x7c1   : > { %5988 = vst [vmem:[#allocation59_spill] sm:$0xff] %v5431_v6  ;;  %v5433_v1 = vpop.f32.mrb[55].mxu1 }
 0x7c2   : > { %5989 = vst [vmem:[#allocation60_spill] sm:$0xff] %v5433_v1 }
 0x7cb   : > { %v5435_v15 = vpop.f32.mrb[56].mxu1 }
 0x7cc   : > { %5990 = vst [vmem:[#allocation61_spill] sm:$0xff] %v5435_v15  ;;  %v5437_v41 = vpop.f32.mrb[57].mxu1 }
 0x7cd   : > { %v5439_v48 = vpop.f32.mrb[58].mxu1 }
 0x7ce   : > { %5991 = vst [vmem:[#allocation62_spill] sm:$0xff] %v5439_v48  ;;  %v5441_v51 = vpop.f32.mrb[59].mxu1 }
 0x7fd   : > { %v5443_v39 = vpop.f32.mrb[60].mxu1 }
 0x7fe   : > { %5992 = vst [vmem:[#allocation63_spill] sm:$0xff] %v5443_v39  ;;  %v5445_v61 = vpop.f32.mrb[61].mxu1 }
 0x7ff   : > { %5993 = vst [vmem:[#allocation64_spill] sm:$0xff] %v5445_v61  ;;  %v5447_v5 = vpop.f32.mrb[62].mxu1 }
 0x800   : > { %5994 = vst [vmem:[#allocation65_spill] sm:$0xff] %v5447_v5  ;;  %v5449_v13 = vpop.f32.mrb[63].mxu1 }
 0x801   : > { %5995 = vst [vmem:[#allocation66_spill] sm:$0xff] %v5449_v13 }
 0x805   : > { %v5451_v17 = vpop.f32.mrb[64].mxu1 }
 0x806   : > { %2386 = vmax.xlane.f32.xlu1 %v5451_v17  ;;  %v5454_v33 = vpop.f32.mrb[65].mxu1 }
 0x807   : > { %2382 = vmax.xlane.f32.xlu0 %v5454_v33  ;;  %v5457_v14 = vpop.f32.mrb[66].mxu1 }
 0x808   : > { %v5459_v54 = vpop.f32.mrb[67].mxu1 }
 0x80a   : > { %2388 = vmax.xlane.f32.xlu1 %v5457_v14 }
 0x80d   : > { %v5462_v39 = vpop.f32.mrb[68].mxu1 }
 0x80e   : > { %2384 = vmax.xlane.f32.xlu1 %v5459_v54  ;;  %v5465_v5 = vpop.f32.mrb[69].mxu1 }
 0x80f   : > { %2390 = vmax.xlane.f32.xlu0 %v5465_v5  ;;  %v5468_v6 = vpop.f32.mrb[70].mxu1 }
 0x810   : > { %v5470_v18 = vpop.f32.mrb[71].mxu1 }
 0x812   : > { %2394 = vmax.xlane.f32.xlu1 %v5462_v39 }
 0x815   : > { %v5473_v13 = vpop.f32.mrb[72].mxu1 }
 0x816   : > { %2396 = vmax.xlane.f32.xlu1 %v5468_v6  ;;  %v5476_v61 = vpop.f32.mrb[73].mxu1 }
 0x817   : > { %v5478_v1 = vpop.f32.mrb[74].mxu1 }
 0x818   : > { %2404 = vmax.xlane.f32.xlu0 %v5478_v1  ;;  %v5481_v23 = vpop.f32.mrb[75].mxu1 }
 0x81a   : > { %2392 = vmax.xlane.f32.xlu1 %v5470_v18 }
 0x81c   : > { %2400 = vmax.xlane.f32.xlu0 %v5481_v23 }
 0x81d   : > { %v5485_v48 = vpop.f32.mrb[76].mxu1 }
 0x81e   : > { %2402 = vmax.xlane.f32.xlu1 %v5473_v13  ;;  %v5488_v15 = vpop.f32.mrb[77].mxu1 }
 0x81f   : > { %v5490_v4 = vpop.f32.mrb[78].mxu1 }
 0x820   : > { %2412 = vmax.xlane.f32.xlu0 %v5490_v4  ;;  %v5493_v55 = vpop.f32.mrb[79].mxu1 }
 0x822   : > { %2398 = vmax.xlane.f32.xlu1 %v5476_v61 }
 0x824   : > { %2408 = vmax.xlane.f32.xlu0 %v5493_v55 }
 0x833   : > { %2514 = vrot.lane.b32.xlu1 %v4761_v50, %s4380_s30 }
 0x83a   : > { %2516 = vrot.lane.b32.xlu0 %v4771_v59, %s4380_s30 }
 0x857   : > { %2406 = vmax.xlane.f32.xlu1 %v5488_v15 }
 0x859   : > { %1540 = vadd.xlane.f32.xlu0 %v5121_v34 }
 0x85b   : > { %2410 = vmax.xlane.f32.xlu1 %v5485_v48 }
 0x85d   : > { %2020 = vadd.xlane.f32.xlu0 %v5369_v25 }
 0x85f   : > { %1538 = vadd.xlane.f32.xlu1 %v5123_v9 }
 0x861   : > { %2008 = vadd.xlane.f32.xlu0 %v5339_v21 }
 0x863   : > { %1554 = vadd.xlane.f32.xlu1 %v5157_v60 }
 0x865   : > { %2024 = vadd.xlane.f32.xlu0 %v5377_v20 }
 0x867   : > { %1556 = vadd.xlane.f32.xlu1 %v5163_v62 }
 0x869   : > { %1546 = vadd.xlane.f32.xlu0 %v5138_v44 }
 0x86b   : > { %1542 = vadd.xlane.f32.xlu1 %v5127_v11 }
 0x86d   : > { %1562 = vadd.xlane.f32.xlu0 %v5186_v35 }
 0x86f   : > { %1544 = vadd.xlane.f32.xlu1 %v5129_v26 }
 0x871   : > { %1550 = vadd.xlane.f32.xlu0 %v5147_v32 }
 0x873   : > { %1558 = vadd.xlane.f32.xlu1 %v5165_v30 }
 0x875   : > { %1566 = vadd.xlane.f32.xlu0 %v5193_v37 }
 0x877   : > { %1560 = vadd.xlane.f32.xlu1 %v5159_v58 }
 0x879   : > { %2012 = vadd.xlane.f32.xlu0 %v5348_v40 }
 0x87b   : > { %2004 = vadd.xlane.f32.xlu1 %v5335_v63 }
 0x87d   : > { %2028 = vadd.xlane.f32.xlu0 %v5398_v2 }
 0x87f   : > { %2006 = vadd.xlane.f32.xlu1 %v5333_v46 }
 0x881   : > { %2016 = vadd.xlane.f32.xlu0 %v5359_v8 }
 0x883   : > { %2022 = vadd.xlane.f32.xlu1 %v5373_v27 }
 0x885   : > { %2032 = vadd.xlane.f32.xlu0 %v5405_v38 }
 0x887   : > { %2010 = vadd.xlane.f32.xlu1 %v5342_v28 }
 0x889   : > { %1088 = vadd.xlane.f32.xlu0 %v4895_v45 }
 0x88b   : > { %2026 = vadd.xlane.f32.xlu1 %v5371_v31 }
 0x88d   : > { %1104 = vadd.xlane.f32.xlu0 %v4931_v22 }
 0x88f   : > { %1548 = vadd.xlane.f32.xlu1 %v5140_v12 }
 0x891   : > { %1092 = vadd.xlane.f32.xlu0 %v4901_v52 }
 0x893   : > { %v2387_v50 = vpop.xlane.xlu1 %2386  ;;  %1564 = vadd.xlane.f32.xlu1 %v5191_v24 }
 0x894   : > { %v2416_v59 = vsub.f32 %v5451_v17, %v2387_v50  ;;  %v2383_v34 = vpop.xlane.xlu0 %2382 }
 0x895   : > { %v2414_v9 = vsub.f32 %v5454_v33, %v2383_v34  ;;  %1108 = vadd.xlane.f32.xlu0 %v4947_v43 }
 0x896   : > { %v2434_v11 = vmul.f32 1.442695, %v2416_v59 }
 0x897   : > { %v2430_v45 = vmul.f32 1.442695, %v2414_v9  ;;  %v2389_v26 = vpop.xlane.xlu1 %2388  ;;  %1552 = vadd.xlane.f32.xlu1 %v5149_v42 }
 0x898   : > { %4003 = vpow2.f32 %v2434_v11  ;;  %v2417_v22 = vsub.f32 %v5457_v14, %v2389_v26 }
 0x899   : > { %4005 = vpow2.f32 %v2430_v45 }
 0x89a   : > { %v2436_v44 = vmul.f32 1.442695, %v2417_v22 }
 0x89b   : > { %v2385_v52 = vpop.xlane.xlu1 %2384  ;;  %1568 = vadd.xlane.f32.xlu1 %v5189_v19 }
 0x89c   : > { %4007 = vpow2.f32 %v2436_v44  ;;  %v2415_v12 = vsub.f32 %v5459_v54, %v2385_v52  ;;  %v2391_v32 = vpop.xlane.xlu0 %2390  ;;  %v5996_v44 = vld [vmem:[#allocation20_spill] sm:$0xff]  ;;  %v5997_v52 = vld [vmem:[#allocation23_spill] sm:$0xff] }
 0x89d   : > { %v2418_v43 = vsub.f32 %v5465_v5, %v2391_v32 }
 0x89e   : > { %v2432_v60 = vmul.f32 1.442695, %v2415_v12 }
 0x89f   : > { %v2395_v58 = vpop.xlane.xlu1 %2394  ;;  %2014 = vadd.xlane.f32.xlu1 %v5352_v57  ;;  %v2438_v35 = vmul.f32 1.442695, %v2418_v43 }
 0x8a0   : > { %4009 = vpow2.f32 %v2432_v60  ;;  %v2420_v42 = vsub.f32 %v5462_v39, %v2395_v58 }
 0x8a2   : > { %v5542_v62 = vpop.eup %4003  ;;  %v2442_v30 = vmul.f32 1.442695, %v2420_v42  ;;  %v5998_v42 = vld [vmem:[#allocation19_spill] sm:$0xff] }
 0x8a3   : > { %v2397_v24 = vpop.xlane.xlu1 %2396  ;;  %2030 = vadd.xlane.f32.xlu1 %v5403_v36  ;;  %2466 = vadd.xlane.f32.xlu0 %v5542_v62  ;;  %v4006_v37 = vpop.eup %4005 }
 0x8a4   : > { %4011 = vpow2.f32 %v2442_v30  ;;  %v2421_v19 = vsub.f32 %v5468_v6, %v2397_v24  ;;  %v5999_v24 = vld [vmem:[#allocation22_spill] sm:$0xff] }
 0x8a5   : > { %v2405_v46 = vpop.xlane.xlu0 %2404  ;;  %4013 = vpow2.f32 %v2438_v35 }
 0x8a6   : > { %v4008_v63 = vpop.eup %4007  ;;  %v2444_v21 = vmul.f32 1.442695, %v2421_v19  ;;  %v2425_v28 = vsub.f32 %v5478_v1, %v2405_v46 }
 0x8a7   : > { %v2393_v40 = vpop.xlane.xlu1 %2392  ;;  %2018 = vadd.xlane.f32.xlu1 %v5361_v10  ;;  %2462 = vadd.xlane.f32.xlu0 %v4006_v37  ;;  %v2495_v57 = vpack.c.bf16 %v4008_v63, %v5542_v62 }
 0x8a8   : > { %4015 = vpow2.f32 %v2444_v21  ;;  %v2419_v8 = vsub.f32 %v5470_v18, %v2393_v40  ;;  %v2452_v20 = vmul.f32 1.442695, %v2425_v28 }
 0x8a9   : > { %v2401_v25 = vpop.xlane.xlu0 %2400 }
 0x8aa   : > { %v4010_v31 = vpop.eup %4009  ;;  %v2440_v27 = vmul.f32 1.442695, %v2419_v8  ;;  %v2423_v2 = vsub.f32 %v5481_v23, %v2401_v25 }
 0x8ab   : > { %v2403_v36 = vpop.xlane.xlu1 %2402  ;;  %2034 = vadd.xlane.f32.xlu1 %v5401_v16  ;;  %v2494_v38 = vpack.c.bf16 %v4010_v31, %v4006_v37 }
 0x8ac   : > { %4017 = vpow2.f32 %v2440_v27  ;;  %v2424_v6 = vsub.f32 %v5473_v13, %v2403_v36  ;;  %v2448_v5 = vmul.f32 1.442695, %v2423_v2 }
 0x8ad   : > { %3652 = vmatprep.mubr.bf16.mxu0 %v2494_v38  ;;  %v2413_v10 = vpop.xlane.xlu0 %2412  ;;  %4019 = vpow2.f32 %v2452_v20 }
 0x8ae   : > { %v4012_v1 = vpop.eup %4011  ;;  %v2450_v39 = vmul.f32 1.442695, %v2424_v6 }
 0x8af   : > { %v2399_v18 = vpop.xlane.xlu1 %2398  ;;  %1090 = vadd.xlane.f32.xlu1 %v4899_v49  ;;  %2474 = vadd.xlane.f32.xlu0 %v4012_v1  ;;  %v4014_v17 = vpop.eup %4013 }
 0x8b0   : > { %4021 = vpow2.f32 %v2450_v39  ;;  %v2422_v23 = vsub.f32 %v5476_v61, %v2399_v18  ;;  %v6002_v18 = vld [vmem:[#allocation50_spill] sm:$0xff] }
 0x8b1   : > { %v2409_v33 = vpop.xlane.xlu0 %2408  ;;  %4023 = vpow2.f32 %v2448_v5  ;;  %v6001_v5 = vld [vmem:[#allocation48_spill] sm:$0xff] }
 0x8b2   : > { %v4016_v16 = vpop.eup %4015  ;;  %v2446_v14 = vmul.f32 1.442695, %v2422_v23 }
 0x8b3   : > { %v2515_v54 = vpop.permute.xlu1 %2514  ;;  %1106 = vadd.xlane.f32.xlu1 %v4936_v29  ;;  %2470 = vadd.xlane.f32.xlu0 %v4014_v17  ;;  %v2497_v13 = vpack.c.bf16 %v4016_v16, %v4012_v1 }
 0x8b4   : > { %4025 = vpow2.f32 %v2446_v14  ;;  %3648 = vmatprep.subr.bf16.mxu0 %v2515_v54  ;;  %v6003_v14 = vld [vmem:[#allocation21_spill] sm:$0xff] }
 0x8b5   : > { %3649 = vmatpush3.bf16.msra.mxu0 %v2515_v54  ;;  %v2517_v50 = vpop.permute.xlu0 %2516 }
 0x8b6   : > { %v4018_v59 = vpop.eup %4017  ;;  %3650 = vmatprep.subr.bf16.mxu0 %v2517_v50 }
 0x8b7   : > { %1094 = vadd.xlane.f32.xlu1 %v4897_v47  ;;  %v2496_v49 = vpack.c.bf16 %v4018_v59, %v4014_v17  ;;  %v4020_v61 = vpop.eup %4019  ;;  %v2429_v47 = vsub.f32 %v5490_v4, %v2413_v10 }
 0x8b9   : > { %3651 = vmatpush3.bf16.msra.mxu0 %v2517_v50  ;;  %v2460_v26 = vmul.f32 1.442695, %v2429_v47 }
 0x8ba   : > { %v4022_v34 = vpop.eup %4021 }
 0x8bb   : > { %1110 = vadd.xlane.f32.xlu1 %v4949_v7  ;;  %2482 = vadd.xlane.f32.xlu0 %v4022_v34  ;;  %v2499_v9 = vpack.c.bf16 %v4020_v61, %v4022_v34  ;;  %v4024_v29 = vpop.eup %4023  ;;  %v2427_v7 = vsub.f32 %v5493_v55, %v2409_v33  ;;  %4027 = vpow2.f32 %v2460_v26  ;;  %v6007_v26 = vld [vmem:[#allocation24_spill] sm:$0xff] }
 0x8bc   : > { %3653 = vmatmul.mubr.bf16.vlgmr.msra.gmra.mrb[80].mxu0 %v2495_v57 }
 0x8bd   : > { %3656 = vmatprep.mubr.bf16.mxu0 %v2496_v49  ;;  %v2456_v22 = vmul.f32 1.442695, %v2427_v7  ;;  %v6004_v49 = vld [vmem:[#allocation18_spill] sm:$0xff] }
 0x8be   : > { %v4026_v11 = vpop.eup %4025 }
 0x8bf   : > { %2468 = vadd.xlane.f32.xlu1 %v4008_v63  ;;  %2478 = vadd.xlane.f32.xlu0 %v4026_v11  ;;  %v2498_v45 = vpack.c.bf16 %v4024_v29, %v4026_v11  ;;  %4029 = vpow2.f32 %v2456_v22 }
 0x8c3   : > { %2464 = vadd.xlane.f32.xlu1 %v4010_v31 }
 0x8c4   : > { %3657 = vmatmul.mubr.bf16.gmra.mrb[84].mxu0 %v2497_v13 }
 0x8c5   : > { %3660 = vmatprep.mubr.bf16.mxu0 %v2498_v45  ;;  %v4028_v12 = vpop.eup %4027 }
 0x8c7   : > { %2476 = vadd.xlane.f32.xlu1 %v4016_v16 }
 0x8c9   : > { %v4030_v32 = vpop.eup %4029 }
 0x8cb   : > { %2472 = vadd.xlane.f32.xlu1 %v4018_v59 }
 0x8cc   : > { %3661 = vmatmul.mubr.bf16.gmra.mrb[88].mxu0 %v2499_v9  ;;  %v6006_v9 = vld [vmem:[#allocation42_spill] sm:$0xff] }
 0x8cf   : > { %2484 = vadd.xlane.f32.xlu1 %v4020_v61  ;;  %v6005_v61 = vld [vmem:[#allocation41_spill] sm:$0xff] }
 0x8d3   : > { %2480 = vadd.xlane.f32.xlu1 %v4024_v29 }
 0x8d7   : > { %1098 = vadd.xlane.f32.xlu1 %v5996_v44 }
 0x8db   : > { %1114 = vadd.xlane.f32.xlu1 %v5997_v52 }
 0x8df   : > { %2492 = vadd.xlane.f32.xlu1 %v4028_v12 }
 0x8e3   : > { %2488 = vadd.xlane.f32.xlu1 %v4030_v32 }
 0x8e4   : > { %v2407_v60 = vpop.xlane.xlu1 %2406 }
 0x8e5   : > { %v2426_v4 = vsub.f32 %v5488_v15, %v2407_v60  ;;  %v6009_v60 = vld [vmem:[#allocation49_spill] sm:$0xff] }
 0x8e6   : > { %v1541_v43 = vpop.xlane.xlu0 %1540 }
 0x8e7   : > { %v2454_v58 = vmul.f32 1.442695, %v2426_v4  ;;  %1102 = vadd.xlane.f32.xlu1 %v5998_v42 }
 0x8e8   : > { %v2411_v55 = vpop.xlane.xlu1 %2410 }
 0x8e9   : > { %4031 = vpow2.f32 %v2454_v58  ;;  %v2428_v62 = vsub.f32 %v5485_v48, %v2411_v55 }
 0x8ea   : > { %v2021_v30 = vpop.xlane.xlu0 %2020  ;;  %4033 = vrcp.f32 %v1541_v43 }
 0x8eb   : > { %v2458_v35 = vmul.f32 1.442695, %v2428_v62  ;;  %1118 = vadd.xlane.f32.xlu1 %v5999_v24 }
 0x8ec   : > { %v1539_v19 = vpop.xlane.xlu1 %1538 }
 0x8ed   : > { %4035 = vpow2.f32 %v2458_v35 }
 0x8ee   : > { %4037 = vrcp.f32 %v1539_v19  ;;  %v5567_v37 = vpop.xlane.xlu0 %2008 }
 0x8f0   : > { %v1555_v46 = vpop.xlane.xlu1 %1554 }
 0x8f1   : > { %4039 = vrcp.f32 %v1555_v46 }
 0x8f2   : > { %v5569_v15 = vpop.xlane.xlu0 %2024 }
 0x8f3   : > { %v4032_v63 = vpop.eup %4031 }
 0x8f4   : > { %v1557_v21 = vpop.xlane.xlu1 %1556  ;;  %v2500_v28 = vpack.c.bf16 %v4030_v32, %v4032_v63  ;;  %v4034_v40 = vpop.eup %4033 }
 0x8f5   : > { %4041 = vrcp.f32 %v1557_v21  ;;  %v5577_v20 = vmul.f32 %v4034_v40, %v5217_v3 }
 0x8f6   : > { %3664 = vmatprep.mubr.bf16.mxu0 %v2500_v28  ;;  %v5571_v48 = vpop.xlane.xlu0 %1546 }
 0x8f7   : > { %v4036_v57 = vpop.eup %4035 }
 0x8f8   : > { %v4038_v8 = vpop.eup %4037  ;;  %v1543_v25 = vpop.xlane.xlu1 %1542  ;;  %2490 = vadd.xlane.f32.xlu0 %v4036_v57  ;;  %v2501_v31 = vpack.c.bf16 %v4028_v12, %v4036_v57  ;;  %v6008_v12 = vld [vmem:[#allocation47_spill] sm:$0xff] }
 0x8f9   : > { %v5574_v27 = vmul.f32 %v4038_v8, %v5213_v0  ;;  %4043 = vrcp.f32 %v1543_v25  ;;  %v6000_v0 = vld [vmem:[#allocation17_spill] sm:$0xff] }
 0x8fa   : > { %3665 = vmatmul.mubr.bf16.gmra.mrb[92].mxu0 %v2501_v31  ;;  %v5579_v2 = vpop.xlane.xlu0 %1562  ;;  %v6010_v31 = vld [vmem:[#allocation55_spill] sm:$0xff] }
 0x8fb   : > { %v1739_v36 = vpack.c.bf16 %v5577_v20, %v5574_v27  ;;  %v4040_v6 = vpop.eup %4039  ;;  %v6015_v20 = vld [vmem:[#allocation34_spill] sm:$0xff] }
 0x8fc   : > { %v1545_v38 = vpop.xlane.xlu1 %1544  ;;  %2486 = vadd.xlane.f32.xlu0 %v4032_v63  ;;  %v1731_v3 = vmul.f32 %v4040_v6, %v6001_v5  ;;  %v6011_v6 = vld [vmem:[#allocation56_spill] sm:$0xff] }
 0x8fd   : > { %4045 = vrcp.f32 %v1545_v38 }
 0x8fe   : > { %v5583_v10 = vpop.xlane.xlu0 %1550 }
 0x8ff   : > { %v4042_v1 = vpop.eup %4041 }
 0x900   : > { %v1559_v39 = vpop.xlane.xlu1 %1558  ;;  %1096 = vadd.xlane.f32.xlu0 %v6000_v0  ;;  %v1732_v23 = vmul.f32 %v4042_v1, %v6002_v18 }
 0x901   : > { %4047 = vrcp.f32 %v1559_v39 }
 0x902   : > { %v5588_v17 = vpop.xlane.xlu0 %1566  ;;  %v1743_v33 = vpack.c.bf16 %v1732_v23, %v1731_v3  ;;  %v6013_v23 = vld [vmem:[#allocation61_spill] sm:$0xff] }
 0x903   : > { %v4044_v54 = vpop.eup %4043 }
 0x904   : > { %v1561_v16 = vpop.xlane.xlu1 %1560  ;;  %1112 = vadd.xlane.f32.xlu0 %v6003_v14  ;;  %2679 = vrot.lane.b32.xlu1 %v1743_v33, %s4380_s30  ;;  %v1725_v34 = vmul.f32 %v4044_v54, %v6005_v61 }
 0x905   : > { %4049 = vrcp.f32 %v1561_v16  ;;  %v6014_v16 = vld [vmem:[#allocation62_spill] sm:$0xff] }
 0x906   : > { %v5592_v13 = vpop.xlane.xlu0 %2012 }
 0x907   : > { %v4046_v50 = vpop.eup %4045 }
 0x908   : > { %v2005_v59 = vpop.xlane.xlu1 %2004  ;;  %1100 = vadd.xlane.f32.xlu0 %v6004_v49  ;;  %v1726_v29 = vmul.f32 %v4046_v50, %v6006_v9  ;;  %v6016_v49 = vld [vmem:[#allocation44_spill] sm:$0xff] }
 0x909   : > { %4051 = vrcp.f32 %v2005_v59 }
 0x90a   : > { %v5597_v11 = vpop.xlane.xlu0 %2028  ;;  %v1740_v45 = vpack.c.bf16 %v1726_v29, %v1725_v34  ;;  %v6017_v34 = vld [vmem:[#allocation46_spill] sm:$0xff] }
 0x90b   : > { %v4048_v7 = vpop.eup %4047 }
 0x90c   : > { %v2007_v47 = vpop.xlane.xlu1 %2006  ;;  %1116 = vadd.xlane.f32.xlu0 %v6007_v26  ;;  %2673 = vrot.lane.b32.xlu1 %v1740_v45, %s4380_s30  ;;  %v1733_v32 = vmul.f32 %v4048_v7, %v6008_v12 }
 0x90d   : > { %4053 = vrcp.f32 %v2007_v47  ;;  %v6018_v47 = vld [vmem:[#allocation25_spill] sm:$0xff] }
 0x90e   : > { %v5601_v22 = vpop.xlane.xlu0 %2016  ;;  %4055 = vrcp.f32 %v2021_v30 }
 0x90f   : > { %v4050_v44 = vpop.eup %4049 }
 0x910   : > { %v2023_v52 = vpop.xlane.xlu1 %2022  ;;  %v1734_v4 = vmul.f32 %v4050_v44, %v6009_v60 }
 0x911   : > { %4057 = vrcp.f32 %v2023_v52 }
 0x912   : > { %v5605_v43 = vpop.xlane.xlu0 %2032  ;;  %v1744_v58 = vpack.c.bf16 %v1734_v4, %v1733_v32  ;;  %4059 = vrcp.f32 %v5567_v37  ;;  %v6020_v32 = vld [vmem:[#allocation54_spill] sm:$0xff] }
 0x913   : > { %v4052_v55 = vpop.eup %4051 }
 0x914   : > { %v2011_v42 = vpop.xlane.xlu1 %2010  ;;  %v2181_v24 = vmul.f32 %v4052_v55, %v5421_v53 }
 0x915   : > { %4061 = vrcp.f32 %v2011_v42  ;;  %v6021_v42 = vld [vmem:[#allocation33_spill] sm:$0xff] }
 0x916   : > { %4063 = vrcp.f32 %v5569_v15  ;;  %v1089_v62 = vpop.xlane.xlu0 %1088 }
 0x917   : > { %v4054_v35 = vpop.eup %4053  ;;  %4065 = vrcp.f32 %v1089_v62 }
 0x918   : > { %v2027_v30 = vpop.xlane.xlu1 %2026  ;;  %v2182_v19 = vmul.f32 %v4054_v35, %v5425_v56  ;;  %v4056_v46 = vpop.eup %4055  ;;  %v6022_v35 = vld [vmem:[#allocation43_spill] sm:$0xff] }
 0x919   : > { %4067 = vrcp.f32 %v2027_v30  ;;  %v2189_v15 = vmul.f32 %v4056_v46, %v5437_v41 }
 0x91a   : > { %4069 = vrcp.f32 %v5571_v48  ;;  %v1105_v63 = vpop.xlane.xlu0 %1104  ;;  %v2197_v21 = vpack.c.bf16 %v2182_v19, %v2181_v24  ;;  %v6023_v24 = vld [vmem:[#allocation45_spill] sm:$0xff] }
 0x91b   : > { %v4058_v37 = vpop.eup %4057  ;;  %4071 = vrcp.f32 %v1105_v63 }
 0x91c   : > { %v1549_v28 = vpop.xlane.xlu1 %1548  ;;  %2695 = vrot.lane.b32.xlu1 %v2197_v21, %s4379_s28  ;;  %v2190_v40 = vmul.f32 %v4058_v37, %v5441_v51  ;;  %v4060_v57 = vpop.eup %4059 }
 0x91d   : > { %4073 = vrcp.f32 %v1549_v28  ;;  %v2183_v38 = vmul.f32 %v4060_v57, %v6010_v31  ;;  %v6024_v28 = vld [vmem:[#allocation51_spill] sm:$0xff]  ;;  %v6027_v31 = vld [vmem:[#allocation60_spill] sm:$0xff] }
 0x91e   : > { %4075 = vrcp.f32 %v5579_v2  ;;  %v1093_v53 = vpop.xlane.xlu0 %1092  ;;  %v2201_v56 = vpack.c.bf16 %v2190_v40, %v2189_v15  ;;  %v6012_v2 = vld [vmem:[#allocation26_spill] sm:$0xff]  ;;  %v6025_v40 = vld [vmem:[#allocation53_spill] sm:$0xff] }
 0x91f   : > { %v4062_v8 = vpop.eup %4061  ;;  %4077 = vrcp.f32 %v1093_v53 }
 0x920   : > { %v4064_v48 = vpop.eup %4063  ;;  %v1565_v25 = vpop.xlane.xlu1 %1564  ;;  %v2184_v1 = vmul.f32 %v4062_v8, %v6011_v6 }
 0x921   : > { %v4066_v39 = vpop.eup %4065  ;;  %4079 = vrcp.f32 %v1565_v25  ;;  %v2191_v33 = vmul.f32 %v4064_v48, %v6013_v23  ;;  %v6026_v48 = vld [vmem:[#allocation58_spill] sm:$0xff] }
 0x922   : > { %4081 = vrcp.f32 %v5583_v10  ;;  %2671 = vrot.lane.b32.xlu0 %v1739_v36, %s4380_s30  ;;  %v1109_v41 = vpop.xlane.xlu0 %1108  ;;  %v2198_v51 = vpack.c.bf16 %v2184_v1, %v2183_v38  ;;  %v5624_v0 = vmul.f32 %v4066_v39, %v6012_v2  ;;  %v6029_v2 = vld [vmem:[#allocation66_spill] sm:$0xff] }
 0x923   : > { %v4068_v5 = vpop.eup %4067  ;;  %4083 = vrcp.f32 %v1109_v41  ;;  %v6028_v41 = vld [vmem:[#allocation64_spill] sm:$0xff] }
 0x924   : > { %v4070_v3 = vpop.eup %4069  ;;  %v1553_v18 = vpop.xlane.xlu1 %1552  ;;  %2697 = vrot.lane.b32.xlu1 %v2198_v51, %s4379_s28  ;;  %v2192_v10 = vmul.f32 %v4068_v5, %v6014_v16 }
 0x925   : > { %v4072_v14 = vpop.eup %4071  ;;  %4085 = vrcp.f32 %v1553_v18  ;;  %v1727_v61 = vmul.f32 %v4070_v3, %v6016_v49 }
 0x926   : > { %2681 = vrot.lane.b32.xlu0 %v1744_v58, %s4380_s30  ;;  %v2202_v27 = vpack.c.bf16 %v2192_v10, %v2191_v33  ;;  %v5631_v36 = vmul.f32 %v4072_v14, %v6015_v20  ;;  %4087 = vrcp.f32 %v5588_v17  ;;  %v6019_v17 = vld [vmem:[#allocation52_spill] sm:$0xff]  ;;  %v6030_v33 = vld [vmem:[#allocation57_spill] sm:$0xff]  ;;  %v6031_v10 = vld [vmem:[#allocation59_spill] sm:$0xff] }
 0x927   : > { %v4074_v54 = vpop.eup %4073 }
 0x928   : > { %v4076_v50 = vpop.eup %4075  ;;  %v1569_v59 = vpop.xlane.xlu1 %1568  ;;  %v1728_v9 = vmul.f32 %v4074_v54, %v6017_v34 }
 0x929   : > { %v4078_v29 = vpop.eup %4077  ;;  %4089 = vrcp.f32 %v1569_v59  ;;  %v1735_v12 = vmul.f32 %v4076_v50, %v6019_v17  ;;  %v6032_v59 = vld [vmem:[#allocation63_spill] sm:$0xff] }
 0x92a   : > { %2703 = vrot.lane.b32.xlu0 %v2201_v56, %s4379_s28  ;;  %v1741_v45 = vpack.c.bf16 %v1728_v9, %v1727_v61  ;;  %v5638_v26 = vmul.f32 %v4078_v29, %v6018_v47  ;;  %4091 = vrcp.f32 %v5592_v13  ;;  %v6033_v61 = vld [vmem:[#allocation65_spill] sm:$0xff]  ;;  %v6034_v47 = vld [vmem:[#allocation28_spill] sm:$0xff] }
 0x92b   : > { %v4080_v7 = vpop.eup %4079 }
 0x92c   : > { %v4082_v44 = vpop.eup %4081  ;;  %v2015_v52 = vpop.xlane.xlu1 %2014  ;;  %2675 = vrot.lane.b32.xlu1 %v1741_v45, %s4380_s30  ;;  %v1736_v60 = vmul.f32 %v4080_v7, %v6020_v32 }
 0x92d   : > { %v4084_v4 = vpop.eup %4083  ;;  %4093 = vrcp.f32 %v2015_v52  ;;  %v1729_v30 = vmul.f32 %v4082_v44, %v6022_v35 }
 0x92e   : > { %2705 = vrot.lane.b32.xlu0 %v2202_v27, %s4379_s28  ;;  %v1745_v58 = vpack.c.bf16 %v1736_v60, %v1735_v12  ;;  %v5646_v55 = vmul.f32 %v4084_v4, %v6021_v42  ;;  %4095 = vrcp.f32 %v5597_v11  ;;  %v6035_v12 = vld [vmem:[#allocation36_spill] sm:$0xff]  ;;  %v6036_v42 = vld [vmem:[#allocation27_spill] sm:$0xff] }
 0x92f   : > { %v4086_v62 = vpop.eup %4085 }
 0x930   : > { %v2031_v13 = vpop.xlane.xlu1 %2030  ;;  %v1730_v19 = vmul.f32 %v4086_v62, %v6023_v24  ;;  %v4088_v46 = vpop.eup %4087  ;;  %v6037_v24 = vld [vmem:[#allocation35_spill] sm:$0xff] }
 0x931   : > { %4097 = vrcp.f32 %v2031_v13  ;;  %v1737_v15 = vmul.f32 %v4088_v46, %v6024_v28 }
 0x932   : > { %2683 = vrot.lane.b32.xlu0 %v1745_v58, %s4380_s30  ;;  %v1742_v63 = vpack.c.bf16 %v1730_v19, %v1729_v30  ;;  %4099 = vrcp.f32 %v5601_v22 }
 0x933   : > { %v4090_v21 = vpop.eup %4089 }
 0x934   : > { %v2019_v37 = vpop.xlane.xlu1 %2018  ;;  %2677 = vrot.lane.b32.xlu1 %v1742_v63, %s4380_s30  ;;  %v1738_v11 = vmul.f32 %v4090_v21, %v6025_v40  ;;  %v4092_v57 = vpop.eup %4091  ;;  %v3899_v21 = vld [vmem:[#allocation9] sm:$0xff]  }
 0x935   : > { %4101 = vrcp.f32 %v2019_v37  ;;  %v2185_v25 = vmul.f32 %v4092_v57, %v6026_v48  ;;  %v3900_v37 = vld [vmem:[#allocation9 + $0x8] sm:$0xff]   ;;  %3668 = vmatprep.subr.bf16.mxu0 %v3899_v21  ;;  %3700 = vmatprep.subr.bf16.mxu1 %v3899_v21 }
 0x936   : > { %v1746_v53 = vpack.c.bf16 %v1738_v11, %v1737_v15  ;;  %4103 = vrcp.f32 %v5605_v43  ;;  %3669 = vmatpush3.bf16.msra.mxu0 %v3899_v21  ;;  %3708 = vmatpush3.bf16.msra.mxu1 %v3899_v21  ;;  %v3901_v15 = vld [vmem:[#allocation9 + $0x10] sm:$0xff]   ;;  %v3902_v11 = vld [vmem:[#allocation9 + $0x18] sm:$0xff]   ;;  %v3904_v48 = vld [vmem:[#allocation9 + $0x28] sm:$0xff]  }
 0x937   : > { %v4094_v56 = vpop.eup %4093  ;;  %3670 = vmatprep.subr.bf16.mxu0 %v3900_v37  ;;  %3701 = vmatprep.subr.bf16.mxu1 %v3900_v37 }
 0x938   : > { %v2035_v8 = vpop.xlane.xlu1 %2034  ;;  %2685 = vrot.lane.b32.xlu0 %v1746_v53, %s4380_s30  ;;  %v2186_v22 = vmul.f32 %v4094_v56, %v6027_v31  ;;  %v4096_v38 = vpop.eup %4095  ;;  %v3903_v53 = vld [vmem:[#allocation9 + $0x20] sm:$0xff]  }
 0x939   : > { %4105 = vrcp.f32 %v2035_v8  ;;  %v2193_v51 = vmul.f32 %v4096_v38, %v6028_v41  ;;  %v2467_v56 = vpop.xlane.xlu0 %2466 }
 0x93a   : > { %v2199_v6 = vpack.c.bf16 %v2186_v22, %v2185_v25  ;;  %3671 = vmatpush3.bf16.msra.mxu0 %v3900_v37  ;;  %3709 = vmatpush3.bf16.msra.mxu1 %v3900_v37  ;;  %v3905_v22 = vld [vmem:[#allocation9 + $0x30] sm:$0xff]  }
 0x93b   : > { %v4098_v1 = vpop.eup %4097  ;;  %3672 = vmatprep.subr.bf16.mxu0 %v3901_v15  ;;  %3702 = vmatprep.subr.bf16.mxu1 %v3901_v15 }
 0x93c   : > { %v1091_v39 = vpop.xlane.xlu1 %1090  ;;  %2699 = vrot.lane.b32.xlu1 %v2199_v6, %s4379_s28  ;;  %v2194_v5 = vmul.f32 %v4098_v1, %v6029_v2  ;;  %v4100_v3 = vpop.eup %4099  ;;  %v6038_v1 = vld [vmem:[#allocation32_spill] sm:$0xff] }
 0x93d   : > { %4107 = vrcp.f32 %v1091_v39  ;;  %v5665_v16 = vmul.f32 %v4100_v3, %v6030_v33  ;;  %v2463_v31 = vpop.xlane.xlu0 %2462 }
 0x93e   : > { %v2203_v43 = vpack.c.bf16 %v2194_v5, %v2193_v51  ;;  %3673 = vmatpush3.bf16.msra.mxu0 %v3901_v15  ;;  %3710 = vmatpush3.bf16.msra.mxu1 %v3901_v15  ;;  %v6039_v5 = vld [vmem:[#allocation40_spill] sm:$0xff] }
 0x93f   : > { %v4102_v18 = vpop.eup %4101  ;;  %3674 = vmatprep.subr.bf16.mxu0 %v3902_v11  ;;  %3703 = vmatprep.subr.bf16.mxu1 %v3902_v11 }
 0x940   : > { %v1107_v23 = vpop.xlane.xlu1 %1106  ;;  %2707 = vrot.lane.b32.xlu0 %v2203_v43, %s4379_s28  ;;  %v5668_v14 = vmul.f32 %v4102_v18, %v6031_v10  ;;  %v4104_v27 = vpop.eup %4103 }
 0x941   : > { %4109 = vrcp.f32 %v1107_v23  ;;  %v5673_v49 = vmul.f32 %v4104_v27, %v6032_v59  ;;  %v2475_v41 = vpop.xlane.xlu0 %2474  ;;  %v6040_v27 = vld [vmem:[#allocation39_spill] sm:$0xff] }
 0x942   : > { %v2200_v20 = vpack.c.bf16 %v5668_v14, %v5665_v16  ;;  %3675 = vmatpush3.bf16.msra.mxu0 %v3902_v11  ;;  %3711 = vmatpush3.bf16.msra.mxu1 %v3902_v11 }
 0x943   : > { %v4106_v54 = vpop.eup %4105  ;;  %3676 = vmatprep.subr.bf16.mxu0 %v3903_v53  ;;  %3704 = vmatprep.subr.bf16.mxu1 %v3903_v53 }
 0x944   : > { %v1095_v50 = vpop.xlane.xlu1 %1094  ;;  %v5676_v34 = vmul.f32 %v4106_v54, %v6033_v61  ;;  %v3906_v61 = vld [vmem:[#allocation9 + $0x38] sm:$0xff]  }
 0x945   : > { %4111 = vrcp.f32 %v1095_v50  ;;  %v2471_v43 = vpop.xlane.xlu0 %2470 }
 0x946   : > { %v2204_v9 = vpack.c.bf16 %v5676_v34, %v5673_v49  ;;  %3677 = vmatpush3.bf16.msra.mxu0 %v3903_v53  ;;  %3712 = vmatpush3.bf16.msra.mxu1 %v3903_v53 }
 0x947   : > { %v4108_v29 = vpop.eup %4107  ;;  %3678 = vmatprep.subr.bf16.mxu0 %v3904_v48  ;;  %3705 = vmatprep.subr.bf16.mxu1 %v3904_v48 }
 0x948   : > { %v1111_v45 = vpop.xlane.xlu1 %1110  ;;  %v5681_v7 = vmul.f32 %v4108_v29, %v6034_v47 }
 0x949   : > { %4113 = vrcp.f32 %v1111_v45  ;;  %v2483_v23 = vpop.xlane.xlu0 %2482 }
 0x94a   : > { %v1257_v44 = vpack.c.bf16 %v5681_v7, %v5624_v0  ;;  %3679 = vmatpush3.bf16.msra.mxu0 %v3904_v48  ;;  %3713 = vmatpush3.bf16.msra.mxu1 %v3904_v48 }
 0x94b   : > { %v4110_v52 = vpop.eup %4109  ;;  %3680 = vmatprep.subr.bf16.mxu0 %v3905_v22  ;;  %3706 = vmatprep.subr.bf16.mxu1 %v3905_v22 }
 0x94c   : > { %v5685_v17 = vpop.xlane.xlu1 %2468  ;;  %v5688_v32 = vmul.f32 %v4110_v52, %v6035_v12 }
 0x94d   : > { %v2479_v33 = vpop.xlane.xlu0 %2478 }
 0x94e   : > { %v1261_v60 = vpack.c.bf16 %v5688_v32, %v5631_v36  ;;  %3681 = vmatpush3.bf16.msra.mxu0 %v3905_v22  ;;  %3714 = vmatpush3.bf16.msra.mxu1 %v3905_v22 }
 0x94f   : > { %v4112_v4 = vpop.eup %4111  ;;  %3682 = vmatprep.subr.bf16.mxu0 %v3906_v61  ;;  %3707 = vmatprep.subr.bf16.mxu1 %v3906_v61 }
 0x950   : > { %v5692_v58 = vpop.xlane.xlu1 %2464  ;;  %v5695_v62 = vmul.f32 %v4112_v4, %v6036_v42 }
 0x952   : > { %v1258_v13 = vpack.c.bf16 %v5695_v62, %v5638_v26  ;;  %3683 = vmatpush3.bf16.msra.mxu0 %v3906_v61  ;;  %3715 = vmatpush3.bf16.msra.mxu1 %v3906_v61  ;;  %v6042_v61 = vld [vmem:[#allocation38_spill] sm:$0xff] }
 0x953   : > { %v4114_v35 = vpop.eup %4113 }
 0x954   : > { %v5699_v30 = vpop.xlane.xlu1 %2476  ;;  %v5702_v19 = vmul.f32 %v4114_v35, %v6037_v24 }
 0x956   : > { %v1262_v46 = vpack.c.bf16 %v5702_v19, %v5646_v55 }
 0x958   : > { %v5706_v63 = vpop.xlane.xlu1 %2472 }
 0x95c   : > { %v5708_v28 = vpop.xlane.xlu1 %2484 }
 0x960   : > { %v5710_v40 = vpop.xlane.xlu1 %2480 }
 0x964   : > { %v1099_v57 = vpop.xlane.xlu1 %1098 }
 0x965   : > { %4115 = vrcp.f32 %v1099_v57 }
 0x968   : > { %v1115_v8 = vpop.xlane.xlu1 %1114 }
 0x969   : > { %4117 = vrcp.f32 %v1115_v8 }
 0x96c   : > { %v5712_v25 = vpop.xlane.xlu1 %2492 }
 0x96f   : > { %v4116_v38 = vpop.eup %4115 }
 0x970   : > { %v5714_v6 = vpop.xlane.xlu1 %2488  ;;  %v5717_v39 = vmul.f32 %v4116_v38, %v6038_v1  ;;  %v6041_v1 = vld [vmem:[#allocation30_spill] sm:$0xff] }
 0x973   : > { %v4118_v51 = vpop.eup %4117 }
 0x974   : > { %v1103_v2 = vpop.xlane.xlu1 %1102  ;;  %v5720_v3 = vmul.f32 %v4118_v51, %v6039_v5 }
 0x978   : > { %v1119_v18 = vpop.xlane.xlu1 %1118 }
 0x979   : > { %4119 = vrcp.f32 %v1119_v18 }
 0x97a   : > { %4121 = vrcp.f32 %v2467_v56 }
 0x97b   : > { %4123 = vrcp.f32 %v2463_v31 }
 0x97c   : > { %4125 = vrcp.f32 %v5685_v17 }
 0x97d   : > { %4127 = vrcp.f32 %v5692_v58 }
 0x97e   : > { %4129 = vrcp.f32 %v2475_v41 }
 0x97f   : > { %4131 = vrcp.f32 %v2471_v43 }
 0x983   : > { %v4120_v10 = vpop.eup %4119 }
 0x984   : > { %v5723_v54 = vmul.f32 %v4120_v10, %v6040_v27  ;;  %v4122_v45 = vpop.eup %4121 }
 0x985   : > { %v5725_v50 = vpop.xlane.xlu0 %2490  ;;  %v4124_v52 = vpop.eup %4123 }
 0x986   : > { %v4126_v12 = vpop.eup %4125 }
 0x987   : > { %v4128_v42 = vpop.eup %4127 }
 0x988   : > { %v4130_v53 = vpop.eup %4129 }
 0x989   : > { %v5729_v59 = vpop.xlane.xlu0 %2486 }
 0x98d   : > { %v1097_v29 = vpop.xlane.xlu0 %1096 }
 0x98e   : > { %4133 = vrcp.f32 %v1097_v29 }
 0x98f   : > { %4135 = vrcp.f32 %v5699_v30  ;;  %v3654_v47 = vpop.f32.mrb[80].mxu0 }
 0x990   : > { %4137 = vrcp.f32 %v5706_v63  ;;  %v2560_v17 = vpop.f32.mrb[81].mxu0  ;;  %v2641_v35 = vmul.f32 %v4122_v45, %v3654_v47  ;;  %v4132_v63 = vpop.eup %4131 }
 0x991   : > { %v3655_v4 = vpop.f32.mrb[82].mxu0  ;;  %v1113_v58 = vpop.xlane.xlu0 %1112  ;;  %v2639_v37 = vmul.f32 %v4124_v52, %v2560_v17 }
 0x992   : > { %v2642_v24 = vmul.f32 %v4126_v12, %v3655_v4  ;;  %4139 = vrcp.f32 %v1113_v58  ;;  %v2563_v21 = vpop.f32.mrb[83].mxu0 }
 0x993   : > { %4141 = vrcp.f32 %v2483_v23  ;;  %v2640_v15 = vmul.f32 %v4128_v42, %v2563_v21  ;;  %v6044_v21 = vld [vmem:[#allocation29_spill] sm:$0xff] }
 0x994   : > { %4143 = vrcp.f32 %v1103_v2  ;;  %v2656_v11 = vpack.c.bf16 %v2642_v24, %v2641_v35  ;;  %v6043_v35 = vld [vmem:[#allocation31_spill] sm:$0xff] }
 0x995   : > { %4145 = vrcp.f32 %v2479_v33  ;;  %v2655_v30 = vpack.c.bf16 %v2640_v15, %v2639_v37  ;;  %v1101_v57 = vpop.xlane.xlu0 %1100 }
 0x996   : > { %4147 = vrcp.f32 %v1101_v57  ;;  %2721 = vrot.lane.b32.xlu1 %v2656_v11, %s4378_s26 }
 0x997   : > { %4149 = vrcp.f32 %v5708_v28  ;;  %v3658_v56 = vpop.f32.mrb[84].mxu0 }
 0x998   : > { %v4134_v8 = vpop.eup %4133  ;;  %4151 = vrcp.f32 %v5710_v40  ;;  %v2576_v48 = vpop.f32.mrb[85].mxu0  ;;  %v2645_v2 = vmul.f32 %v4130_v53, %v3658_v56 }
 0x999   : > { %v4136_v31 = vpop.eup %4135  ;;  %v3659_v22 = vpop.f32.mrb[86].mxu0  ;;  %v5737_v41 = vmul.f32 %v4134_v8, %v6041_v1  ;;  %v2643_v18 = vmul.f32 %v4132_v63, %v2576_v48  ;;  %v6045_v8 = vld [vmem:[#allocation37_spill] sm:$0xff] }
 0x99a   : > { %v1117_v38 = vpop.xlane.xlu0 %1116  ;;  %v4138_v51 = vpop.eup %4137  ;;  %v2646_v5 = vmul.f32 %v4136_v31, %v3659_v22  ;;  %2719 = vrot.lane.b32.xlu1 %v2655_v30, %s4378_s26 }
 0x99b   : > { %4153 = vrcp.f32 %v1117_v38  ;;  %v2579_v43 = vpop.f32.mrb[87].mxu0  ;;  %v1259_v23 = vpack.c.bf16 %v5717_v39, %v5737_v41 }
 0x99c   : > { %v2644_v28 = vmul.f32 %v4138_v51, %v2579_v43  ;;  %v4140_v40 = vpop.eup %4139  ;;  %v2658_v33 = vpack.c.bf16 %v2646_v5, %v2645_v2  ;;  %4155 = vrcp.f32 %v5712_v25 }
 0x99d   : > { %v4142_v10 = vpop.eup %4141  ;;  %v5743_v29 = vmul.f32 %v4140_v40, %v6042_v61  ;;  %4157 = vrcp.f32 %v5714_v6  ;;  %v2680_v6 = vpop.permute.xlu1 %2679 }
 0x99e   : > { %v2657_v27 = vpack.c.bf16 %v2644_v28, %v2643_v18  ;;  %v4144_v45 = vpop.eup %4143  ;;  %2701 = vrot.lane.b32.xlu1 %v2200_v20, %s4379_s28  ;;  %4159 = vrcp.f32 %v5725_v50  ;;  %v2749_v41 = vsel %vm862_vm0, %v1261_v60, %v2680_v6 }
 0x99f   : > { %v4146_v47 = vpop.eup %4145  ;;  %v3662_v52 = vpop.f32.mrb[88].mxu0  ;;  %v1263_v17 = vpack.c.bf16 %v5720_v3, %v5743_v29  ;;  %v5752_v24 = vmul.f32 %v4144_v45, %v6043_v35  ;;  %4161 = vrcp.f32 %v5729_v59  ;;  %v3204_v3 = vld [vmem:[%s5908_s4] ss:$0 sm:$0xff] }
 0x9a0   : > { %v4148_v12 = vpop.eup %4147  ;;  %v2592_v4 = vpop.f32.mrb[89].mxu0  ;;  %v2649_v11 = vmul.f32 %v4142_v10, %v3662_v52 }
 0x9a1   : > { %v4150_v58 = vpop.eup %4149  ;;  %v3663_v42 = vpop.f32.mrb[90].mxu0  ;;  %v5755_v37 = vmul.f32 %v4148_v12, %v6044_v21  ;;  %v2647_v14 = vmul.f32 %v4146_v47, %v2592_v4 }
 0x9a2   : > { %v4152_v15 = vpop.eup %4151  ;;  %v2650_v30 = vmul.f32 %v4150_v58, %v3663_v42  ;;  %v2595_v16 = vpop.f32.mrb[91].mxu0  ;;  %2723 = vrot.lane.b32.xlu1 %v2657_v27, %s4378_s26 }
 0x9a3   : > { %v2648_v20 = vmul.f32 %v4152_v15, %v2595_v16  ;;  %v1260_v57 = vpack.c.bf16 %v5752_v24, %v5755_v37  ;;  %v2674_v50 = vpop.permute.xlu1 %2673  ;;  %v2672_v59 = vpop.permute.xlu0 %2671 }
 0x9a4   : > { %v2660_v63 = vpack.c.bf16 %v2650_v30, %v2649_v11  ;;  %v2737_v42 = vsel %vm862_vm0, %v1257_v44, %v2672_v59  ;;  %v2740_v35 = vsel %vm862_vm0, %v1258_v13, %v2674_v50 }
 0x9a5   : > { %v4154_v53 = vpop.eup %4153  ;;  %v2659_v56 = vpack.c.bf16 %v2648_v20, %v2647_v14 }
 0x9a6   : > { %v5761_v48 = vmul.f32 %v4154_v53, %v6045_v8  ;;  %2725 = vrot.lane.b32.xlu1 %v2658_v33, %s4378_s26  ;;  %2729 = vrot.lane.b32.xlu0 %v2660_v63, %s4378_s26  ;;  %v4156_v22 = vpop.eup %4155 }
 0x9a7   : > { %v4158_v1 = vpop.eup %4157  ;;  %v2696_v33 = vpop.permute.xlu1 %2695 }
 0x9a8   : > { %v1264_v31 = vpack.c.bf16 %v5723_v54, %v5761_v48  ;;  %v4160_v2 = vpop.eup %4159  ;;  %v2682_v10 = vpop.permute.xlu0 %2681  ;;  %v2761_v15 = vsel %vm2759_vm1, %v2737_v42, %v2696_v33 }
 0x9a9   : > { %v4162_v43 = vpop.eup %4161 }
 0x9aa   : > { %2727 = vrot.lane.b32.xlu0 %v2659_v56, %s4378_s26 }
 0x9ab   : > { %v2698_v27 = vpop.permute.xlu1 %2697 }
 0x9ac   : > { %v2704_v45 = vpop.permute.xlu0 %2703  ;;  %v2763_v11 = vsel %vm2759_vm1, %v2740_v35, %v2698_v27 }
 0x9ad   : > { %v2769_v24 = vsel %vm2759_vm1, %v2749_v41, %v2704_v45 }
 0x9ae   : > { %2709 = vrot.lane.b32.xlu0 %v2204_v9, %s4379_s28 }
 0x9af   : > { %v2676_v61 = vpop.permute.xlu1 %2675 }
 0x9b0   : > { %v2706_v52 = vpop.permute.xlu0 %2705  ;;  %v2743_v26 = vsel %vm862_vm0, %v1259_v23, %v2676_v61  ;;  %v2752_v23 = vsel %vm862_vm0, %v1262_v46, %v2682_v10 }
 0x9b3   : > { %v2678_v47 = vpop.permute.xlu1 %2677 }
 0x9b4   : > { %v2684_v4 = vpop.permute.xlu0 %2683  ;;  %v2746_v20 = vsel %vm862_vm0, %v1260_v57, %v2678_v47  ;;  %v2771_v57 = vsel %vm2759_vm1, %v2752_v23, %v2706_v52 }
 0x9b5   : > { %v2755_v55 = vsel %vm862_vm0, %v1263_v17, %v2684_v4 }
 0x9b7   : > { %v2700_v12 = vpop.permute.xlu1 %2699 }
 0x9b8   : > { %v2686_v16 = vpop.permute.xlu0 %2685  ;;  %v2765_v7 = vsel %vm2759_vm1, %v2743_v26, %v2700_v12 }
 0x9b9   : > { %v2758_v46 = vsel %vm862_vm0, %v1264_v31, %v2686_v16 }
 0x9bc   : > { %v2708_v44 = vpop.permute.xlu0 %2707 }
 0x9bd   : > { %v2773_v32 = vsel %vm2759_vm1, %v2755_v55, %v2708_v44 }
 0x9cd   : > { %v3666_v38 = vpop.f32.mrb[92].mxu0 }
 0x9ce   : > { %v2608_v51 = vpop.f32.mrb[93].mxu0  ;;  %v2653_v18 = vmul.f32 %v4160_v2, %v3666_v38 }
 0x9cf   : > { %v3667_v5 = vpop.f32.mrb[94].mxu0  ;;  %v2651_v49 = vmul.f32 %v4162_v43, %v2608_v51 }
 0x9d0   : > { %v2654_v28 = vmul.f32 %v4156_v22, %v3667_v5  ;;  %v2611_v40 = vpop.f32.mrb[95].mxu0 }
 0x9d1   : > { %v2652_v34 = vmul.f32 %v4158_v1, %v2611_v40 }
 0x9d2   : > { %v2662_v9 = vpack.c.bf16 %v2654_v28, %v2653_v18 }
 0x9d3   : > { %v2661_v25 = vpack.c.bf16 %v2652_v34, %v2651_v49 }
 0x9d5   : > { %2731 = vrot.lane.b32.xlu0 %v2661_v25, %s4378_s26 }
 0x9d9   : > { %2733 = vrot.lane.b32.xlu0 %v2662_v9, %s4378_s26 }
 0xa08   : > { %v2722_v58 = vpop.permute.xlu1 %2721 }
 0xa09   : > { %v2781_v14 = vsel %vm2776_vm2, %v2763_v11, %v2722_v58 }
 0xa0c   : > { %v2720_v21 = vpop.permute.xlu1 %2719 }
 0xa0d   : > { %v2778_v30 = vsel %vm2776_vm2, %v2761_v15, %v2720_v21 }
 0xa0e   : > { %3684 = vmatprep.mubr.bf16.mxu0 %v2778_v30 }
 0xa0f   : > { %3685 = vmatmul.mubr.bf16.vlgmr.msra.gmra.mrb[96].mxu0 %v2781_v14 }
 0xa10   : > { %v2702_v0 = vpop.permute.xlu1 %2701 }
 0xa11   : > { %v2767_v53 = vsel %vm2759_vm1, %v2746_v20, %v2702_v0 }
 0xa14   : > { %v2724_v62 = vpop.permute.xlu1 %2723 }
 0xa15   : > { %v2784_v13 = vsel %vm2776_vm2, %v2765_v7, %v2724_v62 }
 0xa16   : > { %3688 = vmatprep.mubr.bf16.mxu0 %v2784_v13 }
 0xa18   : > { %v2726_v63 = vpop.permute.xlu1 %2725  ;;  %v2730_v56 = vpop.permute.xlu0 %2729 }
 0xa19   : > { %v2787_v39 = vsel %vm2776_vm2, %v2767_v53, %v2726_v63  ;;  %v2793_v22 = vsel %vm2776_vm2, %v2771_v57, %v2730_v56 }
 0xa1a   : > { %3689 = vmatmul.mubr.bf16.gmra.mrb[100].mxu0 %v2787_v39 }
 0xa1c   : > { %v2728_v37 = vpop.permute.xlu0 %2727 }
 0xa1d   : > { %v2790_v8 = vsel %vm2776_vm2, %v2769_v24, %v2728_v37 }
 0xa1e   : > { %3692 = vmatprep.mubr.bf16.mxu1 %v2790_v8 }
 0xa1f   : > { %3693 = vmatmul.mubr.bf16.vlgmr.msra.gmra.mrb[80].mxu1 %v2793_v22 }
 0xa20   : > { %v2710_v36 = vpop.permute.xlu0 %2709 }
 0xa21   : > { %v2775_v38 = vsel %vm2759_vm1, %v2758_v46, %v2710_v36 }
 0xa47   : > { %v2732_v60 = vpop.permute.xlu0 %2731 }
 0xa48   : > { %v2796_v19 = vsel %vm2776_vm2, %v2773_v32, %v2732_v60 }
 0xa49   : > { %3696 = vmatprep.mubr.bf16.mxu1 %v2796_v19 }
 0xa4b   : > { %v2734_v1 = vpop.permute.xlu0 %2733 }
 0xa4c   : > { %v2799_v51 = vsel %vm2776_vm2, %v2775_v38, %v2734_v1 }
 0xa4d   : > { %3697 = vmatmul.mubr.bf16.gmra.mrb[84].mxu1 %v2799_v51 }
 0xae2   : > { %v3686_v29 = vpop.f32.mrb[96].mxu0 }
 0xae3   : > { %v2915_v17 = vadd.f32 %v3686_v29, %v3204_v3  ;;  %v2906_v2 = vpop.f32.mrb[97].mxu0 }
 0xae4   : > { %v2907_v5 = vadd.f32 %v3204_v3, %v2906_v2  ;;  %v3687_v43 = vpop.f32.mrb[98].mxu0 }
 0xae5   : > { %2971 = vst [vmem:[%s5830_s1 + $0x10] sm:$0xff] %v2915_v17  ;;  %v2918_v54 = vadd.f32 %v3687_v43, %v3204_v3  ;;  %v2909_v48 = vpop.f32.mrb[99].mxu0 }
 0xae6   : > { %2969 = vst [vmem:[%s5830_s1] sm:$0xff] %v2907_v5  ;;  %v2910_v31 = vadd.f32 %v3204_v3, %v2909_v48 }
 0xae7   : > { %2972 = vst [vmem:[%s5830_s1 + $0x18] sm:$0xff] %v2918_v54 }
 0xae8   : > { %2970 = vst [vmem:[%s5830_s1 + $0x8] sm:$0xff] %v2910_v31 }
 0xaed   : > { %v3690_v18 = vpop.f32.mrb[100].mxu0 }
 0xaee   : > { %v2931_v28 = vadd.f32 %v3690_v18, %v3204_v3  ;;  %v2922_v40 = vpop.f32.mrb[101].mxu0 }
 0xaef   : > { %v2923_v49 = vadd.f32 %v3204_v3, %v2922_v40  ;;  %v3691_v34 = vpop.f32.mrb[102].mxu0 }
 0xaf0   : > { %2975 = vst [vmem:[%s5830_s1 + $0x30] sm:$0xff] %v2931_v28  ;;  %v2934_v9 = vadd.f32 %v3691_v34, %v3204_v3  ;;  %v2925_v25 = vpop.f32.mrb[103].mxu0 }
 0xaf1   : > { %2973 = vst [vmem:[%s5830_s1 + $0x20] sm:$0xff] %v2923_v49  ;;  %v2926_v6 = vadd.f32 %v3204_v3, %v2925_v25 }
 0xaf2   : > { %2976 = vst [vmem:[%s5830_s1 + $0x38] sm:$0xff] %v2934_v9  ;;  %v3694_v50 = vpop.f32.mrb[80].mxu1 }
 0xaf3   : > { %2974 = vst [vmem:[%s5830_s1 + $0x28] sm:$0xff] %v2926_v6  ;;  %v2947_v59 = vadd.f32 %v3694_v50, %v3204_v3  ;;  %v2938_v33 = vpop.f32.mrb[81].mxu1 }
 0xaf4   : > { %v2939_v10 = vadd.f32 %v3204_v3, %v2938_v33  ;;  %v3695_v27 = vpop.f32.mrb[82].mxu1 }
 0xaf5   : > { %2979 = vst [vmem:[%s5830_s1 + $0x50] sm:$0xff] %v2947_v59  ;;  %v2950_v61 = vadd.f32 %v3695_v27, %v3204_v3  ;;  %v2941_v45 = vpop.f32.mrb[83].mxu1 }
 0xaf6   : > { %2977 = vst [vmem:[%s5830_s1 + $0x40] sm:$0xff] %v2939_v10  ;;  %v2942_v47 = vadd.f32 %v3204_v3, %v2941_v45 }
 0xaf7   : > { %2980 = vst [vmem:[%s5830_s1 + $0x58] sm:$0xff] %v2950_v61 }
 0xaf8   : > { %2978 = vst [vmem:[%s5830_s1 + $0x48] sm:$0xff] %v2942_v47 }
 0xb20   : > { %v3698_v52 = vpop.f32.mrb[84].mxu1 }
 0xb21   : > { %v2963_v12 = vadd.f32 %v3698_v52, %v3204_v3  ;;  %v2954_v4 = vpop.f32.mrb[85].mxu1 }
 0xb22   : > { %v2955_v58 = vadd.f32 %v3204_v3, %v2954_v4  ;;  %v3699_v42 = vpop.f32.mrb[86].mxu1 }
 0xb23   : > { %2983 = vst [vmem:[%s5830_s1 + $0x70] sm:$0xff] %v2963_v12  ;;  %v2966_v35 = vadd.f32 %v3699_v42, %v3204_v3  ;;  %v2957_v21 = vpop.f32.mrb[87].mxu1 }
 0xb24   : > { %2981 = vst [vmem:[%s5830_s1 + $0x60] sm:$0xff] %v2955_v58  ;;  %v2958_v15 = vadd.f32 %v3204_v3, %v2957_v21 }
 0xb25   : > { %2984 = vst [vmem:[%s5830_s1 + $0x78] sm:$0xff] %v2966_v35 }
 0xb26   : > { %2982 = vst [vmem:[%s5830_s1 + $0x68] sm:$0xff] %v2958_v15 }
 0xb27   : > { %4290 = shalt.err (!%p4287_p0)
}
 0xb28   : > { %s4291_s26 = scalar_lea.hbm %s5850_s15, 2048  ;;  %s4295_s6 = scalar_lea.hbm %s5909_s5, 4096 }
 0xb29   : > { %p4292_p4 = scmp.ne.s32.totalorder %s5850_s15, %s4291_s26  ;;  %p4296_p12 = scmp.lt.u32.totalorder %s5850_s15, %s5909_s5 }
 0xb2a   : > { %p4297_p1 = scmp.lt.u32.totalorder %s4295_s6, %s4291_s26  ;;  %p4299_p13 = scmp.lt.u32.totalorder %s4291_s26, %s5850_s15 }
 0xb2b   : > { %p4293_p2 = pnand %p4292_p4, %p4574_p3 }
 0xb2c   : > { %p4298_p7 = por %p4297_p1, %p4296_p12 }
 0xb2d   : > { %p4294_p8 = pneg %p4293_p2 }
 0xb2e   : > { %p4300_p6 = por %p4299_p13, %p4298_p7 }
 0xb30   : > { %p4301_p10 = pnand %p4300_p6, %p4294_p8 }
 0xb32   : > { %4304 = shalt.err (!%p4301_p10)
}
 0xb33   : > { %s4382_s1 = smov 128   ;;  %s4383_s9 = smov 8  }
 0xb34   : > { %3762 = dma.vmem_to_hbm [thread:$0]  (%p4574_p3), %s5852_s8, 2048, %s5850_s15, %s2986_s21, %s4382_s1, %s4382_s1, %s4383_s9  }
 0xb35 PF: > { %s6046_s14 = sld [smem:[#allocation16_spill]]  ;;  %s3016_s27 = sand.u32 1, %s4347_s18  }
 0xb36   : > { %p6048_p5 = scmp.ge.s32.totalorder %s4367_s23, 2  ;;  %s3017_s24 = scalar_lea.sflag [#allocation5], %s3016_s27 }
 0xb3b   : > { %p6047_p11 = scmp.ne.s32.totalorder %s6046_s14, 0 }
 0xb3d   : > { %p3779_p9 = pnand %p6048_p5, %p6047_p11 }
 0xb3f   : > { %4342 = dma.done.wait (!%p3779_p9), %s3017_s24, 2048  }
 0xb40   : > { %4344 = vsyncadd (!%p3779_p9), %s3017_s24, 4294965248  ;;  %s23_s23 = sadd.s32 1, %s4367_s23   ;;  %s6049_s18 = smov %s4351_s19 }
 0xb41   : > { %p20_p0 = scmp.ge.s32.totalorder %s23_s23, 4   ;;  %s6050_s19 = smov %s4355_s20 }
 0xb42   : > { %s6051_s20 = smov %s4583_s17  ;;  %s6052_s21 = smov %s4363_s22 }
 0xb43   : > { %s6053_s22 = smov %s6055_s16  ;;  %22 = sbr.rel (!%p20_p0) target bundleno = 10 (0xa), region = 98 }
 0xb4a   :  { %3022 = vsyncpa [#allocation4], 1 }
 0xb4b   :  { %3024 = vsyncpa [#allocation4 + $0x1], 1 }
 0xb4c   :  { %3025 = vsyncpa [#allocation7], 1 }
 0xb4d   :  { %3026 = vsyncpa [#allocation10], 1 }
 0xb4e   :  { %3027 = vsyncpa [#allocation5], 1 }
 0xb4f   :  { %3029 = vsyncpa [#allocation5 + $0x1], 1 }

</bundles_post_ra>
